<compile_context>
chip_gen: v5e
topology: v5e:2x2
jax: 0.10.0
libtpu: 0.0.40
codegen_flags: <defaults>
</compile_context>

<pallas_src>
import jax
import jax.numpy as jnp
import numpy as np
from jax.experimental import pallas as pl
from jax.experimental.pallas import tpu as pltpu  # noqa: F401  (kept for TPU-targeted builds)

# ---- sizes (small, consistent with the module's forward) ---------------------
B = 2          # batch
S = 8          # sequence length (number of point-cloud chunks)
P = 64         # points per chunk
D = 3          # xyz
H_BB = 64      # backbone per-point hidden width
F = 32         # backbone output feature = rnn input_size
H = 32         # rnn hidden_size
H_HEAD = 64    # head hidden width
C = 10         # num classes
OUT_PAD = 128  # lane-padded logits width (sliced back to C in the wrapper)


# ---- kernel -------------------------------------------------------------------
def classifier_kernel(x_ref,                               # (S*B*P, D) points, (S,B) row order
                      w1_ref, b1_ref, w2_ref, b2_ref,      # backbone
                      wih_ref, whh_ref, bih_ref, bhh_ref,  # rnn (tanh)
                      wh1_ref, bh1_ref, wh2_ref, bh2_ref,  # head MLP (wh2/bh2 lane-padded)
                      out_ref):
    # ---- backbone layer 1 on the VPU: K=3 contraction as 3 broadcast FMAs
    x = x_ref[...]                                         # (S*B*P, D)
    h1 = (x[:, 0:1] * w1_ref[0:1, :]
          + x[:, 1:2] * w1_ref[1:2, :]
          + x[:, 2:3] * w1_ref[2:3, :]
          + b1_ref[...])
    h1 = jnp.maximum(h1, 0.0)                              # (S*B*P, H_BB)

    # ---- backbone layer 2 on the MXU: one fused matmul for all S chunks
    h2 = jnp.maximum(
        jnp.dot(h1, w2_ref[...], preferred_element_type=jnp.float32) + b2_ref[...],
        0.0)                                               # (S*B*P, F)

    # ---- max pool over points -> per-(step, batch) feature
    feats = jnp.max(h2.reshape(S * B, P, F), axis=1)       # (S*B, F)

    # ---- RNN input projection for ALL steps at once; both biases folded in
    pre = (jnp.dot(feats, wih_ref[...], preferred_element_type=jnp.float32)
           + bih_ref[...] + bhh_ref[...])                  # (S*B, H)

    # ---- serial Elman recurrence (torch.nn.RNN default tanh), fully unrolled.
    #      Only h @ W_hh + tanh is on the critical path.
    whh = whh_ref[...]
    h = jnp.zeros((B, H), jnp.float32)
    for s in range(S):
        h = jnp.tanh(pre[s * B:(s + 1) * B, :]
                     + jnp.dot(h, whh, preferred_element_type=jnp.float32))

    # ---- head MLP on the last-step hidden state (== x.transpose(0,1)[:, -1, :])
    z = jnp.maximum(
        jnp.dot(h, wh1_ref[...], preferred_element_type=jnp.float32) + bh1_ref[...],
        0.0)                                               # (B, H_HEAD)
    out_ref[...] = (jnp.dot(z, wh2_ref[...], preferred_element_type=jnp.float32)
                    + bh2_ref[...]).astype(out_ref.dtype)  # (B, OUT_PAD)


# ---- wrapper ------------------------------------------------------------------
def classifier_forward(x, params):
    """x: (B, S, P, D) float32 -> logits (B, C) float32."""
    (w1, b1, w2, b2, wih, whh, bih, bhh, wh1, bh1, wh2, bh2) = params

    # layout plumbing in XLA (not in-kernel): (B,S,P,D) -> (S,B,P,D) -> (S*B*P, D)
    xs = jnp.transpose(x, (1, 0, 2, 3)).reshape(S * B * P, D)

    # lane-pad the head output weights so the single logits store is lane-dense
    wh2p = jnp.zeros((H_HEAD, OUT_PAD), jnp.float32).at[:, :C].set(wh2)
    bh2p = jnp.zeros((1, OUT_PAD), jnp.float32).at[:, :C].set(bh2)

    out = pl.pallas_call(
        classifier_kernel,
        out_shape=jax.ShapeDtypeStruct((B, OUT_PAD), jnp.float32),
    )(xs, w1, b1, w2, b2, wih, whh, bih, bhh, wh1, bh1, wh2p, bh2p)
    return out[:, :C]


# ---- deterministic parameter init ----------------------------------------------
def init_params(key):
    ks = jax.random.split(key, 12)
    sc = 0.1
    w1 = sc * jax.random.normal(ks[0], (D, H_BB), jnp.float32)
    b1 = sc * jax.random.normal(ks[1], (1, H_BB), jnp.float32)
    w2 = sc * jax.random.normal(ks[2], (H_BB, F), jnp.float32)
    b2 = sc * jax.random.normal(ks[3], (1, F), jnp.float32)
    wih = sc * jax.random.normal(ks[4], (F, H), jnp.float32)    # = W_ih^T
    whh = sc * jax.random.normal(ks[5], (H, H), jnp.float32)    # = W_hh^T
    bih = sc * jax.random.normal(ks[6], (1, H), jnp.float32)
    bhh = sc * jax.random.normal(ks[7], (1, H), jnp.float32)
    wh1 = sc * jax.random.normal(ks[8], (H, H_HEAD), jnp.float32)
    bh1 = sc * jax.random.normal(ks[9], (1, H_HEAD), jnp.float32)
    wh2 = sc * jax.random.normal(ks[10], (H_HEAD, C), jnp.float32)
    bh2 = sc * jax.random.normal(ks[11], (1, C), jnp.float32)
    return (w1, b1, w2, b2, wih, whh, bih, bhh, wh1, bh1, wh2, bh2)


# ---- pure-JAX reference (mirrors the PyTorch forward) ---------------------------
def reference_forward(x, params):
    (w1, b1, w2, b2, wih, whh, bih, bhh, wh1, bh1, wh2, bh2) = params
    xs = jnp.transpose(x, (1, 0, 2, 3))              # (S, B, P, D)

    def backbone(chunk):                             # (B, P, D) -> (B, F)
        h1 = jax.nn.relu(chunk @ w1 + b1)
        h2 = jax.nn.relu(h1 @ w2 + b2)
        return jnp.max(h2, axis=1)

    feats = jax.vmap(backbone)(xs)                   # (S, B, F)
    h = jnp.zeros((B, H), jnp.float32)
    for s in range(S):                               # nn.RNN (tanh), 1 layer, unidirectional
        h = jnp.tanh(feats[s] @ wih + bih + h @ whh + bhh)
    z = jax.nn.relu(h @ wh1 + bh1)                   # head MLP on last-step output
    return z @ wh2 + bh2


# TODO(synk): only config.type=='point_cloud' + rnn_config.name=='rnn' variant implemented;
# 'conv_3d'/'pca' branches require utils.voxelization / sklearn PCA which have no in-kernel equivalent.

if __name__ == "__main__":
    key = jax.random.PRNGKey(0)
    kx, kp = jax.random.split(key)
    x = jax.random.normal(kx, (B, S, P, D), jnp.float32)
    params = init_params(kp)

    out = classifier_forward(x, params)
    out = jax.block_until_ready(out)

    ref = jax.block_until_ready(reference_forward(x, params))
    assert out.shape == (B, C), out.shape
    np.testing.assert_allclose(np.asarray(out), np.asarray(ref), rtol=1e-3, atol=1e-3)
    print("KERNEL_OK")
</pallas_src>

<mosaic_0001>
module attributes {stable_mosaic.version = 11 : i64} {
  func.func @classifier_kernel(%arg0: memref<1024x3xf32, #tpu.memory_space<vmem>>, %arg1: memref<3x64xf32, #tpu.memory_space<vmem>>, %arg2: memref<1x64xf32, #tpu.memory_space<vmem>>, %arg3: memref<64x32xf32, #tpu.memory_space<vmem>>, %arg4: memref<1x32xf32, #tpu.memory_space<vmem>>, %arg5: memref<32x32xf32, #tpu.memory_space<vmem>>, %arg6: memref<32x32xf32, #tpu.memory_space<vmem>>, %arg7: memref<1x32xf32, #tpu.memory_space<vmem>>, %arg8: memref<1x32xf32, #tpu.memory_space<vmem>>, %arg9: memref<32x64xf32, #tpu.memory_space<vmem>>, %arg10: memref<1x64xf32, #tpu.memory_space<vmem>>, %arg11: memref<64x128xf32, #tpu.memory_space<vmem>>, %arg12: memref<1x128xf32, #tpu.memory_space<vmem>>, %arg13: memref<2x128xf32, #tpu.memory_space<vmem>>) attributes {dimension_semantics = [], scalar_prefetch = 0 : i64, scratch_operands = 0 : i64, tpu.core_type = #tpu.core_type<tc>} {
    %c0 = arith.constant 0 : index
    %c0_0 = arith.constant 0 : index
    %0 = vector.load %arg0[%c0, %c0_0] : memref<1024x3xf32, #tpu.memory_space<vmem>>, vector<1024x3xf32>
    %1 = vector.extract_strided_slice %0 {offsets = [0, 0], sizes = [1024, 1], strides = [1, 1]} : vector<1024x3xf32> to vector<1024x1xf32>
    %c0_1 = arith.constant 0 : index
    %c0_2 = arith.constant 0 : index
    %2 = vector.load %arg1[%c0_1, %c0_2] : memref<3x64xf32, #tpu.memory_space<vmem>>, vector<1x64xf32>
    %3 = vector.broadcast %1 : vector<1024x1xf32> to vector<1024x64xf32>
    %4 = vector.broadcast %2 : vector<1x64xf32> to vector<1024x64xf32>
    %5 = arith.mulf %3, %4 : vector<1024x64xf32>
    %6 = vector.extract_strided_slice %0 {offsets = [0, 1], sizes = [1024, 1], strides = [1, 1]} : vector<1024x3xf32> to vector<1024x1xf32>
    %c1 = arith.constant 1 : index
    %c0_3 = arith.constant 0 : index
    %7 = vector.load %arg1[%c1, %c0_3] : memref<3x64xf32, #tpu.memory_space<vmem>>, vector<1x64xf32>
    %8 = vector.broadcast %6 : vector<1024x1xf32> to vector<1024x64xf32>
    %9 = vector.broadcast %7 : vector<1x64xf32> to vector<1024x64xf32>
    %10 = arith.mulf %8, %9 : vector<1024x64xf32>
    %11 = arith.addf %5, %10 : vector<1024x64xf32>
    %12 = vector.extract_strided_slice %0 {offsets = [0, 2], sizes = [1024, 1], strides = [1, 1]} : vector<1024x3xf32> to vector<1024x1xf32>
    %c2 = arith.constant 2 : index
    %c0_4 = arith.constant 0 : index
    %13 = vector.load %arg1[%c2, %c0_4] : memref<3x64xf32, #tpu.memory_space<vmem>>, vector<1x64xf32>
    %14 = vector.broadcast %12 : vector<1024x1xf32> to vector<1024x64xf32>
    %15 = vector.broadcast %13 : vector<1x64xf32> to vector<1024x64xf32>
    %16 = arith.mulf %14, %15 : vector<1024x64xf32>
    %17 = arith.addf %11, %16 : vector<1024x64xf32>
    %c0_5 = arith.constant 0 : index
    %c0_6 = arith.constant 0 : index
    %18 = vector.load %arg2[%c0_5, %c0_6] : memref<1x64xf32, #tpu.memory_space<vmem>>, vector<1x64xf32>
    %19 = vector.broadcast %18 : vector<1x64xf32> to vector<1024x64xf32>
    %20 = arith.addf %17, %19 : vector<1024x64xf32>
    %cst = arith.constant 0.000000e+00 : f32
    %21 = vector.broadcast %cst : f32 to vector<1024x64xf32>
    %22 = arith.maximumf %20, %21 : vector<1024x64xf32>
    %c0_7 = arith.constant 0 : index
    %c0_8 = arith.constant 0 : index
    %23 = vector.load %arg3[%c0_7, %c0_8] : memref<64x32xf32, #tpu.memory_space<vmem>>, vector<64x32xf32>
    %cst_9 = arith.constant dense<0.000000e+00> : vector<1024x32xf32>
    %24 = tpu.matmul %22, %23, %cst_9 {dimension_numbers = #tpu.dot_dimension_numbers<[1], [0], [0], [1], [0, 0, 1, 1], [], []>} : vector<1024x64xf32>, vector<64x32xf32>, vector<1024x32xf32> -> vector<1024x32xf32>
    %c0_10 = arith.constant 0 : index
    %c0_11 = arith.constant 0 : index
    %25 = vector.load %arg4[%c0_10, %c0_11] : memref<1x32xf32, #tpu.memory_space<vmem>>, vector<1x32xf32>
    %26 = vector.broadcast %25 : vector<1x32xf32> to vector<1024x32xf32>
    %27 = arith.addf %24, %26 : vector<1024x32xf32>
    %cst_12 = arith.constant 0.000000e+00 : f32
    %28 = vector.broadcast %cst_12 : f32 to vector<1024x32xf32>
    %29 = arith.maximumf %27, %28 : vector<1024x32xf32>
    %30 = vector.shape_cast %29 : vector<1024x32xf32> to vector<16x64x32xf32>
    %cst_13 = arith.constant dense<0xFF800000> : vector<16x32xf32>
    %31 = vector.multi_reduction <maximumf>, %30, %cst_13 [1] : vector<16x64x32xf32> to vector<16x32xf32>
    %c0_14 = arith.constant 0 : index
    %c0_15 = arith.constant 0 : index
    %32 = vector.load %arg5[%c0_14, %c0_15] : memref<32x32xf32, #tpu.memory_space<vmem>>, vector<32x32xf32>
    %cst_16 = arith.constant dense<0.000000e+00> : vector<16x32xf32>
    %33 = tpu.matmul %31, %32, %cst_16 {dimension_numbers = #tpu.dot_dimension_numbers<[1], [0], [0], [1], [0, 0, 1, 1], [], []>} : vector<16x32xf32>, vector<32x32xf32>, vector<16x32xf32> -> vector<16x32xf32>
    %c0_17 = arith.constant 0 : index
    %c0_18 = arith.constant 0 : index
    %34 = vector.load %arg7[%c0_17, %c0_18] : memref<1x32xf32, #tpu.memory_space<vmem>>, vector<1x32xf32>
    %35 = vector.broadcast %34 : vector<1x32xf32> to vector<16x32xf32>
    %36 = arith.addf %33, %35 : vector<16x32xf32>
    %c0_19 = arith.constant 0 : index
    %c0_20 = arith.constant 0 : index
    %37 = vector.load %arg8[%c0_19, %c0_20] : memref<1x32xf32, #tpu.memory_space<vmem>>, vector<1x32xf32>
    %38 = vector.broadcast %37 : vector<1x32xf32> to vector<16x32xf32>
    %39 = arith.addf %36, %38 : vector<16x32xf32>
    %c0_21 = arith.constant 0 : index
    %c0_22 = arith.constant 0 : index
    %40 = vector.load %arg6[%c0_21, %c0_22] : memref<32x32xf32, #tpu.memory_space<vmem>>, vector<32x32xf32>
    %cst_23 = arith.constant 0.000000e+00 : f32
    %41 = vector.broadcast %cst_23 : f32 to vector<2x32xf32>
    %42 = vector.extract_strided_slice %39 {offsets = [0, 0], sizes = [2, 32], strides = [1, 1]} : vector<16x32xf32> to vector<2x32xf32>
    %cst_24 = arith.constant dense<0.000000e+00> : vector<2x32xf32>
    %43 = tpu.matmul %41, %40, %cst_24 {dimension_numbers = #tpu.dot_dimension_numbers<[1], [0], [0], [1], [0, 0, 1, 1], [], []>} : vector<2x32xf32>, vector<32x32xf32>, vector<2x32xf32> -> vector<2x32xf32>
    %44 = arith.addf %42, %43 : vector<2x32xf32>
    %45 = math.tanh %44 : vector<2x32xf32>
    %46 = vector.extract_strided_slice %39 {offsets = [2, 0], sizes = [2, 32], strides = [1, 1]} : vector<16x32xf32> to vector<2x32xf32>
    %cst_25 = arith.constant dense<0.000000e+00> : vector<2x32xf32>
    %47 = tpu.matmul %45, %40, %cst_25 {dimension_numbers = #tpu.dot_dimension_numbers<[1], [0], [0], [1], [0, 0, 1, 1], [], []>} : vector<2x32xf32>, vector<32x32xf32>, vector<2x32xf32> -> vector<2x32xf32>
    %48 = arith.addf %46, %47 : vector<2x32xf32>
    %49 = math.tanh %48 : vector<2x32xf32>
    %50 = vector.extract_strided_slice %39 {offsets = [4, 0], sizes = [2, 32], strides = [1, 1]} : vector<16x32xf32> to vector<2x32xf32>
    %cst_26 = arith.constant dense<0.000000e+00> : vector<2x32xf32>
    %51 = tpu.matmul %49, %40, %cst_26 {dimension_numbers = #tpu.dot_dimension_numbers<[1], [0], [0], [1], [0, 0, 1, 1], [], []>} : vector<2x32xf32>, vector<32x32xf32>, vector<2x32xf32> -> vector<2x32xf32>
    %52 = arith.addf %50, %51 : vector<2x32xf32>
    %53 = math.tanh %52 : vector<2x32xf32>
    %54 = vector.extract_strided_slice %39 {offsets = [6, 0], sizes = [2, 32], strides = [1, 1]} : vector<16x32xf32> to vector<2x32xf32>
    %cst_27 = arith.constant dense<0.000000e+00> : vector<2x32xf32>
    %55 = tpu.matmul %53, %40, %cst_27 {dimension_numbers = #tpu.dot_dimension_numbers<[1], [0], [0], [1], [0, 0, 1, 1], [], []>} : vector<2x32xf32>, vector<32x32xf32>, vector<2x32xf32> -> vector<2x32xf32>
    %56 = arith.addf %54, %55 : vector<2x32xf32>
    %57 = math.tanh %56 : vector<2x32xf32>
    %58 = vector.extract_strided_slice %39 {offsets = [8, 0], sizes = [2, 32], strides = [1, 1]} : vector<16x32xf32> to vector<2x32xf32>
    %cst_28 = arith.constant dense<0.000000e+00> : vector<2x32xf32>
    %59 = tpu.matmul %57, %40, %cst_28 {dimension_numbers = #tpu.dot_dimension_numbers<[1], [0], [0], [1], [0, 0, 1, 1], [], []>} : vector<2x32xf32>, vector<32x32xf32>, vector<2x32xf32> -> vector<2x32xf32>
    %60 = arith.addf %58, %59 : vector<2x32xf32>
    %61 = math.tanh %60 : vector<2x32xf32>
    %62 = vector.extract_strided_slice %39 {offsets = [10, 0], sizes = [2, 32], strides = [1, 1]} : vector<16x32xf32> to vector<2x32xf32>
    %cst_29 = arith.constant dense<0.000000e+00> : vector<2x32xf32>
    %63 = tpu.matmul %61, %40, %cst_29 {dimension_numbers = #tpu.dot_dimension_numbers<[1], [0], [0], [1], [0, 0, 1, 1], [], []>} : vector<2x32xf32>, vector<32x32xf32>, vector<2x32xf32> -> vector<2x32xf32>
    %64 = arith.addf %62, %63 : vector<2x32xf32>
    %65 = math.tanh %64 : vector<2x32xf32>
    %66 = vector.extract_strided_slice %39 {offsets = [12, 0], sizes = [2, 32], strides = [1, 1]} : vector<16x32xf32> to vector<2x32xf32>
    %cst_30 = arith.constant dense<0.000000e+00> : vector<2x32xf32>
    %67 = tpu.matmul %65, %40, %cst_30 {dimension_numbers = #tpu.dot_dimension_numbers<[1], [0], [0], [1], [0, 0, 1, 1], [], []>} : vector<2x32xf32>, vector<32x32xf32>, vector<2x32xf32> -> vector<2x32xf32>
    %68 = arith.addf %66, %67 : vector<2x32xf32>
    %69 = math.tanh %68 : vector<2x32xf32>
    %70 = vector.extract_strided_slice %39 {offsets = [14, 0], sizes = [2, 32], strides = [1, 1]} : vector<16x32xf32> to vector<2x32xf32>
    %cst_31 = arith.constant dense<0.000000e+00> : vector<2x32xf32>
    %71 = tpu.matmul %69, %40, %cst_31 {dimension_numbers = #tpu.dot_dimension_numbers<[1], [0], [0], [1], [0, 0, 1, 1], [], []>} : vector<2x32xf32>, vector<32x32xf32>, vector<2x32xf32> -> vector<2x32xf32>
    %72 = arith.addf %70, %71 : vector<2x32xf32>
    %73 = math.tanh %72 : vector<2x32xf32>
    %c0_32 = arith.constant 0 : index
    %c0_33 = arith.constant 0 : index
    %74 = vector.load %arg9[%c0_32, %c0_33] : memref<32x64xf32, #tpu.memory_space<vmem>>, vector<32x64xf32>
    %cst_34 = arith.constant dense<0.000000e+00> : vector<2x64xf32>
    %75 = tpu.matmul %73, %74, %cst_34 {dimension_numbers = #tpu.dot_dimension_numbers<[1], [0], [0], [1], [0, 0, 1, 1], [], []>} : vector<2x32xf32>, vector<32x64xf32>, vector<2x64xf32> -> vector<2x64xf32>
    %c0_35 = arith.constant 0 : index
    %c0_36 = arith.constant 0 : index
    %76 = vector.load %arg10[%c0_35, %c0_36] : memref<1x64xf32, #tpu.memory_space<vmem>>, vector<1x64xf32>
    %77 = vector.broadcast %76 : vector<1x64xf32> to vector<2x64xf32>
    %78 = arith.addf %75, %77 : vector<2x64xf32>
    %cst_37 = arith.constant 0.000000e+00 : f32
    %79 = vector.broadcast %cst_37 : f32 to vector<2x64xf32>
    %80 = arith.maximumf %78, %79 : vector<2x64xf32>
    %c0_38 = arith.constant 0 : index
    %c0_39 = arith.constant 0 : index
    %81 = vector.load %arg11[%c0_38, %c0_39] : memref<64x128xf32, #tpu.memory_space<vmem>>, vector<64x128xf32>
    %cst_40 = arith.constant dense<0.000000e+00> : vector<2x128xf32>
    %82 = tpu.matmul %80, %81, %cst_40 {dimension_numbers = #tpu.dot_dimension_numbers<[1], [0], [0], [1], [0, 0, 1, 1], [], []>} : vector<2x64xf32>, vector<64x128xf32>, vector<2x128xf32> -> vector<2x128xf32>
    %c0_41 = arith.constant 0 : index
    %c0_42 = arith.constant 0 : index
    %83 = vector.load %arg12[%c0_41, %c0_42] : memref<1x128xf32, #tpu.memory_space<vmem>>, vector<1x128xf32>
    %84 = vector.broadcast %83 : vector<1x128xf32> to vector<2x128xf32>
    %85 = arith.addf %82, %84 : vector<2x128xf32>
    %c0_43 = arith.constant 0 : index
    %c0_44 = arith.constant 0 : index
    %86 = vector.load %arg13[%c0_43, %c0_44] : memref<2x128xf32, #tpu.memory_space<vmem>>, vector<2x128xf32>
    tpu.vector_store %arg13[%c0_43, %c0_44], %85 {strides = array<i32>} : memref<2x128xf32, #tpu.memory_space<vmem>>, vector<2x128xf32>,
    return
  }
}

</mosaic_0001>

<bundles_post_ra>
// kernel: tpu_custom_call.1
= control target key start
LH: loop header
LB: loop body
LE: loop exit
PB: predicated region body
PF: predicated region fallthrough
CT: control target
= control target key end

     0   :  { %v7811_v3 = vmov 2   ;;  %v7809_v4 = vmov 0   ;;  %s7793_s0 = inlined_call_operand.vmem [shape: f32[1024,3], index: 0, kind: input, shape index: {}]   ;;  %s7794_s1 = inlined_call_operand.vmem [shape: f32[3,64], index: 1, kind: input, shape index: {}]   ;;  %s7795_s2 = inlined_call_operand.vmem [shape: f32[1,64], index: 2, kind: input, shape index: {}]   ;;  %s7796_s3 = inlined_call_operand.vmem [shape: f32[64,32], index: 3, kind: input, shape index: {}]   ;;  %s7797_s4 = inlined_call_operand.vmem [shape: f32[1,32], index: 4, kind: input, shape index: {}]   ;;  %s7798_s5 = inlined_call_operand.vmem [shape: f32[32,32], index: 5, kind: input, shape index: {}]   ;;  %s7799_s6 = inlined_call_operand.vmem [shape: f32[32,32], index: 6, kind: input, shape index: {}]   ;;  %s7800_s7 = inlined_call_operand.vmem [shape: f32[1,32], index: 7, kind: input, shape index: {}]   ;;  %s7801_s8 = inlined_call_operand.vmem [shape: f32[1,32], index: 8, kind: input, shape index: {}]   ;;  %s7802_s9 = inlined_call_operand.vmem [shape: f32[32,64], index: 9, kind: input, shape index: {}]   ;;  %s7803_s10 = inlined_call_operand.vmem [shape: f32[1,64], index: 10, kind: input, shape index: {}]   ;;  %s7804_s11 = inlined_call_operand.vmem [shape: f32[64,128], index: 11, kind: input, shape index: {}]   ;;  %s7805_s12 = inlined_call_operand.vmem [shape: f32[1,128], index: 12, kind: input, shape index: {}]   ;;  %s7806_s13 = inlined_call_operand.hbm [shape: f32[2,128], index: 13, kind: output, shape index: {}]  }
   0x1   :  { %v4912_v0 = vld [vmem:[%s7793_s0 + $0x20] sm:$0xff]  ;;  %v4917_v1 = vld [vmem:[%s7793_s0 + $0x18] sm:$0xff]  ;;  %v4922_v2 = vld [vmem:[%s7793_s0 + $0x10] sm:$0xff]  ;;  %4570 = vset.pattern.permute.xlu0 %v7811_v3  ;;  %4565 = vset.pattern.permute.xlu2 %v7809_v4 }
   0x2   :  { %4564 = vset.pattern.permute.xlu1 %v7809_v4  ;;  %196 = vperm.xlu2 %4565, %v4912_v0   ;;  %v4933_v5 = vld [vmem:[%s7793_s0 + $0x28] sm:$0xff] }
   0x3   :  { %1727 = vperm.xlu0 %4570, %v4917_v1   ;;  %186 = vperm.xlu1 %4564, %v4922_v2  }
   0x4   :  { %18 = vsyncpa [#allocation3], 0  ;;  %v4938_v6 = vld [vmem:[%s7793_s0 + $0x118] sm:$0xff]  ;;  %v4946_v7 = vld [vmem:[%s7793_s0 + $0x40] sm:$0xff]  ;;  %v7807_v21 = vmov 1   ;;  %vm2755_vm0 = vcmask 523264  }
   0x5   :  { %v4951_v8 = vld [vmem:[%s7793_s0 + $0x50] sm:$0xff]  ;;  %v4956_v9 = vld [vmem:[%s7793_s0 + $0x38] sm:$0xff]  ;;  %v4969_v11 = vld [vmem:[%s7793_s0 + $0x140] sm:$0xff]  ;;  %vm3669_vm1 = vcmask 261120   ;;  %vm4030_vm2 = vcmask 1041409   ;;  %vm4032_vm3 = vcmask 1042434  }
   0x6   :  { %v4964_v10 = vld [vmem:[%s7793_s0 + $0x58] sm:$0xff]  ;;  %v4977_v12 = vld [vmem:[%s7793_s0 + $0x70] sm:$0xff]  ;;  %v4987_v14 = vld [vmem:[%s7793_s0 + $0x68] sm:$0xff]  ;;  %vm4034_vm4 = vcmask 1043459   ;;  %vm4036_vm5 = vcmask 1044484   ;;  %vm4038_vm6 = vcmask 1045509  }
   0x7   :  { %v4982_v13 = vld [vmem:[%s7793_s0 + $0x78] sm:$0xff]  ;;  %v4995_v15 = vld [vmem:[%s7793_s0 + $0x88] sm:$0xff]  ;;  %v5005_v17 = vld [vmem:[%s7793_s0 + $0x80] sm:$0xff]  ;;  %vm4040_vm7 = vcmask 1046534   ;;  %vm4042_vm8 = vcmask 1047559   ;;  %s4838_s30 = smov [#allocation2]  }
   0x8   :  { %v5000_v16 = vld [vmem:[%s7793_s0 + $0x168] sm:$0xff]  ;;  %v5013_v18 = vld [vmem:[%s7793_s0 + $0xa0] sm:$0xff]  ;;  %v5018_v19 = vld [vmem:[%s7793_s0 + $0x98] sm:$0xff]  ;;  %s4385_s14 = sshll.u32 %s4838_s30, 4  ;;  %s4386_s14 = int_to_ptr.vmem [resolvable:$true] %s4385_s14 }
   0x9   :  { %v5023_v20 = vld [vmem:[%s7793_s0 + $0x8] sm:$0xff]  ;;  %v68_v22 = vld [vmem:[%s7793_s0 + $0xb8] sm:$0xff]  ;;  %v5035_v23 = vld [vmem:[%s7793_s0 + $0xb0] sm:$0xff] }
   0xa   :  { %201 = vperm.xlu2 %4565, %v4933_v5   ;;  %v5040_v24 = vld [vmem:[%s7793_s0 + $0x30] sm:$0xff]  ;;  %v70_v26 = vld [vmem:[%s7793_s0 + $0xc8] sm:$0xff]  ;;  %v73_v29 = vld [vmem:[%s7793_s0 + $0xe0] sm:$0xff] }
   0xb   :  { %1855 = vperm.xlu0 %4570, %v4938_v6   ;;  %191 = vperm.xlu1 %4564, %v4917_v1   ;;  %v71_v25 = vld [vmem:[%s7793_s0 + $0xd0] sm:$0xff]  ;;  %v5053_v27 = vld [vmem:[%s7793_s0 + $0x48] sm:$0xff]  ;;  %v5065_v30 = vld [vmem:[%s7793_s0 + $0x138] sm:$0xff] }
   0xc   :  { %v74_v28 = vld [vmem:[%s7793_s0 + $0xe8] sm:$0xff]  ;;  %v77_v31 = vld [vmem:[%s7793_s0 + $0x100] sm:$0xff]  ;;  %v76_v32 = vld [vmem:[%s7793_s0 + $0xf8] sm:$0xff] }
   0xd   :  { %v79_v33 = vld [vmem:[%s7793_s0 + $0x110] sm:$0xff]  ;;  %v5081_v34 = vld [vmem:[%s7793_s0 + $0x160] sm:$0xff]  ;;  %v5095_v37 = vld [vmem:[%s7793_s0 + $0x128] sm:$0xff] }
   0xe   :  { %v5090_v36 = vld [vmem:[%s7793_s0 + $0x130] sm:$0xff]  ;;  %v5105_v39 = vld [vmem:[%s7793_s0 + $0x148] sm:$0xff]  ;;  %v5117_v42 = vld [vmem:[%s7793_s0 + $0x158] sm:$0xff] }
   0xf   :  { %v94_v40 = vld [vmem:[%s7793_s0 + $0x188] sm:$0xff]  ;;  %v5130_v46 = vld [vmem:[%s7793_s0 + $0x178] sm:$0xff]  ;;  %v5135_v47 = vld [vmem:[%s7793_s0 + $0x170] sm:$0xff] }
  0x10   :  { %v115_v48 = vld [vmem:[%s7793_s0 + $0x230] sm:$0xff]  ;;  %v5154_v53 = vld [vmem:[%s7793_s0 + $0xd8] sm:$0xff]  ;;  %v98_v57 = vld [vmem:[%s7793_s0 + $0x1a8] sm:$0xff] }
  0x11   :  { %v95_v52 = vld [vmem:[%s7793_s0 + $0x190] sm:$0xff]  ;;  %v5169_v58 = vld [vmem:[%s7793_s0 + $0x1a0] sm:$0xff]  ;;  %v5184_v63 = vld [vmem:[%s7793_s0 + $0x1b8] sm:$0xff] }
  0x12   :  { %216 = vperm.xlu2 %4565, %v4946_v7   ;;  %7824 = vst [vmem:[#allocation7_spill] sm:$0xff] %v5169_v58  ;;  %v101_v59 = vld [vmem:[%s7793_s0 + $0x1c0] sm:$0xff] }
  0x13   :  { %1755 = vperm.xlu0 %4570, %v4951_v8   ;;  %211 = vperm.xlu1 %4564, %v4956_v9   ;;  %7826 = vst [vmem:[#allocation9_spill] sm:$0xff] %v5184_v63 }
  0x1a   :  { %231 = vperm.xlu2 %4565, %v4964_v10  }
  0x1b   :  { %1875 = vperm.xlu0 %4570, %v4969_v11   ;;  %226 = vperm.xlu1 %4564, %v4951_v8  }
  0x22   :  { %246 = vperm.xlu2 %4565, %v4977_v12  }
  0x23   :  { %1775 = vperm.xlu0 %4570, %v4982_v13   ;;  %241 = vperm.xlu1 %4564, %v4987_v14  }
  0x2a   :  { %261 = vperm.xlu2 %4565, %v4995_v15  }
  0x2b   :  { %1895 = vperm.xlu0 %4570, %v5000_v16   ;;  %256 = vperm.xlu1 %4564, %v5005_v17  }
  0x32   :  { %276 = vperm.xlu2 %4565, %v5013_v18  }
  0x33   :  { %4591 = vset.pattern.permute.xlu0 %v7807_v21  ;;  %271 = vperm.xlu1 %4564, %v5018_v19   ;;  %v110_v21 = vld [vmem:[%s7793_s0 + $0x208] sm:$0xff] }
  0x34   :  { %949 = vperm.xlu0 %4591, %v5023_v20  }
  0x3a   :  { %291 = vperm.xlu2 %4565, %v68_v22  }
  0x3b   :  { %286 = vperm.xlu1 %4564, %v5035_v23  }
  0x3c   :  { %969 = vperm.xlu0 %4591, %v5040_v24  }
  0x42   :  { %306 = vperm.xlu2 %4565, %v71_v25  }
  0x43   :  { %301 = vperm.xlu1 %4564, %v70_v26  }
  0x44   :  { %981 = vperm.xlu0 %4591, %v5053_v27  }
  0x4a   :  { %321 = vperm.xlu2 %4565, %v74_v28   ;;  %v104_v28 = vld [vmem:[%s7793_s0 + $0x1d8] sm:$0xff] }
  0x4b   :  { %316 = vperm.xlu1 %4564, %v73_v29   ;;  %v103_v29 = vld [vmem:[%s7793_s0 + $0x1d0] sm:$0xff] }
  0x4c   :  { %1101 = vperm.xlu0 %4591, %v5065_v30  }
  0x52   :  { %336 = vperm.xlu2 %4565, %v77_v31   ;;  %v5202_v31 = vld [vmem:[%s7793_s0 + $0x1e0] sm:$0xff] }
  0x53   :  { %331 = vperm.xlu1 %4564, %v76_v32  }
  0x54   :  { %1001 = vperm.xlu0 %4591, %v4977_v12  }
  0x5a   :  { %351 = vperm.xlu2 %4565, %v4938_v6  }
  0x5b   :  { %346 = vperm.xlu1 %4564, %v79_v33  }
  0x5c   :  { %1121 = vperm.xlu0 %4591, %v5081_v34   ;;  %v5085_v35 = vpop.permute.xlu2 %196 }
  0x62   :  { %366 = vperm.xlu2 %4565, %v5090_v36  }
  0x63   :  { %361 = vperm.xlu1 %4564, %v5095_v37  }
  0x64   :  { %1021 = vperm.xlu0 %4591, %v5018_v19   ;;  %v5100_v38 = vpop.permute.xlu2 %201 }
  0x6a   :  { %381 = vperm.xlu2 %4565, %v5105_v39  }
  0x6b   :  { %376 = vperm.xlu1 %4564, %v4969_v11  }
  0x6c   :  { %1141 = vperm.xlu0 %4591, %v94_v40   ;;  %v5112_v41 = vpop.permute.xlu2 %216 }
  0x72   :  { %396 = vperm.xlu2 %4565, %v5081_v34  }
  0x73   :  { %391 = vperm.xlu1 %4564, %v5117_v42  }
  0x74   :  { %1037 = vperm.xlu0 %4591, %v68_v22   ;;  %v5121_v43 = vpop.permute.xlu2 %231 }
  0x75   :  { %v5123_v44 = vpop.permute.xlu1 %186  ;;  %v5125_v45 = vpop.permute.xlu0 %1727 }
  0x7a   :  { %411 = vperm.xlu2 %4565, %v5130_v46  }
  0x7b   :  { %406 = vperm.xlu1 %4564, %v5135_v47  }
  0x7c   :  { %1225 = vperm.xlu0 %4591, %v115_v48   ;;  %v5142_v49 = vpop.permute.xlu2 %246  ;;  %v107_v48 = vld [vmem:[%s7793_s0 + $0x1f0] sm:$0xff] }
  0x7d   :  { %7822 = vst [vmem:[#allocation5_spill] sm:$0xff] %v5142_v49  ;;  %v5144_v50 = vpop.permute.xlu1 %191  ;;  %v5146_v51 = vpop.permute.xlu0 %1855 }
  0x82   :  { %426 = vperm.xlu2 %4565, %v95_v52   ;;  %v106_v52 = vld [vmem:[%s7793_s0 + $0x1e8] sm:$0xff] }
  0x83   :  { %421 = vperm.xlu1 %4564, %v94_v40  }
  0x84   :  { %1053 = vperm.xlu0 %4591, %v5154_v53   ;;  %v5157_v54 = vpop.permute.xlu2 %261 }
  0x85   :  { %7823 = vst [vmem:[#allocation6_spill] sm:$0xff] %v5157_v54  ;;  %v5159_v55 = vpop.permute.xlu1 %211  ;;  %v5161_v56 = vpop.permute.xlu0 %1755 }
  0x8a   :  { %441 = vperm.xlu2 %4565, %v98_v57   ;;  %v45_v57 = vld [vmem:[%s7793_s0] sm:$0xff] }
  0x8b   :  { %436 = vperm.xlu1 %4564, %v5169_v58  }
  0x8c   :  { %1169 = vperm.xlu0 %4591, %v101_v59   ;;  %v5175_v60 = vpop.permute.xlu2 %276 }
  0x8d   :  { %7825 = vst [vmem:[#allocation8_spill] sm:$0xff] %v5175_v60  ;;  %v5177_v61 = vpop.permute.xlu1 %226  ;;  %v5179_v62 = vpop.permute.xlu0 %1875 }
  0x92   :  { %456 = vperm.xlu2 %4565, %v101_v59  }
  0x93   :  { %451 = vperm.xlu1 %4564, %v5184_v63  }
  0x94   :  { %1069 = vperm.xlu0 %4591, %v76_v32   ;;  %v5187_v22 = vpop.permute.xlu2 %291 }
  0x95   :  { %7827 = vst [vmem:[#allocation10_spill] sm:$0xff] %v5187_v22  ;;  %v5189_v25 = vpop.permute.xlu1 %241  ;;  %v5191_v26 = vpop.permute.xlu0 %1775  ;;  %v7839_v22 = vmov 2  }
  0x96   :  { %7828 = vst [vmem:[#allocation11_spill] sm:$0xff] %v5189_v25 }
  0x97   :  { %7829 = vst [vmem:[#allocation12_spill] sm:$0xff] %v5191_v26 }
  0x9a   :  { %471 = vperm.xlu2 %4565, %v104_v28  }
  0x9b   :  { %466 = vperm.xlu1 %4564, %v103_v29  }
  0x9c   :  { %1185 = vperm.xlu0 %4591, %v5202_v31   ;;  %v5205_v32 = vpop.permute.xlu2 %306 }
  0x9d   :  { %7830 = vst [vmem:[#allocation13_spill] sm:$0xff] %v5205_v32  ;;  %v5207_v33 = vpop.permute.xlu1 %256  ;;  %v5209_v40 = vpop.permute.xlu0 %1895  ;;  %v5248_v32 = vld [vmem:[%s7793_s0 + $0x218] sm:$0xff] }
  0x9e   :  { %7831 = vst [vmem:[#allocation14_spill] sm:$0xff] %v5207_v33 }
  0x9f   :  { %7832 = vst [vmem:[#allocation15_spill] sm:$0xff] %v5209_v40 }
  0xa0   :  { %7837 = vst [vmem:[#allocation20_spill] sm:$0xff] %v5248_v32 }
  0xa2   :  { %486 = vperm.xlu2 %4565, %v107_v48   ;;  %v109_v48 = vld [vmem:[%s7793_s0 + $0x200] sm:$0xff] }
  0xa3   :  { %481 = vperm.xlu1 %4564, %v106_v52  }
  0xa4   :  { %4635 = vset.pattern.permute.xlu0 %v7809_v4  ;;  %v5221_v59 = vpop.permute.xlu2 %321 }
  0xa5   :  { %7833 = vst [vmem:[#allocation16_spill] sm:$0xff] %v5221_v59  ;;  %v5223_v28 = vpop.permute.xlu1 %271  ;;  %176 = vperm.xlu0 %4635, %v45_v57   ;;  %v5243_v59 = vld [vmem:[%s7793_s0 + $0x220] sm:$0xff] }
  0xa6   :  { %7834 = vst [vmem:[#allocation17_spill] sm:$0xff] %v5223_v28  ;;  %v5225_v29 = vpop.permute.xlu0 %949 }
  0xaa   :  { %501 = vperm.xlu2 %4565, %v110_v21  }
  0xab   :  { %496 = vperm.xlu1 %4564, %v109_v48  }
  0xac   :  { %v5233_v52 = vpop.permute.xlu2 %336 }
  0xad   :  { %7835 = vst [vmem:[#allocation18_spill] sm:$0xff] %v5233_v52  ;;  %v5235_v4 = vpop.permute.xlu1 %286  ;;  %181 = vperm.xlu0 %4635, %v5023_v20  }
  0xae   :  { %7836 = vst [vmem:[#allocation19_spill] sm:$0xff] %v5235_v4  ;;  %v5238_v3 = vpop.permute.xlu0 %969  ;;  %v7840_v4 = vmov 1  }
  0xb2   :  { %516 = vperm.xlu2 %4565, %v5243_v59  }
  0xb3   :  { %511 = vperm.xlu1 %4564, %v5248_v32  }
  0xb4   :  { %v5252_v21 = vpop.permute.xlu2 %351 }
  0xb5   :  { %v5254_v48 = vpop.permute.xlu1 %301  ;;  %206 = vperm.xlu0 %4635, %v5040_v24  }
  0xb6   :  { %7838 = vst [vmem:[#allocation21_spill] sm:$0xff] %v5254_v48  ;;  %v5257_v52 = vpop.permute.xlu0 %981  ;;  %v5271_v48 = vld [vmem:[%s7793_s0 + $0x60] sm:$0xff] }
  0xba   :  { %4567 = vset.pattern.permute.xlu2 %v7839_v22 }
  0xbb   :  { %4566 = vset.pattern.permute.xlu1 %v7840_v4  ;;  %1715 = vperm.xlu2 %4567, %v45_v57  }
  0xbc   :  { %945 = vperm.xlu1 %4566, %v45_v57   ;;  %v5261_v60 = vpop.permute.xlu2 %366 }
  0xbd   :  { %v5263_v28 = vpop.permute.xlu1 %316  ;;  %221 = vperm.xlu0 %4635, %v5053_v27  }
  0xbe   :  { %7841 = vst [vmem:[#allocation22_spill] sm:$0xff] %v5263_v28  ;;  %v5266_v54 = vpop.permute.xlu0 %1101 }
  0xc3   :  { %4569 = vset.pattern.permute.xlu2 %v7840_v4 }
  0xc4   :  { %4568 = vset.pattern.permute.xlu1 %v7839_v22  ;;  %v5275_v40 = vpop.permute.xlu2 %381  ;;  %953 = vperm.xlu2 %4569, %v4922_v2  }
  0xc5   :  { %7842 = vst [vmem:[#allocation23_spill] sm:$0xff] %v5275_v40  ;;  %v5278_v57 = vpop.permute.xlu1 %331  ;;  %236 = vperm.xlu0 %4635, %v5271_v48   ;;  %1719 = vperm.xlu1 %4568, %v5023_v20   ;;  %v5481_v40 = vld [vmem:[%s7793_s0 + $0x1b0] sm:$0xff] }
  0xc6   :  { %7843 = vst [vmem:[#allocation24_spill] sm:$0xff] %v5278_v57  ;;  %v5282_v28 = vpop.permute.xlu0 %1001  ;;  %v5296_v57 = vld [vmem:[%s7793_s0 + $0x90] sm:$0xff] }
  0xc7   :  { %7844 = vst [vmem:[#allocation25_spill] sm:$0xff] %v5282_v28 }
  0xc8   :  { %7875 = vst [vmem:[#allocation56_spill] sm:$0xff] %v5481_v40 }
  0xcc   :  { %v5284_v33 = vpop.permute.xlu2 %396  ;;  %957 = vperm.xlu2 %4569, %v4917_v1  }
  0xcd   :  { %7845 = vst [vmem:[#allocation26_spill] sm:$0xff] %v5284_v33  ;;  %v5287_v32 = vpop.permute.xlu1 %346  ;;  %251 = vperm.xlu0 %4635, %v4982_v13   ;;  %1723 = vperm.xlu1 %4568, %v4922_v2   ;;  %v5312_v2 = vld [vmem:[%s7793_s0 + $0xa8] sm:$0xff] }
  0xce   :  { %7846 = vst [vmem:[#allocation27_spill] sm:$0xff] %v5287_v32  ;;  %v5291_v26 = vpop.permute.xlu0 %1121 }
  0xcf   :  { %7847 = vst [vmem:[#allocation28_spill] sm:$0xff] %v5291_v26 }
  0xd4   :  { %v5298_v20 = vpop.permute.xlu2 %411  ;;  %4572 = vset.pattern.permute.xlu2 %v7839_v22 }
  0xd5   :  { %7848 = vst [vmem:[#allocation29_spill] sm:$0xff] %v5298_v20  ;;  %v5301_v33 = vpop.permute.xlu1 %361  ;;  %266 = vperm.xlu0 %4635, %v5296_v57   ;;  %4571 = vset.pattern.permute.xlu1 %v7840_v4 }
  0xd6   :  { %v5305_v1 = vpop.permute.xlu0 %1021  ;;  %1731 = vperm.xlu2 %4572, %v4912_v0   ;;  %961 = vperm.xlu1 %4571, %v4912_v0   ;;  %v5326_v0 = vld [vmem:[%s7793_s0 + $0xc0] sm:$0xff] }
  0xd7   :  { %7849 = vst [vmem:[#allocation30_spill] sm:$0xff] %v5305_v1 }
  0xd8   :  { %7852 = vst [vmem:[#allocation33_spill] sm:$0xff] %v5326_v0 }
  0xdc   :  { %v5314_v32 = vpop.permute.xlu2 %426 }
  0xdd   :  { %7850 = vst [vmem:[#allocation31_spill] sm:$0xff] %v5314_v32  ;;  %v5316_v20 = vpop.permute.xlu1 %376  ;;  %281 = vperm.xlu0 %4635, %v5312_v2  }
  0xde   :  { %v5319_v26 = vpop.permute.xlu0 %1141  ;;  %1735 = vperm.xlu2 %4572, %v4933_v5   ;;  %965 = vperm.xlu1 %4571, %v4933_v5  }
  0xdf   :  { %7851 = vst [vmem:[#allocation32_spill] sm:$0xff] %v5319_v26 }
  0xe4   :  { %v5328_v1 = vpop.permute.xlu2 %441 }
  0xe5   :  { %7853 = vst [vmem:[#allocation34_spill] sm:$0xff] %v5328_v1  ;;  %v5330_v63 = vpop.permute.xlu1 %391  ;;  %296 = vperm.xlu0 %4635, %v5326_v0  }
  0xe6   :  { %7854 = vst [vmem:[#allocation35_spill] sm:$0xff] %v5330_v63  ;;  %v5333_v32 = vpop.permute.xlu0 %1037  ;;  %4574 = vset.pattern.permute.xlu2 %v7840_v4  ;;  %4573 = vset.pattern.permute.xlu1 %v7839_v22 }
  0xe7   :  { %7855 = vst [vmem:[#allocation36_spill] sm:$0xff] %v5333_v32  ;;  %973 = vperm.xlu2 %4574, %v4956_v9   ;;  %1739 = vperm.xlu1 %4573, %v5040_v24   ;;  %v75_v32 = vld [vmem:[%s7793_s0 + $0xf0] sm:$0xff] }
  0xec   :  { %v5339_v5 = vpop.permute.xlu2 %456 }
  0xed   :  { %7856 = vst [vmem:[#allocation37_spill] sm:$0xff] %v5339_v5  ;;  %v5341_v26 = vpop.permute.xlu1 %406  ;;  %311 = vperm.xlu0 %4635, %v5154_v53  }
  0xee   :  { %7857 = vst [vmem:[#allocation38_spill] sm:$0xff] %v5341_v26  ;;  %v5344_v1 = vpop.permute.xlu0 %1225 }
  0xef   :  { %7858 = vst [vmem:[#allocation39_spill] sm:$0xff] %v5344_v1  ;;  %1085 = vperm.xlu2 %4574, %v4938_v6   ;;  %1743 = vperm.xlu1 %4573, %v4956_v9   ;;  %v78_v6 = vld [vmem:[%s7793_s0 + $0x108] sm:$0xff]  ;;  %v2743_v1 = vld [vmem:[%s7796_s3] sm:$0xff] }
  0xf4   :  { %v5351_v0 = vpop.permute.xlu2 %471 }
  0xf5   :  { %7859 = vst [vmem:[#allocation40_spill] sm:$0xff] %v5351_v0  ;;  %v5353_v63 = vpop.permute.xlu1 %421  ;;  %326 = vperm.xlu0 %4635, %v75_v32   ;;  %v81_v32 = vld [vmem:[%s7793_s0 + $0x120] sm:$0xff] }
  0xf6   :  { %7860 = vst [vmem:[#allocation41_spill] sm:$0xff] %v5353_v63  ;;  %v5355_v24 = vpop.permute.xlu0 %1053 }
  0xf7   :  { %7861 = vst [vmem:[#allocation42_spill] sm:$0xff] %v5355_v24  ;;  %4576 = vset.pattern.permute.xlu2 %v7839_v22  ;;  %4575 = vset.pattern.permute.xlu1 %v7840_v4 }
  0xf8   :  { %1747 = vperm.xlu2 %4576, %v4946_v7   ;;  %977 = vperm.xlu1 %4575, %v4946_v7  }
  0xfc   :  { %v5364_v9 = vpop.permute.xlu2 %486 }
  0xfd   :  { %7862 = vst [vmem:[#allocation43_spill] sm:$0xff] %v5364_v9  ;;  %v5366_v53 = vpop.permute.xlu1 %436  ;;  %341 = vperm.xlu0 %4635, %v78_v6   ;;  %v2750_v6 = vld [vmem:[%s7796_s3 + $0x38] sm:$0xff] }
  0xfe   :  { %7863 = vst [vmem:[#allocation44_spill] sm:$0xff] %v5366_v53  ;;  %v5371_v0 = vpop.permute.xlu0 %1169  ;;  %3148 = vmatpush.msra.mxu0 %v2750_v6  ;;  %4535 = vmatpush.msra.mxu1 %v2750_v6  ;;  %v5436_v53 = vld [vmem:[%s7793_s0 + $0x180] sm:$0xff] }
  0xff   :  { %7864 = vst [vmem:[#allocation45_spill] sm:$0xff] %v5371_v0  ;;  %4536 = vmatpush.msra.mxu2 %v2750_v6  ;;  %4537 = vmatpush.msra.mxu3 %v2750_v6  ;;  %v2747_v6 = vld [vmem:[%s7796_s3 + $0x20] sm:$0xff]  ;;  %v2744_v0 = vld [vmem:[%s7796_s3 + $0x8] sm:$0xff] }
 0x100   :  { %1859 = vperm.xlu2 %4576, %v81_v32   ;;  %1089 = vperm.xlu1 %4575, %v81_v32  }
 0x104   :  { %v5373_v5 = vpop.permute.xlu2 %501 }
 0x105   :  { %7865 = vst [vmem:[#allocation46_spill] sm:$0xff] %v5373_v5  ;;  %v5375_v7 = vpop.permute.xlu1 %451  ;;  %356 = vperm.xlu0 %4635, %v81_v32   ;;  %v2749_v32 = vld [vmem:[%s7796_s3 + $0x30] sm:$0xff] }
 0x106   :  { %7866 = vst [vmem:[#allocation47_spill] sm:$0xff] %v5375_v7  ;;  %v5377_v24 = vpop.permute.xlu0 %1069  ;;  %3149 = vmatpush.msra.mxu0 %v2749_v32  ;;  %4538 = vmatpush.msra.mxu1 %v2749_v32 }
 0x107   :  { %7867 = vst [vmem:[#allocation48_spill] sm:$0xff] %v5377_v24  ;;  %4539 = vmatpush.msra.mxu2 %v2749_v32  ;;  %4540 = vmatpush.msra.mxu3 %v2749_v32  ;;  %v2745_v32 = vld [vmem:[%s7796_s3 + $0x10] sm:$0xff] }
 0x108   :  { %4578 = vset.pattern.permute.xlu2 %v7840_v4  ;;  %4577 = vset.pattern.permute.xlu1 %v7839_v22 }
 0x109   :  { %1093 = vperm.xlu2 %4578, %v5095_v37   ;;  %1751 = vperm.xlu1 %4577, %v5053_v27   ;;  %v2748_v27 = vld [vmem:[%s7796_s3 + $0x28] sm:$0xff] }
 0x10a   :  { %3150 = vmatpush.msra.mxu0 %v2748_v27  ;;  %4541 = vmatpush.msra.mxu1 %v2748_v27 }
 0x10b   :  { %4542 = vmatpush.msra.mxu2 %v2748_v27  ;;  %4543 = vmatpush.msra.mxu3 %v2748_v27 }
 0x10c   :  { %v5389_v5 = vpop.permute.xlu2 %516  ;;  %3151 = vmatpush.msra.mxu0 %v2747_v6  ;;  %4544 = vmatpush.msra.mxu1 %v2747_v6 }
 0x10d   :  { %7868 = vst [vmem:[#allocation49_spill] sm:$0xff] %v5389_v5  ;;  %v5391_v9 = vpop.permute.xlu1 %466  ;;  %371 = vperm.xlu0 %4635, %v5065_v30   ;;  %4545 = vmatpush.msra.mxu2 %v2747_v6 }
 0x10e   :  { %7869 = vst [vmem:[#allocation50_spill] sm:$0xff] %v5391_v9  ;;  %v5397_v24 = vpop.permute.xlu0 %1185  ;;  %v2746_v9 = vld [vmem:[%s7796_s3 + $0x18] sm:$0xff]  ;;  %4546 = vmatpush.msra.mxu3 %v2747_v6 }
 0x10f   :  { %7870 = vst [vmem:[#allocation51_spill] sm:$0xff] %v5397_v24  ;;  %v5410_v24 = vld [vmem:[%s7793_s0 + $0x150] sm:$0xff]  ;;  %3152 = vmatpush.msra.mxu0 %v2746_v9  ;;  %4547 = vmatpush.msra.mxu1 %v2746_v9 }
 0x110   :  { %4548 = vmatpush.msra.mxu2 %v2746_v9  ;;  %4549 = vmatpush.msra.mxu3 %v2746_v9 }
 0x111   :  { %985 = vperm.xlu2 %4578, %v4951_v8   ;;  %1863 = vperm.xlu1 %4577, %v5095_v37  }
 0x112   :  { %3153 = vmatpush.msra.mxu0 %v2745_v32  ;;  %4550 = vmatpush.msra.mxu1 %v2745_v32 }
 0x113   :  { %4551 = vmatpush.msra.mxu2 %v2745_v32  ;;  %4552 = vmatpush.msra.mxu3 %v2745_v32 }
 0x114   :  { %3154 = vmatpush.msra.mxu0 %v2744_v0  ;;  %4553 = vmatpush.msra.mxu1 %v2744_v0 }
 0x115   :  { %v5415_v8 = vpop.permute.xlu1 %481  ;;  %386 = vperm.xlu0 %4635, %v5410_v24   ;;  %v1716_v37 = vpop.permute.xlu2 %1715  ;;  %4554 = vmatpush.msra.mxu2 %v2744_v0 }
 0x116   :  { %7871 = vst [vmem:[#allocation52_spill] sm:$0xff] %v5415_v8  ;;  %3155 = vmatpush.msra.mxu0 %v2743_v1  ;;  %4556 = vmatpush.msra.mxu1 %v2743_v1 }
 0x117   :  { %v177_v7 = vpop.permute.xlu0 %176  ;;  %4557 = vmatpush.msra.mxu2 %v2743_v1  ;;  %4555 = vmatpush.msra.mxu3 %v2744_v0  ;;  %v5460_v0 = vld [vmem:[%s7794_s1 + $0x1] ss:$0 sm:$0xff] }
 0x119   :  { %4580 = vset.pattern.permute.xlu2 %v7839_v22  ;;  %4579 = vset.pattern.permute.xlu1 %v7840_v4 }
 0x11a   :  { %1867 = vperm.xlu2 %4580, %v5090_v36   ;;  %1097 = vperm.xlu1 %4579, %v5090_v36  }
 0x11b   :  { %4558 = vmatpush.msra.mxu3 %v2743_v1  ;;  %v5453_v1 = vld [vmem:[%s7794_s1] ss:$0 sm:$0xff] }
 0x11c   :  { %v815_v32 = vmul.f32 %v5453_v1, %v177_v7  ;;  %v1458_v7 = vmul.f32 %v5460_v0, %v5225_v29 }
 0x11d   :  { %v5428_v27 = vpop.permute.xlu1 %496  ;;  %401 = vperm.xlu0 %4635, %v5000_v16  }
 0x11e   :  { %7872 = vst [vmem:[#allocation53_spill] sm:$0xff] %v5428_v27  ;;  %v954_v8 = vpop.permute.xlu2 %953 }
 0x11f   :  { %v182_v6 = vpop.permute.xlu0 %181 }
 0x122   :  { %1759 = vperm.xlu2 %4580, %v4964_v10   ;;  %989 = vperm.xlu1 %4579, %v4964_v10   ;;  %v5448_v10 = vld [vmem:[%s7793_s0 + $0x198] sm:$0xff] }
 0x123   :  { %7874 = vst [vmem:[#allocation55_spill] sm:$0xff] %v5448_v10 }
 0x125   :  { %v5438_v36 = vpop.permute.xlu1 %511  ;;  %416 = vperm.xlu0 %4635, %v5436_v53  }
 0x126   :  { %7873 = vst [vmem:[#allocation54_spill] sm:$0xff] %v5438_v36  ;;  %v958_v27 = vpop.permute.xlu2 %957  ;;  %v5467_v36 = vld [vmem:[%s7794_s1 + $0x2] ss:$0 sm:$0xff] }
 0x127   :  { %v5441_v9 = vpop.permute.xlu0 %206  ;;  %v2227_v49 = vmul.f32 %v5467_v36, %v1716_v37 }
 0x12a   :  { %4582 = vset.pattern.permute.xlu2 %v7840_v4  ;;  %4581 = vset.pattern.permute.xlu1 %v7839_v22 }
 0x12b   :  { %993 = vperm.xlu2 %4582, %v5271_v48   ;;  %1871 = vperm.xlu1 %4581, %v5065_v30  }
 0x12d   :  { %431 = vperm.xlu0 %4635, %v5448_v10   ;;  %v816_v10 = vmul.f32 %v5453_v1, %v182_v6 }
 0x12e   :  { %v946_v5 = vpop.permute.xlu1 %945 }
 0x12f   :  { %v1457_v63 = vmul.f32 %v5460_v0, %v946_v5  ;;  %v5470_v26 = vpop.permute.xlu0 %221  ;;  %v5488_v5 = vld [vmem:[%s7795_s2] ss:$0 sm:$0xff]  ;;  %v1586_v29 = vadd.f32 %v1458_v7, %v816_v10  ;;  %v817_v7 = vmul.f32 %v5453_v1, %v5123_v44  ;;  %v2230_v44 = vmul.f32 %v5467_v36, %v5125_v45 }
 0x130   :  { %v5472_v30 = vpop.permute.xlu2 %1731 }
 0x131   :  { %v1585_v28 = vadd.f32 %v1457_v63, %v815_v32 }
 0x133   :  { %v2355_v58 = vadd.f32 %v2227_v49, %v1585_v28  ;;  %1105 = vperm.xlu2 %4582, %v4969_v11   ;;  %1763 = vperm.xlu1 %4581, %v5271_v48   ;;  %v102_v48 = vld [vmem:[%s7793_s0 + $0x1c8] sm:$0xff] }
 0x135   :  { %446 = vperm.xlu0 %4635, %v5481_v40   ;;  %v2487_v63 = vadd.f32 %v5488_v5, %v2355_v58  ;;  %v1459_v58 = vmul.f32 %v5460_v0, %v954_v8  ;;  %v818_v8 = vmul.f32 %v5453_v1, %v5144_v50 }
 0x137   :  { %v5492_v37 = vpop.permute.xlu0 %236  ;;  %v1720_v6 = vpop.permute.xlu1 %1719  ;;  %v2615_v32 = vmax.f32 %v2487_v63, 0.0 }
 0x138   :  { %v2228_v49 = vmul.f32 %v5467_v36, %v1720_v6  ;;  %v5495_v11 = vpop.permute.xlu2 %1735 }
 0x139   :  { %4396 = vmatmul.msk.f32.vlgmr.msra.gmra.mxu0 %vm2755_vm0, %v2615_v32 }
 0x13a   :  { %v2356_v28 = vadd.f32 %v2228_v49, %v1586_v29  ;;  %v1460_v29 = vmul.f32 %v5460_v0, %v958_v27  ;;  %v1587_v49 = vadd.f32 %v1459_v58, %v817_v7 }
 0x13b   :  { %4584 = vset.pattern.permute.xlu2 %v7839_v22  ;;  %4583 = vset.pattern.permute.xlu1 %v7840_v4 }
 0x13c   :  { %1767 = vperm.xlu2 %4584, %v4987_v14   ;;  %997 = vperm.xlu1 %4583, %v4987_v14   ;;  %v2488_v10 = vadd.f32 %v5488_v5, %v2356_v28  ;;  %v1588_v28 = vadd.f32 %v1460_v29, %v818_v8  ;;  %v108_v29 = vld [vmem:[%s7793_s0 + $0x1f8] sm:$0xff] }
 0x13d   :  { %461 = vperm.xlu0 %4635, %v102_v48  }
 0x13e   :  { %v2616_v63 = vmax.f32 %v2488_v10, 0.0  ;;  %v2358_v58 = vadd.f32 %v2230_v44, %v1588_v28 }
 0x13f   :  { %v5510_v6 = vpop.permute.xlu0 %251  ;;  %v1724_v32 = vpop.permute.xlu1 %1723 }
 0x140   :  { %v2229_v40 = vmul.f32 %v5467_v36, %v1724_v32 }
 0x141   :  { %v5515_v25 = vpop.permute.xlu2 %973  ;;  %4397 = vmatmul.msk.f32.gmra.mxu0 %vm2755_vm0, %v2616_v63  ;;  %v850_v63 = vmul.f32 %v5453_v1, %v5252_v21 }
 0x142   :  { %v2357_v14 = vadd.f32 %v2229_v40, %v1587_v49  ;;  %v819_v40 = vmul.f32 %v5453_v1, %v5085_v35  ;;  %v2490_v35 = vadd.f32 %v5488_v5, %v2358_v58 }
 0x144   :  { %1879 = vperm.xlu2 %4584, %v5105_v39   ;;  %1109 = vperm.xlu1 %4583, %v5105_v39   ;;  %v2489_v27 = vadd.f32 %v5488_v5, %v2357_v14  ;;  %v2262_v39 = vmul.f32 %v5467_v36, %v5146_v51  ;;  %v2231_v51 = vmul.f32 %v5467_v36, %v5472_v30  ;;  %v2618_v44 = vmax.f32 %v2490_v35, 0.0 }
 0x145   :  { %476 = vperm.xlu0 %4635, %v5202_v31  }
 0x146   :  { %v2617_v48 = vmax.f32 %v2489_v27, 0.0 }
 0x147   :  { %v5524_v50 = vpop.permute.xlu0 %266 }
 0x148   :  { %v962_v10 = vpop.permute.xlu1 %961 }
 0x149   :  { %v1461_v7 = vmul.f32 %v5460_v0, %v962_v10  ;;  %v1086_v45 = vpop.permute.xlu2 %1085  ;;  %4398 = vmatmul.msk.f32.gmra.mxu0 %vm2755_vm0, %v2617_v48  ;;  %v820_v48 = vmul.f32 %v5453_v1, %v5100_v38  ;;  %v1463_v38 = vmul.f32 %v5460_v0, %v5238_v3 }
 0x14a   :  { %v1492_v31 = vmul.f32 %v5460_v0, %v1086_v45  ;;  %v2232_v45 = vmul.f32 %v5467_v36, %v5495_v11 }
 0x14b   :  { %v1589_v32 = vadd.f32 %v1461_v7, %v819_v40 }
 0x14c   :  { %v1620_v49 = vadd.f32 %v1492_v31, %v850_v63  ;;  %4586 = vset.pattern.permute.xlu2 %v7840_v4  ;;  %4585 = vset.pattern.permute.xlu1 %v7839_v22 }
 0x14d   :  { %491 = vperm.xlu0 %4635, %v108_v29   ;;  %1113 = vperm.xlu2 %4586, %v5410_v24   ;;  %v2359_v8 = vadd.f32 %v2231_v51, %v1589_v32 }
 0x14e   :  { %v2390_v21 = vadd.f32 %v2262_v39, %v1620_v49  ;;  %1771 = vperm.xlu1 %4585, %v4977_v12   ;;  %v5555_v12 = vld [vmem:[%s7793_s0 + $0x210] sm:$0xff]  ;;  %v821_v39 = vmul.f32 %v5453_v1, %v5441_v9 }
 0x14f   :  { %v5545_v14 = vpop.permute.xlu0 %281  ;;  %v2491_v7 = vadd.f32 %v5488_v5, %v2359_v8 }
 0x150   :  { %v966_v28 = vpop.permute.xlu1 %965  ;;  %v2522_v27 = vadd.f32 %v5488_v5, %v2390_v21  ;;  %v1464_v21 = vmul.f32 %v5460_v0, %v5515_v25 }
 0x151   :  { %v1462_v58 = vmul.f32 %v5460_v0, %v966_v28  ;;  %4399 = vmatmul.msk.f32.gmra.mxu0 %vm2755_vm0, %v2618_v44  ;;  %v2619_v29 = vmax.f32 %v2491_v7, 0.0  ;;  %v5591_v44 = vld [vmem:[%s7793_s0 + $0x238] sm:$0xff]  ;;  %v822_v28 = vmul.f32 %v5453_v1, %v5159_v55 }
 0x152   :  { %v1748_v30 = vpop.permute.xlu2 %1747  ;;  %v2650_v10 = vmax.f32 %v2522_v27, 0.0  ;;  %v120_v55 = vld [vmem:[%s7793_s0 + $0x258] sm:$0xff] }
 0x153   :  { %v1590_v40 = vadd.f32 %v1462_v58, %v820_v48  ;;  %v1592_v58 = vadd.f32 %v1464_v21, %v822_v28  ;;  %v824_v21 = vmul.f32 %v5453_v1, %v5470_v26  ;;  %v125_v26 = vld [vmem:[%s7793_s0 + $0x280] sm:$0xff] }
 0x154   :  { %4431 = vmatmul.msk.f32.vlgmr.msra.gmra.mxu1 %vm2755_vm0, %v2650_v10 }
 0x155   :  { %506 = vperm.xlu0 %4635, %v5555_v12   ;;  %1005 = vperm.xlu2 %4586, %v4982_v13   ;;  %v2360_v63 = vadd.f32 %v2232_v45, %v1590_v40  ;;  %v5574_v13 = vld [vmem:[%s7793_s0 + $0x228] sm:$0xff]  ;;  %v823_v45 = vmul.f32 %v5453_v1, %v5112_v41 }
 0x156   :  { %1883 = vperm.xlu1 %4585, %v5410_v24   ;;  %v1591_v24 = vadd.f32 %v1463_v38, %v821_v39 }
 0x157   :  { %v5568_v31 = vpop.permute.xlu0 %296  ;;  %v2492_v3 = vadd.f32 %v5488_v5, %v2360_v63 }
 0x159   :  { %4400 = vmatmul.msk.f32.gmra.mxu0 %vm2755_vm0, %v2619_v29  ;;  %v1740_v32 = vpop.permute.xlu1 %1739  ;;  %v2620_v51 = vmax.f32 %v2492_v3, 0.0 }
 0x15a   :  { %v1860_v11 = vpop.permute.xlu2 %1859  ;;  %v2233_v35 = vmul.f32 %v5467_v36, %v1740_v32 }
 0x15c   :  { %v2361_v9 = vadd.f32 %v2233_v35, %v1591_v24 }
 0x15d   :  { %521 = vperm.xlu0 %4635, %v5574_v13   ;;  %4588 = vset.pattern.permute.xlu2 %v7839_v22 }
 0x15e   :  { %4587 = vset.pattern.permute.xlu1 %v7840_v4  ;;  %1887 = vperm.xlu2 %4588, %v5117_v42   ;;  %v2493_v48 = vadd.f32 %v5488_v5, %v2361_v9 }
 0x15f   :  { %1117 = vperm.xlu1 %4587, %v5117_v42   ;;  %v5583_v49 = vpop.permute.xlu0 %311 }
 0x160   :  { %v2621_v40 = vmax.f32 %v2493_v48, 0.0 }
 0x161   :  { %4401 = vmatmul.msk.f32.gmra.mxu0 %vm2755_vm0, %v2620_v51  ;;  %v1744_v8 = vpop.permute.xlu1 %1743  ;;  %v1466_v51 = vmul.f32 %v5460_v0, %v5257_v52 }
 0x162   :  { %v2234_v27 = vmul.f32 %v5467_v36, %v1744_v8 }
 0x163   :  { %v1094_v42 = vpop.permute.xlu2 %1093  ;;  %v1594_v48 = vadd.f32 %v1466_v51, %v824_v21 }
 0x164   :  { %v2362_v25 = vadd.f32 %v2234_v27, %v1592_v58  ;;  %v2263_v58 = vmul.f32 %v5467_v36, %v1860_v11 }
 0x165   :  { %531 = vperm.xlu0 %4635, %v5591_v44  }
 0x166   :  { %1779 = vperm.xlu2 %4588, %v5005_v17   ;;  %v2494_v39 = vadd.f32 %v5488_v5, %v2362_v25 }
 0x167   :  { %1009 = vperm.xlu1 %4587, %v5005_v17   ;;  %v5600_v10 = vpop.permute.xlu0 %326  ;;  %v2235_v17 = vmul.f32 %v5467_v36, %v1748_v30  ;;  %v124_v30 = vld [vmem:[%s7793_s0 + $0x278] sm:$0xff] }
 0x168   :  { %v2622_v35 = vmax.f32 %v2494_v39, 0.0 }
 0x169   :  { %4402 = vmatmul.msk.f32.gmra.mxu0 %vm2755_vm0, %v2621_v40  ;;  %v825_v40 = vmul.f32 %v5453_v1, %v5177_v61 }
 0x16a   :  { %v978_v7 = vpop.permute.xlu1 %977 }
 0x16b   :  { %v1465_v38 = vmul.f32 %v5460_v0, %v978_v7  ;;  %v986_v63 = vpop.permute.xlu2 %985 }
 0x16c   :  { %v1467_v52 = vmul.f32 %v5460_v0, %v986_v63 }
 0x16d   :  { %v1593_v29 = vadd.f32 %v1465_v38, %v823_v45  ;;  %551 = vperm.xlu0 %4635, %v120_v55   ;;  %v2237_v45 = vmul.f32 %v5467_v36, %v5161_v56  ;;  %v852_v56 = vmul.f32 %v5453_v1, %v5301_v33 }
 0x16e   :  { %4590 = vset.pattern.permute.xlu2 %v7840_v4  ;;  %v1595_v11 = vadd.f32 %v1467_v52, %v825_v40 }
 0x16f   :  { %v2363_v32 = vadd.f32 %v2235_v17, %v1593_v29  ;;  %4589 = vset.pattern.permute.xlu1 %v7839_v22  ;;  %v5613_v24 = vpop.permute.xlu0 %341  ;;  %1013 = vperm.xlu2 %4590, %v4995_v15   ;;  %v1494_v17 = vmul.f32 %v5460_v0, %v1094_v42  ;;  %v127_v42 = vld [vmem:[%s7793_s0 + $0x290] sm:$0xff] }
 0x170   :  { %1891 = vperm.xlu1 %4589, %v5081_v34  }
 0x171   :  { %4403 = vmatmul.msk.f32.gmra.mxu0 %vm2755_vm0, %v2622_v35  ;;  %v2495_v3 = vadd.f32 %v5488_v5, %v2363_v32  ;;  %v2365_v32 = vadd.f32 %v2237_v45, %v1595_v11 }
 0x172   :  { %v1090_v41 = vpop.permute.xlu1 %1089 }
 0x173   :  { %v2623_v34 = vmax.f32 %v2495_v3, 0.0  ;;  %v1493_v28 = vmul.f32 %v5460_v0, %v1090_v41  ;;  %v2497_v21 = vadd.f32 %v5488_v5, %v2365_v32 }
 0x174   :  { %v1868_v9 = vpop.permute.xlu2 %1867 }
 0x175   :  { %571 = vperm.xlu0 %4635, %v124_v30   ;;  %v1622_v30 = vadd.f32 %v1494_v17, %v852_v56  ;;  %v1496_v17 = vmul.f32 %v5460_v0, %v5266_v54 }
 0x177   :  { %v357_v8 = vpop.permute.xlu0 %356  ;;  %1125 = vperm.xlu2 %4590, %v5000_v16  }
 0x178   :  { %v851_v27 = vmul.f32 %v5453_v1, %v357_v8  ;;  %1783 = vperm.xlu1 %4589, %v4995_v15  }
 0x179   :  { %4404 = vmatmul.msk.f32.gmra.mxu0 %vm2755_vm0, %v2623_v34  ;;  %v2625_v34 = vmax.f32 %v2497_v21, 0.0 }
 0x17a   :  { %v1621_v25 = vadd.f32 %v1493_v28, %v851_v27  ;;  %v131_v27 = vld [vmem:[%s7793_s0 + $0x2b0] sm:$0xff] }
 0x17b   :  { %v1752_v16 = vpop.permute.xlu1 %1751 }
 0x17c   :  { %v2391_v7 = vadd.f32 %v2263_v58, %v1621_v25  ;;  %v2236_v55 = vmul.f32 %v5467_v36, %v1752_v16  ;;  %v1760_v15 = vpop.permute.xlu2 %1759  ;;  %v853_v58 = vmul.f32 %v5453_v1, %v5261_v60 }
 0x17d   :  { %576 = vperm.xlu0 %4635, %v125_v26  }
 0x17e   :  { %v2364_v38 = vadd.f32 %v2236_v55, %v1594_v48  ;;  %v2523_v39 = vadd.f32 %v5488_v5, %v2391_v7  ;;  %v826_v55 = vmul.f32 %v5453_v1, %v5121_v43 }
 0x17f   :  { %4593 = vset.pattern.permute.xlu2 %v7839_v22  ;;  %v372_v63 = vpop.permute.xlu0 %371 }
 0x180   :  { %4592 = vset.pattern.permute.xlu1 %v7840_v4  ;;  %1787 = vperm.xlu2 %4593, %v5296_v57   ;;  %v2651_v61 = vmax.f32 %v2523_v39, 0.0  ;;  %v2496_v29 = vadd.f32 %v5488_v5, %v2364_v38  ;;  %v2238_v38 = vmul.f32 %v5467_v36, %v1760_v15  ;;  %v854_v43 = vmul.f32 %v5453_v1, %v372_v63 }
 0x181   :  { %1017 = vperm.xlu1 %4592, %v5296_v57  }
 0x182   :  { %4432 = vmatmul.msk.f32.gmra.mxu1 %vm2755_vm0, %v2651_v61  ;;  %v2624_v35 = vmax.f32 %v2496_v29, 0.0  ;;  %v1624_v56 = vadd.f32 %v1496_v17, %v854_v43  ;;  %v7878_v17 = vld [vmem:[#allocation23_spill] sm:$0xff] }
 0x183   :  { %v1864_v41 = vpop.permute.xlu1 %1863  ;;  %v856_v43 = vmul.f32 %v5453_v1, %v7878_v17 }
 0x184   :  { %v2264_v3 = vmul.f32 %v5467_v36, %v1864_v41  ;;  %4405 = vmatmul.msk.f32.gmra.mxu0 %vm2755_vm0, %v2624_v35 }
 0x185   :  { %586 = vperm.xlu0 %4635, %v127_v42   ;;  %v994_v51 = vpop.permute.xlu2 %993  ;;  %v855_v42 = vmul.f32 %v5453_v1, %v5316_v20 }
 0x186   :  { %v2392_v57 = vadd.f32 %v2264_v3, %v1622_v30  ;;  %v827_v3 = vmul.f32 %v5453_v1, %v5492_v37  ;;  %v1469_v20 = vmul.f32 %v5460_v0, %v994_v51 }
 0x187   :  { %v5657_v33 = vpop.permute.xlu0 %386 }
 0x188   :  { %1899 = vperm.xlu2 %4593, %v5135_v47   ;;  %v2524_v8 = vadd.f32 %v5488_v5, %v2392_v57 }
 0x189   :  { %1129 = vperm.xlu1 %4592, %v5135_v47   ;;  %v2265_v47 = vmul.f32 %v5467_v36, %v1868_v9 }
 0x18a   :  { %v2652_v28 = vmax.f32 %v2524_v8, 0.0  ;;  %v1597_v8 = vadd.f32 %v1469_v20, %v827_v3  ;;  %v830_v20 = vmul.f32 %v5453_v1, %v5510_v6 }
 0x18c   :  { %4406 = vmatmul.msk.f32.gmra.mxu0 %vm2755_vm0, %v2625_v34  ;;  %4433 = vmatmul.msk.f32.gmra.mxu1 %vm2755_vm0, %v2652_v28  ;;  %v1098_v48 = vpop.permute.xlu1 %1097 }
 0x18d   :  { %v1495_v52 = vmul.f32 %v5460_v0, %v1098_v48  ;;  %606 = vperm.xlu0 %4635, %v131_v27   ;;  %v1106_v25 = vpop.permute.xlu2 %1105 }
 0x18e   :  { %v1497_v15 = vmul.f32 %v5460_v0, %v1106_v25 }
 0x18f   :  { %v1623_v26 = vadd.f32 %v1495_v52, %v853_v58  ;;  %v5671_v16 = vpop.permute.xlu0 %401 }
 0x190   :  { %4595 = vset.pattern.permute.xlu2 %v7840_v4  ;;  %v1625_v63 = vadd.f32 %v1497_v15, %v855_v42 }
 0x191   :  { %v2393_v40 = vadd.f32 %v2265_v47, %v1623_v26  ;;  %4594 = vset.pattern.permute.xlu1 %v7839_v22  ;;  %1133 = vperm.xlu2 %4595, %v5130_v46  }
 0x192   :  { %1791 = vperm.xlu1 %4594, %v5018_v19  }
 0x193   :  { %v2525_v60 = vadd.f32 %v5488_v5, %v2393_v40 }
 0x194   :  { %v990_v7 = vpop.permute.xlu1 %989 }
 0x195   :  { %v1468_v9 = vmul.f32 %v5460_v0, %v990_v7  ;;  %4658 = vset.pattern.permute.xlu0 %v7839_v22  ;;  %v2653_v45 = vmax.f32 %v2525_v60, 0.0  ;;  %v7877_v60 = vld [vmem:[#allocation7_spill] sm:$0xff] }
 0x196   :  { %1795 = vperm.xlu0 %4658, %v5013_v18   ;;  %v1768_v11 = vpop.permute.xlu2 %1767 }
 0x197   :  { %v1596_v39 = vadd.f32 %v1468_v9, %v826_v55  ;;  %4434 = vmatmul.msk.f32.gmra.mxu1 %vm2755_vm0, %v2653_v45  ;;  %v5685_v19 = vpop.permute.xlu0 %416  ;;  %v2240_v7 = vmul.f32 %v5467_v36, %v1768_v11  ;;  %v4749_v55 = vld [vmem:[%s7793_s0 + $0x188] sm:$0xff] }
 0x199   :  { %v2366_v61 = vadd.f32 %v2238_v38, %v1596_v39  ;;  %1025 = vperm.xlu2 %4595, %v5013_v18  }
 0x19a   :  { %1903 = vperm.xlu1 %4594, %v5130_v46   ;;  %v2267_v46 = vmul.f32 %v5467_v36, %v5179_v62 }
 0x19b   :  { %v2498_v29 = vadd.f32 %v5488_v5, %v2366_v61 }
 0x19c   :  { %v2395_v57 = vadd.f32 %v2267_v46, %v1625_v63  ;;  %v7879_v46 = vld [vmem:[#allocation25_spill] sm:$0xff] }
 0x19d   :  { %v1872_v32 = vpop.permute.xlu1 %1871  ;;  %v2626_v35 = vmax.f32 %v2498_v29, 0.0  ;;  %v1471_v63 = vmul.f32 %v5460_v0, %v7879_v46 }
 0x19e   :  { %v2266_v41 = vmul.f32 %v5467_v36, %v1872_v32  ;;  %v1880_v54 = vpop.permute.xlu2 %1879  ;;  %1803 = vperm.xlu0 %4658, %v5035_v23   ;;  %v2527_v27 = vadd.f32 %v5488_v5, %v2395_v57 }
 0x19f   :  { %4407 = vmatmul.msk.f32.gmra.mxu0 %vm2755_vm0, %v2626_v35  ;;  %v5699_v18 = vpop.permute.xlu0 %431  ;;  %v2268_v32 = vmul.f32 %v5467_v36, %v1880_v54 }
 0x1a0   :  { %v2394_v30 = vadd.f32 %v2266_v41, %v1624_v56  ;;  %v2655_v58 = vmax.f32 %v2527_v27, 0.0  ;;  %v5744_v56 = vld [vmem:[%s7793_s0 + $0xc8] sm:$0xff]  ;;  %v4751_v41 = vld [vmem:[%s7793_s0 + $0xb0] sm:$0xff] }
 0x1a1   :  { %4597 = vset.pattern.permute.xlu2 %v7839_v22 }
 0x1a2   :  { %4596 = vset.pattern.permute.xlu1 %v7840_v4  ;;  %1907 = vperm.xlu2 %4597, %v5436_v53   ;;  %v2526_v23 = vadd.f32 %v5488_v5, %v2394_v30  ;;  %v7880_v30 = vld [vmem:[#allocation5_spill] sm:$0xff] }
 0x1a3   :  { %1137 = vperm.xlu1 %4596, %v5436_v53   ;;  %v829_v3 = vmul.f32 %v5453_v1, %v7880_v30 }
 0x1a4   :  { %v2654_v21 = vmax.f32 %v2526_v23, 0.0 }
 0x1a5   :  { %v1764_v62 = vpop.permute.xlu1 %1763 }
 0x1a6   :  { %v2239_v34 = vmul.f32 %v5467_v36, %v1764_v62  ;;  %4435 = vmatmul.msk.f32.gmra.mxu1 %vm2755_vm0, %v2654_v21  ;;  %1987 = vperm.xlu0 %4658, %v5243_v59   ;;  %v7876_v59 = vld [vmem:[#allocation11_spill] sm:$0xff] }
 0x1a7   :  { %v5714_v37 = vpop.permute.xlu0 %446  ;;  %v1114_v51 = vpop.permute.xlu2 %1113  ;;  %v828_v25 = vmul.f32 %v5453_v1, %v7876_v59  ;;  %v857_v59 = vmul.f32 %v5453_v1, %v5657_v33 }
 0x1a8   :  { %v2367_v28 = vadd.f32 %v2239_v34, %v1597_v8  ;;  %v7881_v8 = vld [vmem:[#allocation9_spill] sm:$0xff] }
 0x1aa   :  { %1799 = vperm.xlu2 %4597, %v5312_v2   ;;  %v2499_v53 = vadd.f32 %v5488_v5, %v2367_v28  ;;  %v1599_v28 = vadd.f32 %v1471_v63, %v829_v3 }
 0x1ab   :  { %1029 = vperm.xlu1 %4596, %v5312_v2  }
 0x1ac   :  { %v2627_v48 = vmax.f32 %v2499_v53, 0.0  ;;  %v7882_v53 = vld [vmem:[#allocation12_spill] sm:$0xff] }
 0x1ae   :  { %4408 = vmatmul.msk.f32.gmra.mxu0 %vm2755_vm0, %v2627_v48  ;;  %4436 = vmatmul.msk.f32.gmra.mxu1 %vm2755_vm0, %v2655_v58  ;;  %v998_v52 = vpop.permute.xlu1 %997  ;;  %v2242_v48 = vmul.f32 %v5467_v36, %v7882_v53  ;;  %v7886_v53 = vld [vmem:[#allocation14_spill] sm:$0xff] }
 0x1af   :  { %v1470_v47 = vmul.f32 %v5460_v0, %v998_v52  ;;  %v5725_v26 = vpop.permute.xlu0 %461  ;;  %v1006_v40 = vpop.permute.xlu2 %1005  ;;  %1923 = vperm.xlu0 %4658, %v7877_v60   ;;  %v7883_v52 = vld [vmem:[#allocation20_spill] sm:$0xff] }
 0x1b0   :  { %v1472_v23 = vmul.f32 %v5460_v0, %v1006_v40 }
 0x1b1   :  { %v1598_v2 = vadd.f32 %v1470_v47, %v828_v25  ;;  %v1499_v25 = vmul.f32 %v5460_v0, %v1114_v51  ;;  %v4752_v47 = vld [vmem:[%s7793_s0 + $0x190] sm:$0xff] }
 0x1b2   :  { %1911 = vperm.xlu2 %4597, %v4749_v55   ;;  %v1600_v6 = vadd.f32 %v1472_v23, %v830_v20  ;;  %v5786_v55 = vld [vmem:[%s7793_s0 + $0xe8] sm:$0xff]  ;;  %v7885_v23 = vld [vmem:[#allocation55_spill] sm:$0xff] }
 0x1b3   :  { %v2368_v9 = vadd.f32 %v2240_v7, %v1598_v2  ;;  %1209 = vperm.xlu1 %4596, %v5555_v12   ;;  %v1627_v51 = vadd.f32 %v1499_v25, %v857_v59 }
 0x1b4   :  { %v2370_v60 = vadd.f32 %v2242_v48, %v1600_v6 }
 0x1b5   :  { %v2500_v45 = vadd.f32 %v5488_v5, %v2368_v9 }
 0x1b6   :  { %v5734_v38 = vpop.f32.mrf.mxu0  ;;  %v1110_v39 = vpop.permute.xlu1 %1109 }
 0x1b7   :  { %v1498_v61 = vmul.f32 %v5460_v0, %v1110_v39  ;;  %v5739_v11 = vpop.permute.xlu0 %476  ;;  %v2628_v29 = vmax.f32 %v2500_v45, 0.0  ;;  %1815 = vperm.xlu0 %4658, %v5744_v56  }
 0x1b8   :  { %v1888_v15 = vpop.permute.xlu2 %1887 }
 0x1b9   :  { %v1626_v35 = vadd.f32 %v1498_v61, %v856_v43  ;;  %4409 = vmatmul.msk.f32.gmra.mxu0 %vm2755_vm0, %v2628_v29  ;;  %v2502_v43 = vadd.f32 %v5488_v5, %v2370_v60  ;;  %v2270_v30 = vmul.f32 %v5467_v36, %v1888_v15  ;;  %v831_v15 = vmul.f32 %v5453_v1, %v7886_v53 }
 0x1ba   :  { %4599 = vset.pattern.permute.xlu2 %v7840_v4 }
 0x1bb   :  { %v2396_v42 = vadd.f32 %v2268_v32, %v1626_v35  ;;  %4598 = vset.pattern.permute.xlu1 %v7839_v22  ;;  %1033 = vperm.xlu2 %4599, %v4751_v41   ;;  %v2630_v32 = vmax.f32 %v2502_v43, 0.0  ;;  %v7884_v41 = vld [vmem:[#allocation35_spill] sm:$0xff] }
 0x1bc   :  { %1979 = vperm.xlu1 %4598, %v5555_v12   ;;  %v858_v46 = vmul.f32 %v5453_v1, %v7884_v41 }
 0x1bd   :  { %v2528_v54 = vadd.f32 %v5488_v5, %v2396_v42 }
 0x1be   :  { %v5763_v57 = vpop.f32.mrf.mxu0 }
 0x1bf   :  { %v5765_v21 = vpop.permute.xlu0 %491  ;;  %v2656_v62 = vmax.f32 %v2528_v54, 0.0  ;;  %1935 = vperm.xlu0 %4658, %v7881_v8   ;;  %v4754_v8 = vld [vmem:[%s7793_s0 + $0xb8] sm:$0xff] }
 0x1c0   :  { %v1772_v12 = vpop.permute.xlu1 %1771  ;;  %v1780_v34 = vpop.permute.xlu2 %1779 }
 0x1c1   :  { %v2241_v27 = vmul.f32 %v5467_v36, %v1772_v12  ;;  %4437 = vmatmul.msk.f32.gmra.mxu1 %vm2755_vm0, %v2656_v62 }
 0x1c3   :  { %v2369_v58 = vadd.f32 %v2241_v27, %v1599_v28  ;;  %1213 = vperm.xlu2 %4599, %v7883_v52  }
 0x1c4   :  { %4600 = vset.pattern.permute.xlu1 %v7840_v4 }
 0x1c5   :  { %1145 = vperm.xlu1 %4600, %v4752_v47   ;;  %v2501_v40 = vadd.f32 %v5488_v5, %v2369_v58 }
 0x1c6   :  { %v5791_v45 = vpop.f32.mrf.mxu0 }
 0x1c7   :  { %v5781_v7 = vpop.permute.xlu0 %506  ;;  %v2629_v2 = vmax.f32 %v2501_v40, 0.0  ;;  %1831 = vperm.xlu0 %4658, %v5786_v55   ;;  %v7887_v40 = vld [vmem:[#allocation26_spill] sm:$0xff] }
 0x1c8   :  { %v1884_v33 = vpop.permute.xlu1 %1883  ;;  %v859_v60 = vmul.f32 %v5453_v1, %v7887_v40  ;;  %v4756_v40 = vld [vmem:[%s7793_s0 + $0x1a0] sm:$0xff] }
 0x1c9   :  { %v2269_v9 = vmul.f32 %v5467_v36, %v1884_v33  ;;  %4410 = vmatmul.msk.f32.gmra.mxu0 %vm2755_vm0, %v2629_v2  ;;  %v1014_v39 = vpop.permute.xlu2 %1013  ;;  %v7888_v2 = vld [vmem:[#allocation28_spill] sm:$0xff] }
 0x1ca   :  { %v1501_v33 = vmul.f32 %v5460_v0, %v7888_v2 }
 0x1cb   :  { %v2397_v17 = vadd.f32 %v2269_v9, %v1627_v51  ;;  %4602 = vset.pattern.permute.xlu2 %v7839_v22 }
 0x1cc   :  { %1983 = vperm.xlu2 %4602, %v7883_v52   ;;  %v2243_v52 = vmul.f32 %v5467_v36, %v1780_v34  ;;  %v4755_v34 = vld [vmem:[%s7793_s0 + $0x220] sm:$0xff] }
 0x1cd   :  { %4601 = vset.pattern.permute.xlu1 %v7839_v22  ;;  %v2529_v61 = vadd.f32 %v5488_v5, %v2397_v17  ;;  %v860_v17 = vmul.f32 %v5453_v1, %v5671_v16 }
 0x1ce   :  { %1915 = vperm.xlu1 %4601, %v4752_v47   ;;  %v5806_v3 = vpop.f32.mrf.mxu0 }
 0x1cf   :  { %v5798_v29 = vpop.permute.xlu0 %521  ;;  %v2657_v35 = vmax.f32 %v2529_v61, 0.0 }
 0x1d1   :  { %4411 = vmatmul.msk.f32.gmra.mxu0 %vm2755_vm0, %v2630_v32  ;;  %4438 = vmatmul.msk.f32.gmra.mxu1 %vm2755_vm0, %v2657_v35  ;;  %v1118_v42 = vpop.permute.xlu1 %1117  ;;  %v1126_v54 = vpop.permute.xlu2 %1125 }
 0x1d2   :  { %v1500_v63 = vmul.f32 %v5460_v0, %v1118_v42  ;;  %v1502_v43 = vmul.f32 %v5460_v0, %v1126_v54  ;;  %v1629_v42 = vadd.f32 %v1501_v33, %v859_v60 }
 0x1d4   :  { %v1628_v20 = vadd.f32 %v1500_v63, %v858_v46  ;;  %4603 = vset.pattern.permute.xlu2 %v7840_v4  ;;  %v7889_v46 = vld [vmem:[#allocation15_spill] sm:$0xff] }
 0x1d5   :  { %1149 = vperm.xlu2 %4603, %v7885_v23   ;;  %v2272_v63 = vmul.f32 %v5467_v36, %v7889_v46 }
 0x1d6   :  { %v2398_v62 = vadd.f32 %v2270_v30, %v1628_v20  ;;  %1807 = vperm.xlu1 %4601, %v4754_v8   ;;  %v5822_v25 = vpop.f32.mrf.mxu0  ;;  %v1630_v30 = vadd.f32 %v1502_v43, %v860_v17 }
 0x1d7   :  { %v5813_v12 = vpop.permute.xlu0 %531 }
 0x1d8   :  { %v2530_v28 = vadd.f32 %v5488_v5, %v2398_v62  ;;  %v1474_v62 = vmul.f32 %v5460_v0, %v1014_v39  ;;  %v2400_v53 = vadd.f32 %v2272_v63, %v1630_v30 }
 0x1d9   :  { %v1010_v27 = vpop.permute.xlu1 %1009 }
 0x1da   :  { %v1473_v48 = vmul.f32 %v5460_v0, %v1010_v27  ;;  %v1788_v6 = vpop.permute.xlu2 %1787  ;;  %v2658_v58 = vmax.f32 %v2530_v28, 0.0  ;;  %v7891_v28 = vld [vmem:[#allocation6_spill] sm:$0xff] }
 0x1db   :  { %v832_v27 = vmul.f32 %v5453_v1, %v7891_v28 }
 0x1dc   :  { %v1601_v59 = vadd.f32 %v1473_v48, %v831_v15  ;;  %4439 = vmatmul.msk.f32.gmra.mxu1 %vm2755_vm0, %v2658_v58 }
 0x1dd   :  { %4605 = vset.pattern.permute.xlu2 %v7839_v22  ;;  %v1602_v58 = vadd.f32 %v1474_v62, %v832_v27 }
 0x1de   :  { %v2371_v47 = vadd.f32 %v2243_v52, %v1601_v59  ;;  %4604 = vset.pattern.permute.xlu1 %v7840_v4  ;;  %1919 = vperm.xlu2 %4605, %v7885_v23   ;;  %v7890_v23 = vld [vmem:[#allocation33_spill] sm:$0xff]  ;;  %v5849_v8 = vpop.f32.mrf.mxu0 }
 0x1df   :  { %1217 = vperm.xlu1 %4604, %v4755_v34   ;;  %v5833_v51 = vpop.permute.xlu0 %551 }
 0x1e0   :  { %v2503_v9 = vadd.f32 %v5488_v5, %v2371_v47  ;;  %v2532_v47 = vadd.f32 %v5488_v5, %v2400_v53 }
 0x1e2   :  { %v1892_v61 = vpop.permute.xlu1 %1891  ;;  %v1900_v32 = vpop.permute.xlu2 %1899  ;;  %v2631_v35 = vmax.f32 %v2503_v9, 0.0  ;;  %v2660_v34 = vmax.f32 %v2532_v47, 0.0  ;;  %v833_v9 = vmul.f32 %v5453_v1, %v5524_v50  ;;  %v7895_v47 = vld [vmem:[#allocation17_spill] sm:$0xff] }
 0x1e3   :  { %v2271_v41 = vmul.f32 %v5467_v36, %v1892_v61  ;;  %v2273_v27 = vmul.f32 %v5467_v36, %v1900_v32  ;;  %v4758_v32 = vld [vmem:[%s7793_s0 + $0x230] sm:$0xff] }
 0x1e4   :  { %4412 = vmatmul.msk.f32.gmra.mxu0 %vm2755_vm0, %v2631_v35 }
 0x1e5   :  { %v2399_v20 = vadd.f32 %v2271_v41, %v1629_v42  ;;  %v2245_v42 = vmul.f32 %v5467_v36, %v1788_v6 }
 0x1e6   :  { %1811 = vperm.xlu2 %4605, %v7890_v23   ;;  %v5866_v17 = vpop.f32.mrf.mxu0 }
 0x1e7   :  { %1041 = vperm.xlu1 %4604, %v7890_v23   ;;  %v5846_v16 = vpop.permute.xlu0 %571  ;;  %v2531_v54 = vadd.f32 %v5488_v5, %v2399_v20  ;;  %v7892_v20 = vld [vmem:[#allocation38_spill] sm:$0xff] }
 0x1e8   :  { %v861_v23 = vmul.f32 %v5453_v1, %v7892_v20 }
 0x1e9   :  { %v2659_v15 = vmax.f32 %v2531_v54, 0.0 }
 0x1ea   :  { %v1784_v48 = vpop.permute.xlu1 %1783 }
 0x1eb   :  { %v2244_v52 = vmul.f32 %v5467_v36, %v1784_v48  ;;  %4440 = vmatmul.msk.f32.gmra.mxu1 %vm2755_vm0, %v2659_v15  ;;  %v1134_v39 = vpop.permute.xlu2 %1133  ;;  %v7893_v48 = vmov 0  }
 0x1ec   :  { %v1504_v20 = vmul.f32 %v5460_v0, %v1134_v39 }
 0x1ed   :  { %v2372_v59 = vadd.f32 %v2244_v52, %v1602_v58  ;;  %v7894_v58 = vld [vmem:[#allocation30_spill] sm:$0xff] }
 0x1ee   :  { %4606 = vset.pattern.permute.xlu2 %v7840_v4  ;;  %v5881_v28 = vpop.f32.mrf.mxu0  ;;  %v1476_v52 = vmul.f32 %v5460_v0, %v7894_v58 }
 0x1ef   :  { %1153 = vperm.xlu1 %4604, %v4756_v40   ;;  %1221 = vperm.xlu2 %4606, %v5574_v13   ;;  %v5861_v60 = vpop.permute.xlu0 %576  ;;  %v2504_v2 = vadd.f32 %v5488_v5, %v2372_v59  ;;  %v834_v40 = vmul.f32 %v5453_v1, %v7895_v47 }
 0x1f1   :  { %v2632_v33 = vmax.f32 %v2504_v2, 0.0 }
 0x1f3   :  { %4413 = vmatmul.msk.f32.gmra.mxu0 %vm2755_vm0, %v2632_v33  ;;  %4441 = vmatmul.msk.f32.gmra.mxu1 %vm2755_vm0, %v2660_v34  ;;  %v1018_v43 = vpop.permute.xlu1 %1017  ;;  %v1026_v61 = vpop.permute.xlu2 %1025 }
 0x1f4   :  { %v1475_v35 = vmul.f32 %v5460_v0, %v1018_v43  ;;  %v1477_v43 = vmul.f32 %v5460_v0, %v1026_v61 }
 0x1f6   :  { %v1603_v41 = vadd.f32 %v1475_v35, %v833_v9  ;;  %v1604_v9 = vadd.f32 %v1476_v52, %v834_v40 }
 0x1f7   :  { %4607 = vset.pattern.permute.xlu1 %v7839_v22  ;;  %1045 = vperm.xlu2 %4606, %v5744_v56   ;;  %v5874_v46 = vpop.permute.xlu0 %586 }
 0x1f8   :  { %v2373_v50 = vadd.f32 %v2245_v42, %v1603_v41  ;;  %1991 = vperm.xlu1 %4607, %v5574_v13   ;;  %v4757_v13 = vld [vmem:[%s7793_s0 + $0x1a8] sm:$0xff]  ;;  %v7896_v42 = vld [vmem:[#allocation8_spill] sm:$0xff] }
 0x1f9   :  { %v835_v41 = vmul.f32 %v5453_v1, %v7896_v42 }
 0x1fa   :  { %v2505_v63 = vadd.f32 %v5488_v5, %v2373_v50  ;;  %v3181_v50 = vpop.f32.mrf.mxu0 }
 0x1fb   :  { %v1130_v30 = vpop.permute.xlu1 %1129 }
 0x1fc   :  { %v1503_v62 = vmul.f32 %v5460_v0, %v1130_v30  ;;  %v1908_v54 = vpop.permute.xlu2 %1907  ;;  %v2633_v6 = vmax.f32 %v2505_v63, 0.0 }
 0x1fe   :  { %v1631_v56 = vadd.f32 %v1503_v62, %v861_v23  ;;  %4414 = vmatmul.msk.f32.gmra.mxu0 %vm2755_vm0, %v2633_v6  ;;  %v1605_v23 = vadd.f32 %v1477_v43, %v835_v41  ;;  %v7897_v6 = vld [vmem:[#allocation29_spill] sm:$0xff]  ;;  %v863_v43 = vmul.f32 %v5453_v1, %v5685_v19 }
 0x1ff   :  { %1157 = vperm.xlu2 %4606, %v4757_v13   ;;  %v5888_v53 = vpop.permute.xlu0 %606 }
 0x200   :  { %v2401_v15 = vadd.f32 %v2273_v27, %v1631_v56  ;;  %4608 = vset.pattern.permute.xlu1 %v7893_v48  ;;  %v862_v27 = vmul.f32 %v5453_v1, %v7897_v6 }
 0x201   :  { %526 = vperm.xlu1 %4608, %v4758_v32  }
 0x202   :  { %v2533_v59 = vadd.f32 %v5488_v5, %v2401_v15  ;;  %v3184_v39 = vpop.f32.mrf.mxu0 }
 0x204   :  { %v1792_v2 = vpop.permute.xlu1 %1791  ;;  %v5899_v33 = vpop.permute.xlu2 %1799  ;;  %v2661_v34 = vmax.f32 %v2533_v59, 0.0  ;;  %v1632_v59 = vadd.f32 %v1504_v20, %v862_v27  ;;  %v7899_v20 = vld [vmem:[#allocation41_spill] sm:$0xff] }
 0x205   :  { %v2246_v35 = vmul.f32 %v5467_v36, %v1792_v2 }
 0x206   :  { %4442 = vmatmul.msk.f32.gmra.mxu1 %vm2755_vm0, %v2661_v34 }
 0x207   :  { %v2374_v63 = vadd.f32 %v2246_v35, %v1604_v9  ;;  %4610 = vset.pattern.permute.xlu2 %v7839_v22 }
 0x208   :  { %v1796_v30 = vpop.permute.xlu0 %1795  ;;  %1995 = vperm.xlu2 %4610, %v4758_v32  }
 0x209   :  { %v2247_v62 = vmul.f32 %v5467_v36, %v1796_v30  ;;  %4609 = vset.pattern.permute.xlu1 %v7839_v22  ;;  %v2506_v61 = vadd.f32 %v5488_v5, %v2374_v63  ;;  %v7898_v63 = vld [vmem:[#allocation32_spill] sm:$0xff] }
 0x20a   :  { %1927 = vperm.xlu1 %4609, %v4757_v13   ;;  %v4759_v13 = vld [vmem:[%s7793_s0 + $0xd0] sm:$0xff]  ;;  %v1506_v30 = vmul.f32 %v5460_v0, %v7898_v63  ;;  %v3187_v19 = vpop.f32.mrf.mxu0 }
 0x20b   :  { %v2375_v56 = vadd.f32 %v2247_v62, %v1605_v23  ;;  %v2634_v15 = vmax.f32 %v2506_v61, 0.0  ;;  %v864_v23 = vmul.f32 %v5453_v1, %v7899_v20  ;;  %v2275_v62 = vmul.f32 %v5467_v36, %v1908_v54  ;;  %v5943_v54 = vld [vmem:[%s7797_s4] ss:$0 sm:$0xff] }
 0x20c   :  { %v1904_v58 = vpop.permute.xlu1 %1903  ;;  %v1912_v52 = vpop.permute.xlu2 %1911  ;;  %v3182_v63 = vadd.f32 %v5943_v54, %v3181_v50 }
 0x20d   :  { %v2274_v32 = vmul.f32 %v5467_v36, %v1904_v58  ;;  %4415 = vmatmul.msk.f32.gmra.mxu0 %vm2755_vm0, %v2634_v15  ;;  %v2507_v40 = vadd.f32 %v5488_v5, %v2375_v56  ;;  %v2276_v6 = vmul.f32 %v5467_v36, %v1912_v52  ;;  %v7900_v56 = vld [vmem:[#allocation56_spill] sm:$0xff]  ;;  %v1634_v15 = vadd.f32 %v1506_v30, %v864_v23  ;;  %v4761_v23 = vld [vmem:[%s7793_s0 + $0x1b0] sm:$0xff] }
 0x20e   :  { %v836_v58 = vmul.f32 %v5453_v1, %v5545_v14  ;;  %v3188_v30 = vadd.f32 %v5943_v54, %v3187_v19 }
 0x20f   :  { %v2402_v47 = vadd.f32 %v2274_v32, %v1632_v59  ;;  %v2635_v34 = vmax.f32 %v2507_v40, 0.0  ;;  %v2404_v40 = vadd.f32 %v2276_v6, %v1634_v15 }
 0x210   :  { %1819 = vperm.xlu2 %4610, %v4759_v13   ;;  %v3551_v6 = vmax.f32 %v3188_v30, 0.0  ;;  %v4765_v30 = vld [vmem:[%s7793_s0 + $0xd8] sm:$0xff] }
 0x211   :  { %v2534_v2 = vadd.f32 %v5488_v5, %v2402_v47 }
 0x212   :  { %4611 = vset.pattern.permute.xlu1 %v7840_v4 }
 0x213   :  { %1049 = vperm.xlu1 %4611, %v4759_v13   ;;  %v2662_v9 = vmax.f32 %v2534_v2, 0.0 }
 0x215   :  { %4416 = vmatmul.msk.f32.gmra.mxu0 %vm2755_vm0, %v2635_v34  ;;  %4443 = vmatmul.msk.f32.gmra.mxu1 %vm2755_vm0, %v2662_v9  ;;  %v1138_v35 = vpop.permute.xlu1 %1137  ;;  %v1034_v42 = vpop.permute.xlu2 %1033  ;;  %v7901_v9 = vld [vmem:[#allocation19_spill] sm:$0xff] }
 0x216   :  { %v1505_v41 = vmul.f32 %v5460_v0, %v1138_v35  ;;  %v1479_v52 = vmul.f32 %v5460_v0, %v1034_v42  ;;  %v1804_v34 = vpop.permute.xlu0 %1803  ;;  %v837_v14 = vmul.f32 %v5453_v1, %v7901_v9  ;;  %v2248_v35 = vmul.f32 %v5467_v36, %v5899_v33  ;;  %v5959_v1 = vld [vmem:[%s7794_s1 + $0x2] ss:$0 sm:$0xff] }
 0x217   :  { %v2536_v36 = vadd.f32 %v5488_v5, %v2404_v40  ;;  %v3694_v40 = vsel %vm3669_vm1, %v3551_v6, -inf }
 0x218   :  { %v1633_v61 = vadd.f32 %v1505_v41, %v863_v43  ;;  %4612 = vset.pattern.permute.xlu2 %v7840_v4  ;;  %v3185_v43 = vadd.f32 %v5943_v54, %v3184_v39  ;;  %v2249_v39 = vmul.f32 %v5959_v1, %v1804_v34 }
 0x219   :  { %1229 = vperm.xlu2 %4612, %v5591_v44  }
 0x21a   :  { %v2403_v27 = vadd.f32 %v2275_v62, %v1633_v61  ;;  %v3550_v33 = vmax.f32 %v3185_v43, 0.0  ;;  %v3549_v61 = vmax.f32 %v3182_v63, 0.0 }
 0x21b   :  { %1161 = vperm.xlu1 %4611, %v7900_v56  }
 0x21c   :  { %v2535_v59 = vadd.f32 %v5488_v5, %v2403_v27  ;;  %v3190_v42 = vpop.f32.mrf.mxu0 }
 0x21d   :  { %v1030_v32 = vpop.permute.xlu1 %1029  ;;  %v5938_v47 = vpop.permute.xlu2 %1213  ;;  %v3191_v50 = vadd.f32 %v5943_v54, %v3190_v42 }
 0x21e   :  { %v1478_v13 = vmul.f32 %v5460_v0, %v1030_v32  ;;  %v2663_v2 = vmax.f32 %v2535_v59, 0.0  ;;  %v1607_v0 = vadd.f32 %v1479_v52, %v837_v14  ;;  %v117_v32 = vld [vmem:[%s7793_s0 + $0x240] sm:$0xff] }
 0x21f   :  { %v3552_v59 = vmax.f32 %v3191_v50, 0.0  ;;  %v5982_v52 = vld [vmem:[%s7795_s2] ss:$0 sm:$0xff]  ;;  %v5995_v14 = vld [vmem:[%s7794_s1 + $0x1] ss:$0 sm:$0xff] }
 0x220   :  { %v1606_v41 = vadd.f32 %v1478_v13, %v836_v58  ;;  %4444 = vmatmul.msk.f32.gmra.mxu1 %vm2755_vm0, %v2663_v2  ;;  %v2377_v27 = vadd.f32 %v2249_v39, %v1607_v0  ;;  %v3692_v58 = vsel %vm3669_vm1, %v3550_v33, -inf  ;;  %v5988_v2 = vld [vmem:[%s7794_s1] ss:$0 sm:$0xff]  ;;  %v1524_v33 = vmul.f32 %v5995_v14, %v5938_v47 }
 0x221   :  { %4614 = vset.pattern.permute.xlu2 %v7839_v22  ;;  %v881_v34 = vmul.f32 %v5988_v2, %v5781_v7  ;;  %v3696_v63 = vsel %vm3669_vm1, %v3552_v59, -inf }
 0x222   :  { %v2376_v20 = vadd.f32 %v2248_v35, %v1606_v41  ;;  %1999 = vperm.xlu2 %4614, %v5591_v44   ;;  %v2664_v44 = vmax.f32 %v2536_v36, 0.0  ;;  %v2509_v13 = vadd.f32 %v5982_v52, %v2377_v27  ;;  %v5998_v41 = vpop.f32.mrf.mxu1 }
 0x223   :  { %4613 = vset.pattern.permute.xlu1 %v7839_v22 }
 0x224   :  { %1931 = vperm.xlu1 %4613, %v4761_v23   ;;  %v2508_v62 = vadd.f32 %v5488_v5, %v2376_v20  ;;  %v3691_v5 = vsel %vm3669_vm1, %v3549_v61, -inf  ;;  %v2637_v20 = vmax.f32 %v2509_v13, 0.0 }
 0x225   :  { %v1210_v19 = vpop.permute.xlu1 %1209  ;;  %v3693_v9 = vmax.f32 %v3691_v5, %v3692_v58 }
 0x226   :  { %v2636_v56 = vmax.f32 %v2508_v62, 0.0  ;;  %v1984_v15 = vpop.permute.xlu2 %1983  ;;  %v1523_v43 = vmul.f32 %v5995_v14, %v1210_v19  ;;  %v7902_v19 = vld [vmem:[#allocation54_spill] sm:$0xff] }
 0x227   :  { %v3695_v42 = vmax.f32 %v3693_v9, %v3694_v40  ;;  %v882_v6 = vmul.f32 %v5988_v2, %v7902_v19  ;;  %v2294_v27 = vmul.f32 %v5959_v1, %v1984_v15  ;;  %v4766_v40 = vld [vmem:[%s7793_s0 + $0x1b8] sm:$0xff] }
 0x228   :  { %4417 = vmatmul.msk.f32.gmra.mxu0 %vm2755_vm0, %v2636_v56  ;;  %4445 = vmatmul.msk.f32.gmra.mxu1 %vm2755_vm0, %v2664_v44  ;;  %v1651_v50 = vadd.f32 %v1523_v43, %v881_v34 }
 0x229   :  { %v3697_v36 = vmax.f32 %v3695_v42, %v3696_v63  ;;  %v1652_v58 = vadd.f32 %v1524_v33, %v882_v6 }
 0x22a   :  { %4615 = vset.pattern.permute.xlu2 %v7893_v48  ;;  %v6017_v59 = vpop.f32.mrf.mxu1 }
 0x22b   :  { %536 = vperm.xlu2 %4615, %v117_v32   ;;  %v3193_v35 = vpop.f32.mrf.mxu0  ;;  %v2422_v5 = vadd.f32 %v2294_v27, %v1652_v58 }
 0x22c   :  { %1823 = vperm.xlu1 %4613, %v4765_v30   ;;  %v3194_v7 = vadd.f32 %v5943_v54, %v3193_v35 }
 0x22d   :  { %v2554_v63 = vadd.f32 %v5982_v52, %v2422_v5 }
 0x22e   :  { %v3553_v0 = vmax.f32 %v3194_v7, 0.0  ;;  %v1980_v39 = vpop.permute.xlu1 %1979 }
 0x22f   :  { %v2293_v23 = vmul.f32 %v5959_v1, %v1980_v39  ;;  %v1150_v62 = vpop.permute.xlu2 %1149  ;;  %v866_v39 = vmul.f32 %v5988_v2, %v5699_v18  ;;  %v2682_v33 = vmax.f32 %v2554_v63, 0.0 }
 0x230   :  { %v3698_v61 = vsel %vm3669_vm1, %v3553_v0, -inf  ;;  %4418 = vmatmul.msk.f32.gmra.mxu0 %vm2755_vm0, %v2637_v20  ;;  %v4767_v0 = vld [vmem:[%s7793_s0 + $0xe0] sm:$0xff]  ;;  %v1508_v20 = vmul.f32 %v5995_v14, %v1150_v62 }
 0x231   :  { %v6013_v56 = vmax.f32 %v3697_v36, %v3698_v61  ;;  %v2421_v44 = vadd.f32 %v2293_v23, %v1651_v50  ;;  %v7903_v50 = vld [vmem:[#allocation31_spill] sm:$0xff] }
 0x232   :  { %v6027_v7 = vpop.f32.mrf.mxu1  ;;  %v865_v23 = vmul.f32 %v5988_v2, %v7903_v50  ;;  %v1636_v6 = vadd.f32 %v1508_v20, %v866_v39 }
 0x233   :  { %4617 = vset.pattern.permute.xlu2 %v7840_v4  ;;  %v2553_v47 = vadd.f32 %v5982_v52, %v2421_v44 }
 0x234   :  { %4616 = vset.pattern.permute.xlu1 %v7840_v4  ;;  %1233 = vperm.xlu2 %4617, %v117_v32  }
 0x235   :  { %1165 = vperm.xlu1 %4616, %v4766_v40   ;;  %v2681_v15 = vmax.f32 %v2553_v47, 0.0  ;;  %v7904_v47 = vld [vmem:[#allocation36_spill] sm:$0xff] }
 0x236   :  { %v3196_v13 = vpop.f32.mrf.mxu0  ;;  %v1480_v5 = vmul.f32 %v5995_v14, %v7904_v47  ;;  %v4769_v47 = vld [vmem:[%s7793_s0 + $0x1c0] sm:$0xff] }
 0x237   :  { %v3197_v34 = vadd.f32 %v5943_v54, %v3196_v13  ;;  %4462 = vmatmul.msk.f32.vlgmr.msra.gmra.mxu2 %vm2755_vm0, %v2681_v15  ;;  %v1146_v9 = vpop.permute.xlu1 %1145  ;;  %v1988_v13 = vpop.permute.xlu0 %1987 }
 0x238   :  { %v1920_v43 = vpop.permute.xlu2 %1919  ;;  %v1507_v36 = vmul.f32 %v5995_v14, %v1146_v9  ;;  %v7905_v9 = vld [vmem:[#allocation10_spill] sm:$0xff] }
 0x239   :  { %v3554_v35 = vmax.f32 %v3197_v34, 0.0  ;;  %v2278_v18 = vmul.f32 %v5959_v1, %v1920_v43  ;;  %v838_v43 = vmul.f32 %v5988_v2, %v7905_v9 }
 0x23a   :  { %v1635_v27 = vadd.f32 %v1507_v36, %v865_v23  ;;  %v6054_v58 = vpop.f32.mrf.mxu1 }
 0x23b   :  { %v3700_v30 = vsel %vm3669_vm1, %v3554_v35, -inf  ;;  %v2406_v40 = vadd.f32 %v2278_v18, %v1636_v6  ;;  %v1608_v39 = vadd.f32 %v1480_v5, %v838_v43  ;;  %v7906_v43 = vld [vmem:[#allocation49_spill] sm:$0xff] }
 0x23c   :  { %v3701_v42 = vmax.f32 %v6013_v56, %v3700_v30  ;;  %1057 = vperm.xlu2 %4617, %v4767_v0   ;;  %v6048_v56 = vld [vmem:[%s7793_s0 + $0x250] sm:$0xff] }
 0x23d   :  { %4618 = vset.pattern.permute.xlu1 %v7839_v22  ;;  %2011 = vperm.xlu0 %4658, %v6048_v56   ;;  %v2538_v50 = vadd.f32 %v5982_v52, %v2406_v40 }
 0x23e   :  { %2003 = vperm.xlu1 %4618, %v117_v32   ;;  %v118_v32 = vld [vmem:[%s7793_s0 + $0x248] sm:$0xff] }
 0x23f   :  { %4463 = vmatmul.msk.f32.gmra.mxu2 %vm2755_vm0, %v2682_v33 }
 0x240   :  { %v1916_v61 = vpop.permute.xlu1 %1915  ;;  %v6041_v19 = vpop.permute.xlu2 %1811 }
 0x241   :  { %v2277_v62 = vmul.f32 %v5959_v1, %v1916_v61 }
 0x242   :  { %v6075_v6 = vpop.f32.mrf.mxu1 }
 0x243   :  { %v2405_v44 = vadd.f32 %v2277_v62, %v1635_v27  ;;  %v2666_v62 = vmax.f32 %v2538_v50, 0.0 }
 0x244   :  { %4619 = vset.pattern.permute.xlu2 %v7893_v48 }
 0x245   :  { %541 = vperm.xlu2 %4619, %v118_v32   ;;  %v2537_v15 = vadd.f32 %v5982_v52, %v2405_v44 }
 0x246   :  { %1827 = vperm.xlu1 %4618, %v4767_v0   ;;  %v3199_v34 = vpop.f32.mrf.mxu0  ;;  %v6071_v0 = vld [vmem:[%s7793_s0 + $0x1d8] sm:$0xff] }
 0x247   :  { %v3200_v35 = vadd.f32 %v5943_v54, %v3199_v34  ;;  %v2665_v63 = vmax.f32 %v2537_v15, 0.0  ;;  %1951 = vperm.xlu0 %4658, %v6071_v0   ;;  %v1924_v15 = vpop.permute.xlu0 %1923 }
 0x248   :  { %v1808_v30 = vpop.permute.xlu1 %1807 }
 0x249   :  { %v3555_v20 = vmax.f32 %v3200_v35, 0.0  ;;  %v2250_v36 = vmul.f32 %v5959_v1, %v1808_v30  ;;  %4446 = vmatmul.msk.f32.gmra.mxu1 %vm2755_vm0, %v2665_v63  ;;  %v6065_v33 = vpop.permute.xlu2 %1221  ;;  %v883_v35 = vmul.f32 %v5988_v2, %v7906_v43  ;;  %v2295_v63 = vmul.f32 %v5959_v1, %v1988_v13 }
 0x24a   :  { %v839_v13 = vmul.f32 %v5988_v2, %v5568_v31 }
 0x24b   :  { %v3702_v23 = vsel %vm3669_vm1, %v3555_v20, -inf  ;;  %v2378_v61 = vadd.f32 %v2250_v36, %v1608_v39  ;;  %v6093_v39 = vld [vmem:[%s7793_s0 + $0x108] sm:$0xff] }
 0x24c   :  { %v3703_v27 = vmax.f32 %v3701_v42, %v3702_v23  ;;  %v6099_v23 = vpop.f32.mrf.mxu1 }
 0x24d   :  { %4621 = vset.pattern.permute.xlu2 %v7839_v22  ;;  %v2510_v18 = vadd.f32 %v5982_v52, %v2378_v61 }
 0x24e   :  { %4620 = vset.pattern.permute.xlu1 %v7840_v4  ;;  %v3202_v44 = vpop.f32.mrf.mxu0  ;;  %1939 = vperm.xlu2 %4621, %v4769_v47  }
 0x24f   :  { %v3203_v5 = vadd.f32 %v5943_v54, %v3202_v44  ;;  %1237 = vperm.xlu1 %4620, %v118_v32   ;;  %v2638_v40 = vmax.f32 %v2510_v18, 0.0  ;;  %1847 = vperm.xlu0 %4658, %v6093_v39  }
 0x251   :  { %v3556_v34 = vmax.f32 %v3203_v5, 0.0  ;;  %4419 = vmatmul.msk.f32.gmra.mxu0 %vm2755_vm0, %v2638_v40  ;;  %4447 = vmatmul.msk.f32.gmra.mxu1 %vm2755_vm0, %v2666_v62  ;;  %v1218_v42 = vpop.permute.xlu1 %1217  ;;  %v1046_v9 = vpop.permute.xlu2 %1045 }
 0x252   :  { %v1525_v30 = vmul.f32 %v5995_v14, %v1218_v42  ;;  %v1816_v5 = vpop.permute.xlu0 %1815 }
 0x253   :  { %v3704_v20 = vsel %vm3669_vm1, %v3556_v34, -inf  ;;  %v7907_v34 = vld [vmem:[#allocation21_spill] sm:$0xff] }
 0x254   :  { %v6097_v36 = vmax.f32 %v3703_v27, %v3704_v20  ;;  %v1653_v50 = vadd.f32 %v1525_v30, %v883_v35  ;;  %v1482_v27 = vmul.f32 %v5995_v14, %v1046_v9  ;;  %v840_v42 = vmul.f32 %v5988_v2, %v7907_v34  ;;  %v6116_v31 = vpop.f32.mrf.mxu1  ;;  %v7908_v20 = vld [vmem:[#allocation44_spill] sm:$0xff] }
 0x255   :  { %v2252_v9 = vmul.f32 %v5959_v1, %v1816_v5 }
 0x256   :  { %v2423_v61 = vadd.f32 %v2295_v63, %v1653_v50  ;;  %4623 = vset.pattern.permute.xlu2 %v7840_v4  ;;  %v4771_v63 = vld [vmem:[%s7793_s0 + $0x1c8] sm:$0xff] }
 0x257   :  { %4622 = vset.pattern.permute.xlu1 %v7839_v22  ;;  %1061 = vperm.xlu2 %4623, %v5786_v55   ;;  %v2251_v55 = vmul.f32 %v5959_v1, %v6041_v19  ;;  %v867_v19 = vmul.f32 %v5988_v2, %v7908_v20 }
 0x258   :  { %2007 = vperm.xlu1 %4622, %v118_v32   ;;  %v2555_v18 = vadd.f32 %v5982_v52, %v2423_v61  ;;  %v1610_v32 = vadd.f32 %v1482_v27, %v840_v42  ;;  %v2279_v61 = vmul.f32 %v5959_v1, %v1924_v15  ;;  %v884_v42 = vmul.f32 %v5988_v2, %v5798_v29 }
 0x259   :  { %v1042_v62 = vpop.permute.xlu1 %1041  ;;  %v6109_v47 = vpop.permute.xlu2 %1157 }
 0x25a   :  { %v1481_v44 = vmul.f32 %v5995_v14, %v1042_v62  ;;  %v2683_v40 = vmax.f32 %v2555_v18, 0.0 }
 0x25c   :  { %v1609_v43 = vadd.f32 %v1481_v44, %v839_v13  ;;  %4464 = vmatmul.msk.f32.gmra.mxu2 %vm2755_vm0, %v2683_v40  ;;  %v2380_v13 = vadd.f32 %v2252_v9, %v1610_v32  ;;  %v6130_v5 = vpop.f32.mrf.mxu1 }
 0x25e   :  { %v2379_v35 = vadd.f32 %v2251_v55, %v1609_v43  ;;  %v2512_v40 = vadd.f32 %v5982_v52, %v2380_v13  ;;  %v1526_v55 = vmul.f32 %v5995_v14, %v6065_v33 }
 0x25f   :  { %1173 = vperm.xlu2 %4623, %v4771_v63  }
 0x260   :  { %v2511_v30 = vadd.f32 %v5982_v52, %v2379_v35  ;;  %4624 = vset.pattern.permute.xlu1 %v7893_v48  ;;  %v2640_v32 = vmax.f32 %v2512_v40, 0.0  ;;  %v1654_v20 = vadd.f32 %v1526_v55, %v884_v42  ;;  %v7909_v42 = vld [vmem:[#allocation39_spill] sm:$0xff] }
 0x261   :  { %546 = vperm.xlu1 %4624, %v6048_v56   ;;  %v1154_v50 = vpop.permute.xlu1 %1153  ;;  %v3205_v15 = vpop.f32.mrf.mxu0  ;;  %v1527_v55 = vmul.f32 %v5995_v14, %v7909_v42 }
 0x262   :  { %v1509_v18 = vmul.f32 %v5995_v14, %v1154_v50  ;;  %v2639_v62 = vmax.f32 %v2511_v30, 0.0  ;;  %v1996_v27 = vpop.permute.xlu2 %1995  ;;  %v3206_v33 = vadd.f32 %v5943_v54, %v3205_v15 }
 0x263   :  { %v2297_v15 = vmul.f32 %v5959_v1, %v1996_v27  ;;  %v1510_v27 = vmul.f32 %v5995_v14, %v6109_v47 }
 0x264   :  { %v1637_v44 = vadd.f32 %v1509_v18, %v867_v19  ;;  %4420 = vmatmul.msk.f32.gmra.mxu0 %vm2755_vm0, %v2639_v62  ;;  %v3286_v19 = vpop.f32.mrf.mxu1  ;;  %v3557_v13 = vmax.f32 %v3206_v33, 0.0  ;;  %v886_v33 = vmul.f32 %v5988_v2, %v5813_v12 }
 0x266   :  { %v2407_v34 = vadd.f32 %v2279_v61, %v1637_v44 }
 0x267   :  { %4626 = vset.pattern.permute.xlu2 %v7839_v22 }
 0x268   :  { %1943 = vperm.xlu2 %4626, %v4771_v63   ;;  %v2539_v43 = vadd.f32 %v5982_v52, %v2407_v34 }
 0x269   :  { %4625 = vset.pattern.permute.xlu1 %v7840_v4 }
 0x26a   :  { %1241 = vperm.xlu1 %4625, %v6048_v56   ;;  %v1992_v9 = vpop.permute.xlu1 %1991  ;;  %v2667_v35 = vmax.f32 %v2539_v43, 0.0  ;;  %v6141_v30 = vpop.permute.xlu2 %1819  ;;  %v4772_v56 = vld [vmem:[%s7793_s0 + $0xf0] sm:$0xff] }
 0x26b   :  { %v2296_v29 = vmul.f32 %v5959_v1, %v1992_v9 }
 0x26c   :  { %4421 = vmatmul.msk.f32.gmra.mxu0 %vm2755_vm0, %v2640_v32  ;;  %4448 = vmatmul.msk.f32.gmra.mxu1 %vm2755_vm0, %v2667_v35  ;;  %v3712_v32 = vsel %vm3669_vm1, %v3557_v13, -inf  ;;  %v3289_v35 = vpop.f32.mrf.mxu1  ;;  %v7910_v13 = vld [vmem:[#allocation34_spill] sm:$0xff] }
 0x26d   :  { %v2424_v63 = vadd.f32 %v2296_v29, %v1654_v20 }
 0x26f   :  { %v2556_v50 = vadd.f32 %v5982_v52, %v2424_v63 }
 0x270   :  { %v3208_v61 = vpop.f32.mrf.mxu0  ;;  %1835 = vperm.xlu2 %4626, %v4772_v56  }
 0x271   :  { %v3209_v18 = vadd.f32 %v5943_v54, %v3208_v61  ;;  %v2684_v62 = vmax.f32 %v2556_v50, 0.0  ;;  %v4773_v61 = vld [vmem:[%s7793_s0 + $0x258] sm:$0xff] }
 0x272   :  { %1065 = vperm.xlu1 %4625, %v4772_v56   ;;  %v4774_v56 = vld [vmem:[%s7793_s0 + $0x1d0] sm:$0xff] }
 0x273   :  { %v3558_v44 = vmax.f32 %v3209_v18, 0.0  ;;  %4465 = vmatmul.msk.f32.gmra.mxu2 %vm2755_vm0, %v2684_v62  ;;  %v527_v40 = vpop.permute.xlu1 %526  ;;  %v1230_v34 = vpop.permute.xlu2 %1229  ;;  %v868_v18 = vmul.f32 %v5988_v2, %v7910_v13 }
 0x274   :  { %v885_v43 = vmul.f32 %v5988_v2, %v527_v40  ;;  %v1528_v63 = vmul.f32 %v5995_v14, %v1230_v34 }
 0x275   :  { %v3713_v9 = vsel %vm3669_vm1, %v3558_v44, -inf }
 0x276   :  { %v3714_v20 = vmax.f32 %v3712_v32, %v3713_v9  ;;  %v1655_v29 = vadd.f32 %v1527_v55, %v885_v43  ;;  %v1656_v62 = vadd.f32 %v1528_v63, %v886_v33  ;;  %v1638_v55 = vadd.f32 %v1510_v27, %v868_v18 }
 0x277   :  { %v3281_v33 = vadd.f32 %v5943_v54, %v6116_v31  ;;  %v3278_v18 = vadd.f32 %v5943_v54, %v6099_v23 }
 0x278   :  { %v2425_v50 = vadd.f32 %v2297_v15, %v1655_v29  ;;  %4627 = vset.pattern.permute.xlu2 %v7840_v4 }
 0x279   :  { %1245 = vperm.xlu2 %4627, %v4773_v61  }
 0x27a   :  { %1177 = vperm.xlu1 %4625, %v4774_v56   ;;  %v2557_v12 = vadd.f32 %v5982_v52, %v2425_v50  ;;  %v3292_v50 = vpop.f32.mrf.mxu1 }
 0x27b   :  { %v3211_v44 = vpop.f32.mrf.mxu0 }
 0x27c   :  { %v3212_v40 = vadd.f32 %v5943_v54, %v3211_v44  ;;  %v1928_v47 = vpop.permute.xlu1 %1927  ;;  %v2685_v34 = vmax.f32 %v2557_v12, 0.0  ;;  %v2000_v42 = vpop.permute.xlu2 %1999 }
 0x27d   :  { %v2280_v15 = vmul.f32 %v5959_v1, %v1928_v47  ;;  %v2298_v43 = vmul.f32 %v5959_v1, %v2000_v42  ;;  %v7911_v42 = vld [vmem:[#allocation13_spill] sm:$0xff] }
 0x27e   :  { %v3559_v32 = vmax.f32 %v3212_v40, 0.0  ;;  %4466 = vmatmul.msk.f32.gmra.mxu2 %vm2755_vm0, %v2685_v34  ;;  %v3287_v40 = vadd.f32 %v5943_v54, %v3286_v19  ;;  %v841_v23 = vmul.f32 %v5988_v2, %v7911_v42 }
 0x27f   :  { %v2408_v9 = vadd.f32 %v2280_v15, %v1638_v55  ;;  %v2426_v29 = vadd.f32 %v2298_v43, %v1656_v62  ;;  %v3284_v62 = vadd.f32 %v5943_v54, %v6130_v5  ;;  %v3581_v55 = vmax.f32 %v3278_v18, 0.0 }
 0x280   :  { %v3715_v13 = vsel %vm3669_vm1, %v3559_v32, -inf  ;;  %v2253_v15 = vmul.f32 %v5959_v1, %v6141_v30  ;;  %v121_v32 = vld [vmem:[%s7793_s0 + $0x260] sm:$0xff] }
 0x281   :  { %v6181_v63 = vmax.f32 %v3714_v20, %v3715_v13  ;;  %4629 = vset.pattern.permute.xlu2 %v7839_v22  ;;  %v2540_v27 = vadd.f32 %v5982_v52, %v2408_v9  ;;  %v2558_v12 = vadd.f32 %v5982_v52, %v2426_v29  ;;  %v3582_v20 = vmax.f32 %v3281_v33, 0.0 }
 0x282   :  { %4628 = vset.pattern.permute.xlu1 %v7839_v22  ;;  %2015 = vperm.xlu2 %4629, %v4773_v61   ;;  %v3583_v5 = vmax.f32 %v3284_v62, 0.0  ;;  %v3584_v29 = vmax.f32 %v3287_v40, 0.0  ;;  %v3293_v13 = vadd.f32 %v5943_v54, %v3292_v50  ;;  %v3775_v33 = vsel %vm3669_vm1, %v3581_v55, -inf }
 0x283   :  { %1947 = vperm.xlu1 %4628, %v4774_v56   ;;  %v2668_v44 = vmax.f32 %v2540_v27, 0.0  ;;  %v2686_v31 = vmax.f32 %v2558_v12, 0.0  ;;  %v3290_v56 = vadd.f32 %v5943_v54, %v3289_v35  ;;  %v3295_v19 = vpop.f32.mrf.mxu1  ;;  %v3776_v9 = vsel %vm3669_vm1, %v3582_v20, -inf }
 0x284   :  { %v3778_v35 = vsel %vm3669_vm1, %v3583_v5, -inf  ;;  %v3296_v18 = vadd.f32 %v5943_v54, %v3295_v19  ;;  %v3777_v50 = vmax.f32 %v3775_v33, %v3776_v9  ;;  %v3780_v20 = vsel %vm3669_vm1, %v3584_v29, -inf }
 0x285   :  { %4449 = vmatmul.msk.f32.gmra.mxu1 %vm2755_vm0, %v2668_v44  ;;  %v1050_v47 = vpop.permute.xlu1 %1049  ;;  %v6193_v34 = vpop.permute.xlu2 %536  ;;  %v3585_v30 = vmax.f32 %v3290_v56, 0.0  ;;  %v4775_v44 = vld [vmem:[%s7793_s0 + $0xf8] sm:$0xff]  ;;  %v3586_v40 = vmax.f32 %v3293_v13, 0.0  ;;  %v869_v29 = vmul.f32 %v5988_v2, %v5714_v37 }
 0x286   :  { %v1483_v61 = vmul.f32 %v5995_v14, %v1050_v47  ;;  %4467 = vmatmul.msk.f32.gmra.mxu2 %vm2755_vm0, %v2686_v31  ;;  %v3587_v56 = vmax.f32 %v3296_v18, 0.0 }
 0x287   :  { %v3782_v5 = vsel %vm3669_vm1, %v3585_v30, -inf  ;;  %v3784_v9 = vsel %vm3669_vm1, %v3586_v40, -inf }
 0x288   :  { %v1611_v43 = vadd.f32 %v1483_v61, %v841_v23  ;;  %v3779_v23 = vmax.f32 %v3777_v50, %v3778_v35 }
 0x28a   :  { %v2381_v27 = vadd.f32 %v2253_v15, %v1611_v43  ;;  %v3214_v12 = vpop.f32.mrf.mxu0  ;;  %4630 = vset.pattern.permute.xlu2 %v7893_v48  ;;  %v3781_v19 = vmax.f32 %v3779_v23, %v3780_v20 }
 0x28b   :  { %v3215_v62 = vadd.f32 %v5943_v54, %v3214_v12  ;;  %1839 = vperm.xlu1 %4628, %v4775_v44   ;;  %556 = vperm.xlu2 %4630, %v121_v32   ;;  %v3786_v12 = vsel %vm3669_vm1, %v3587_v56, -inf }
 0x28c   :  { %v2513_v31 = vadd.f32 %v5982_v52, %v2381_v27  ;;  %v3783_v13 = vmax.f32 %v3781_v19, %v3782_v5 }
 0x28d   :  { %v3560_v47 = vmax.f32 %v3215_v62, 0.0  ;;  %v1162_v42 = vpop.permute.xlu1 %1161 }
 0x28e   :  { %v6217_v55 = vpop.permute.xlu2 %1233  ;;  %v2641_v61 = vmax.f32 %v2513_v31, 0.0  ;;  %v1511_v35 = vmul.f32 %v5995_v14, %v1162_v42 }
 0x28f   :  { %v3717_v15 = vsel %vm3669_vm1, %v3560_v47, -inf }
 0x290   :  { %v3718_v43 = vmax.f32 %v6181_v63, %v3717_v15  ;;  %4422 = vmatmul.msk.f32.gmra.mxu0 %vm2755_vm0, %v2641_v61  ;;  %v3785_v63 = vmax.f32 %v3783_v13, %v3784_v9  ;;  %v1639_v31 = vadd.f32 %v1511_v35, %v869_v29  ;;  %v842_v15 = vmul.f32 %v5988_v2, %v5583_v49  ;;  %v4776_v9 = vld [vmem:[%s7793_s0 + $0x100] sm:$0xff]  ;;  %v6258_v49 = vld [vmem:[%s7793_s0 + $0x270] sm:$0xff] }
 0x291   :  { %2027 = vperm.xlu0 %4658, %v6258_v49  }
 0x292   :  { %v3217_v33 = vpop.f32.mrf.mxu0  ;;  %v3298_v27 = vpop.f32.mrf.mxu1  ;;  %v3787_v44 = vmax.f32 %v3785_v63, %v3786_v12 }
 0x293   :  { %v3218_v30 = vadd.f32 %v5943_v54, %v3217_v33  ;;  %v3299_v18 = vadd.f32 %v5943_v54, %v3298_v27  ;;  %4631 = vset.pattern.permute.xlu1 %v7840_v4  ;;  %4632 = vset.pattern.permute.xlu2 %v7840_v4  ;;  %v1936_v63 = vpop.permute.xlu0 %1935 }
 0x294   :  { %1181 = vperm.xlu1 %4631, %v6071_v0   ;;  %1249 = vperm.xlu2 %4632, %v121_v32   ;;  %v7912_v0 = vld [vmem:[#allocation42_spill] sm:$0xff] }
 0x295   :  { %v3561_v37 = vmax.f32 %v3218_v30, 0.0  ;;  %v3588_v62 = vmax.f32 %v3299_v18, 0.0  ;;  %v1484_v56 = vmul.f32 %v5995_v14, %v7912_v0  ;;  %v6265_v30 = vld [vmem:[%s7793_s0 + $0x268] sm:$0xff] }
 0x296   :  { %v1932_v50 = vpop.permute.xlu1 %1931  ;;  %v6236_v42 = vpop.permute.xlu2 %1057 }
 0x297   :  { %v3719_v20 = vsel %vm3669_vm1, %v3561_v37, -inf  ;;  %v3788_v40 = vsel %vm3669_vm1, %v3588_v62, -inf  ;;  %v2281_v47 = vmul.f32 %v5959_v1, %v1932_v50  ;;  %v1612_v33 = vadd.f32 %v1484_v56, %v842_v15 }
 0x298   :  { %v6238_v23 = vmax.f32 %v3718_v43, %v3719_v20  ;;  %v6240_v61 = vmax.f32 %v3787_v44, %v3788_v40  ;;  %v7913_v40 = vld [vmem:[#allocation47_spill] sm:$0xff] }
 0x299   :  { %v2409_v5 = vadd.f32 %v2281_v47, %v1639_v31  ;;  %v870_v47 = vmul.f32 %v5988_v2, %v7913_v40 }
 0x29b   :  { %v2541_v19 = vadd.f32 %v5982_v52, %v2409_v5 }
 0x29c   :  { %4633 = vset.pattern.permute.xlu1 %v7839_v22  ;;  %1073 = vperm.xlu2 %4632, %v4776_v9  }
 0x29d   :  { %2019 = vperm.xlu1 %4633, %v121_v32   ;;  %v3301_v43 = vpop.f32.mrf.mxu1  ;;  %v2669_v29 = vmax.f32 %v2541_v19, 0.0  ;;  %v2282_v19 = vmul.f32 %v5959_v1, %v1936_v63 }
 0x29e   :  { %v1824_v13 = vpop.permute.xlu1 %1823  ;;  %v3302_v32 = vadd.f32 %v5943_v54, %v3301_v43  ;;  %v6280_v43 = vld [vmem:[%s7793_s0 + $0x1f8] sm:$0xff] }
 0x29f   :  { %v2254_v27 = vmul.f32 %v5959_v1, %v1824_v13  ;;  %4450 = vmatmul.msk.f32.gmra.mxu1 %vm2755_vm0, %v2669_v29  ;;  %v6253_v12 = vpop.permute.xlu2 %541  ;;  %1967 = vperm.xlu0 %4658, %v6280_v43   ;;  %v7914_v29 = vld [vmem:[#allocation45_spill] sm:$0xff] }
 0x2a0   :  { %v3589_v50 = vmax.f32 %v3302_v32, 0.0  ;;  %v1513_v13 = vmul.f32 %v5995_v14, %v7914_v29 }
 0x2a1   :  { %v2382_v35 = vadd.f32 %v2254_v27, %v1612_v33 }
 0x2a2   :  { %v6286_v33 = vsel %vm3669_vm1, %v3589_v50, -inf  ;;  %v887_v50 = vmul.f32 %v5988_v2, %v6193_v34 }
 0x2a3   :  { %v2514_v18 = vadd.f32 %v5982_v52, %v2382_v35 }
 0x2a4   :  { %4634 = vset.pattern.permute.xlu2 %v7893_v48 }
 0x2a5   :  { %v2642_v37 = vmax.f32 %v2514_v18, 0.0  ;;  %1843 = vperm.xlu1 %4633, %v4776_v9   ;;  %v3220_v62 = vpop.f32.mrf.mxu0  ;;  %v3304_v44 = vpop.f32.mrf.mxu1  ;;  %561 = vperm.xlu2 %4634, %v6265_v30  }
 0x2a6   :  { %v3221_v31 = vadd.f32 %v5943_v54, %v3220_v62  ;;  %v3305_v20 = vadd.f32 %v5943_v54, %v3304_v44 }
 0x2a7   :  { %4423 = vmatmul.msk.f32.gmra.mxu0 %vm2755_vm0, %v2642_v37  ;;  %v1166_v5 = vpop.permute.xlu1 %1165  ;;  %v7915_v37 = vld [vmem:[#allocation37_spill] sm:$0xff] }
 0x2a8   :  { %v3562_v0 = vmax.f32 %v3221_v31, 0.0  ;;  %v3590_v56 = vmax.f32 %v3305_v20, 0.0  ;;  %v1512_v15 = vmul.f32 %v5995_v14, %v1166_v5  ;;  %v1940_v9 = vpop.permute.xlu2 %1939  ;;  %v871_v62 = vmul.f32 %v5988_v2, %v7915_v37  ;;  %v4778_v5 = vld [vmem:[%s7793_s0 + $0x1e0] sm:$0xff] }
 0x2a9   :  { %v2283_v31 = vmul.f32 %v5959_v1, %v1940_v9  ;;  %v1529_v20 = vmul.f32 %v5995_v14, %v6217_v55  ;;  %v3158_v55 = vadd.f32 %v5943_v54, %v5734_v38  ;;  %v3167_v37 = vadd.f32 %v5943_v54, %v5806_v3 }
 0x2aa   :  { %v3721_v27 = vsel %vm3669_vm1, %v3562_v0, -inf  ;;  %v6290_v35 = vsel %vm3669_vm1, %v3590_v56, -inf  ;;  %v1640_v32 = vadd.f32 %v1512_v15, %v870_v47  ;;  %v3161_v0 = vadd.f32 %v5943_v54, %v5763_v57 }
 0x2ab   :  { %v3722_v18 = vmax.f32 %v6238_v23, %v3721_v27  ;;  %v3798_v63 = vmax.f32 %v6286_v33, %v6290_v35  ;;  %v1641_v23 = vadd.f32 %v1513_v13, %v871_v62  ;;  %v3164_v56 = vadd.f32 %v5943_v54, %v5791_v45 }
 0x2ac   :  { %v2410_v44 = vadd.f32 %v2282_v19, %v1640_v32  ;;  %v1657_v13 = vadd.f32 %v1529_v20, %v887_v50  ;;  %v3542_v38 = vmax.f32 %v3161_v0, 0.0  ;;  %v3541_v45 = vmax.f32 %v3158_v55, 0.0  ;;  %v7917_v55 = vld [vmem:[#allocation16_spill] sm:$0xff] }
 0x2ad   :  { %4636 = vset.pattern.permute.xlu1 %v7840_v4  ;;  %v3223_v40 = vpop.f32.mrf.mxu0  ;;  %4637 = vset.pattern.permute.xlu2 %v7839_v22  ;;  %v2411_v15 = vadd.f32 %v2283_v31, %v1641_v23  ;;  %v3543_v31 = vmax.f32 %v3164_v56, 0.0  ;;  %v3170_v50 = vadd.f32 %v5943_v54, %v5822_v25  ;;  %v1485_v20 = vmul.f32 %v5995_v14, %v6236_v42 }
 0x2ae   :  { %v3224_v47 = vadd.f32 %v5943_v54, %v3223_v40  ;;  %1253 = vperm.xlu1 %4636, %v6265_v30   ;;  %1955 = vperm.xlu2 %4637, %v4778_v5   ;;  %v2542_v34 = vadd.f32 %v5982_v52, %v2410_v44  ;;  %v3544_v23 = vmax.f32 %v3167_v37, 0.0  ;;  %v844_v0 = vmul.f32 %v5988_v2, %v7917_v55 }
 0x2af   :  { %v2543_v40 = vadd.f32 %v5982_v52, %v2411_v15  ;;  %v3673_v56 = vsel %vm3669_vm1, %v3543_v31, -inf  ;;  %v1832_v15 = vpop.permute.xlu0 %1831 }
 0x2b0   :  { %v3563_v19 = vmax.f32 %v3224_v47, 0.0  ;;  %v2004_v9 = vpop.permute.xlu1 %2003  ;;  %v2670_v29 = vmax.f32 %v2542_v34, 0.0  ;;  %v3173_v47 = vadd.f32 %v5943_v54, %v5849_v8  ;;  %v3671_v34 = vsel %vm3669_vm1, %v3542_v38, -inf }
 0x2b1   :  { %v2299_v27 = vmul.f32 %v5959_v1, %v2004_v9  ;;  %v1062_v32 = vpop.permute.xlu2 %1061  ;;  %v3670_v8 = vsel %vm3669_vm1, %v3541_v45, -inf  ;;  %v2671_v9 = vmax.f32 %v2543_v40, 0.0  ;;  %v3675_v37 = vsel %vm3669_vm1, %v3544_v23, -inf }
 0x2b2   :  { %v3723_v62 = vsel %vm3669_vm1, %v3563_v19, -inf  ;;  %4451 = vmatmul.msk.f32.gmra.mxu1 %vm2755_vm0, %v2670_v29  ;;  %v1486_v25 = vmul.f32 %v5995_v14, %v1062_v32  ;;  %v3545_v29 = vmax.f32 %v3170_v50, 0.0  ;;  %v3672_v32 = vmax.f32 %v3670_v8, %v3671_v34 }
 0x2b3   :  { %v6321_v57 = vmax.f32 %v3722_v18, %v3723_v62  ;;  %v2427_v44 = vadd.f32 %v2299_v27, %v1657_v13  ;;  %v7916_v18 = vld [vmem:[#allocation22_spill] sm:$0xff]  ;;  %v3176_v13 = vadd.f32 %v5943_v54, %v5866_v17  ;;  %v3546_v62 = vmax.f32 %v3173_v47, 0.0 }
 0x2b4   :  { %v843_v5 = vmul.f32 %v5988_v2, %v7916_v18  ;;  %v3179_v38 = vadd.f32 %v5943_v54, %v5881_v28  ;;  %v2256_v45 = vmul.f32 %v5959_v1, %v1832_v15  ;;  %v872_v17 = vmul.f32 %v5988_v2, %v5725_v26  ;;  %v4779_v26 = vld [vmem:[%s7793_s0 + $0x1e8] sm:$0xff] }
 0x2b5   :  { %v2559_v3 = vadd.f32 %v5982_v52, %v2427_v44  ;;  %v1614_v44 = vadd.f32 %v1486_v25, %v844_v0  ;;  %v3674_v40 = vmax.f32 %v3672_v32, %v3673_v56  ;;  %v3677_v50 = vsel %vm3669_vm1, %v3545_v29, -inf }
 0x2b6   :  { %4638 = vset.pattern.permute.xlu1 %v7839_v22  ;;  %4639 = vset.pattern.permute.xlu2 %v7840_v4  ;;  %v1613_v27 = vadd.f32 %v1485_v20, %v843_v5  ;;  %v3547_v20 = vmax.f32 %v3176_v13, 0.0  ;;  %v3679_v18 = vsel %vm3669_vm1, %v3546_v62, -inf  ;;  %v3548_v5 = vmax.f32 %v3179_v38, 0.0 }
 0x2b7   :  { %2023 = vperm.xlu1 %4638, %v6265_v30   ;;  %1077 = vperm.xlu2 %4639, %v6093_v39   ;;  %v2687_v42 = vmax.f32 %v2559_v3, 0.0  ;;  %v3676_v47 = vmax.f32 %v3674_v40, %v3675_v37  ;;  %v2384_v28 = vadd.f32 %v2256_v45, %v1614_v44  ;;  %v3706_v38 = vrot.slane %v6097_v36, 4 }
 0x2b8   :  { %v1828_v19 = vpop.permute.xlu1 %1827  ;;  %v3683_v15 = vsel %vm3669_vm1, %v3548_v5, -inf  ;;  %v888_v44 = vmul.f32 %v5988_v2, %v6253_v12 }
 0x2b9   :  { %v2255_v30 = vmul.f32 %v5959_v1, %v1828_v19  ;;  %4468 = vmatmul.msk.f32.gmra.mxu2 %vm2755_vm0, %v2687_v42  ;;  %v1174_v39 = vpop.permute.xlu2 %1173  ;;  %v3678_v25 = vmax.f32 %v3676_v47, %v3677_v50  ;;  %v3681_v42 = vsel %vm3669_vm1, %v3547_v20, -inf  ;;  %v2516_v19 = vadd.f32 %v5982_v52, %v2384_v28 }
 0x2ba   :  { %4452 = vmatmul.msk.f32.gmra.mxu1 %vm2755_vm0, %v2671_v9  ;;  %v1514_v23 = vmul.f32 %v5995_v14, %v1174_v39 }
 0x2bb   :  { %v2383_v31 = vadd.f32 %v2255_v30, %v1613_v27  ;;  %v3680_v8 = vmax.f32 %v3678_v25, %v3679_v18  ;;  %v2644_v39 = vmax.f32 %v2516_v19, 0.0  ;;  %v6406_v19 = vld [vmem:[%s7793_s0 + $0x298] sm:$0xff] }
 0x2bc   :  { %v1642_v55 = vadd.f32 %v1514_v23, %v872_v17  ;;  %2047 = vperm.xlu0 %4658, %v6406_v19  }
 0x2bd   :  { %v2515_v3 = vadd.f32 %v5982_v52, %v2383_v31  ;;  %v3682_v29 = vmax.f32 %v3680_v8, %v3681_v42 }
 0x2bf   :  { %v2643_v34 = vmax.f32 %v2515_v3, 0.0  ;;  %4640 = vset.pattern.permute.xlu1 %v7893_v48  ;;  %1189 = vperm.xlu2 %4639, %v4779_v26   ;;  %v3684_v27 = vmax.f32 %v3682_v29, %v3683_v15 }
 0x2c0   :  { %566 = vperm.xlu1 %4640, %v6258_v49  }
 0x2c1   :  { %4424 = vmatmul.msk.f32.gmra.mxu0 %vm2755_vm0, %v2643_v34  ;;  %v1238_v0 = vpop.permute.xlu1 %1237  ;;  %v3685_v50 = vrot.slane %v3684_v27, 4 }
 0x2c2   :  { %v1944_v56 = vpop.permute.xlu2 %1943  ;;  %v1530_v32 = vmul.f32 %v5995_v14, %v1238_v0 }
 0x2c3   :  { %v2284_v9 = vmul.f32 %v5959_v1, %v1944_v56  ;;  %v3686_v28 = vmax.f32 %v3684_v27, %v3685_v50 }
 0x2c4   :  { %v1658_v20 = vadd.f32 %v1530_v32, %v888_v44 }
 0x2c5   :  { %v2412_v13 = vadd.f32 %v2284_v9, %v1642_v55  ;;  %v3687_v42 = vrot.slane %v3686_v28, 2 }
 0x2c6   :  { %v3307_v30 = vpop.f32.mrf.mxu1 }
 0x2c7   :  { %v3308_v37 = vadd.f32 %v5943_v54, %v3307_v30  ;;  %4642 = vset.pattern.permute.xlu2 %v7839_v22  ;;  %v2544_v62 = vadd.f32 %v5982_v52, %v2412_v13  ;;  %v3688_v13 = vmax.f32 %v3686_v28, %v3687_v42 }
 0x2c8   :  { %4641 = vset.pattern.permute.xlu1 %v7840_v4  ;;  %1959 = vperm.xlu2 %4642, %v4779_v26  }
 0x2c9   :  { %v3591_v45 = vmax.f32 %v3308_v37, 0.0  ;;  %1257 = vperm.xlu1 %4641, %v6258_v49   ;;  %4425 = vmatmul.msk.f32.gmra.mxu0 %vm2755_vm0, %v2644_v39  ;;  %v2672_v31 = vmax.f32 %v2544_v62, 0.0  ;;  %v3707_v49 = vmax.f32 %v6097_v36, %v3706_v38  ;;  %v4782_v39 = vld [vmem:[%s7793_s0 + $0x278] sm:$0xff]  ;;  %v2012_v37 = vpop.permute.xlu0 %2011  ;;  %v3689_v62 = vrot.slane %v3688_v13, 1 }
 0x2ca   :  { %v2008_v17 = vpop.permute.xlu1 %2007  ;;  %v6378_v40 = vpop.permute.xlu2 %1835 }
 0x2cb   :  { %v3799_v3 = vsel %vm3669_vm1, %v3591_v45, -inf  ;;  %v2300_v23 = vmul.f32 %v5959_v1, %v2008_v17  ;;  %4453 = vmatmul.msk.f32.gmra.mxu1 %vm2755_vm0, %v2672_v31  ;;  %v4780_v1 = vld [vmem:[%s7793_s0 + $0x110] sm:$0xff]  ;;  %v3708_v33 = vrot.slane %v3707_v49, 2  ;;  %v6419_v45 = vld [vmem:[%s7793_s0 + $0x318] sm:$0xff] }
 0x2cc   :  { %v6386_v12 = vmax.f32 %v3798_v63, %v3799_v3  ;;  %v6426_v3 = vld [vmem:[%s7794_s1 + $0x2] ss:$0 sm:$0xff]  ;;  %2111 = vperm.xlu0 %4658, %v6419_v45  }
 0x2cd   :  { %v2428_v47 = vadd.f32 %v2300_v23, %v1658_v20  ;;  %v3709_v9 = vmax.f32 %v3707_v49, %v3708_v33  ;;  %v2301_v23 = vmul.f32 %v6426_v3, %v2012_v37  ;;  %v6473_v37 = vld [vmem:[%s7795_s2] ss:$0 sm:$0xff] }
 0x2ce   :  { %v3226_v18 = vpop.f32.mrf.mxu0  ;;  %v3310_v5 = vpop.f32.mrf.mxu1 }
 0x2cf   :  { %v3227_v34 = vadd.f32 %v5943_v54, %v3226_v18  ;;  %v3311_v26 = vadd.f32 %v5943_v54, %v3310_v5  ;;  %v2560_v25 = vadd.f32 %v5982_v52, %v2428_v47  ;;  %v3710_v30 = vrot.slane %v3709_v9, 1 }
 0x2d0   :  { %1851 = vperm.xlu2 %4642, %v4780_v1   ;;  %v3690_v47 = vmax.f32 %v3688_v13, %v3689_v62 }
 0x2d1   :  { %v3564_v35 = vmax.f32 %v3227_v34, 0.0  ;;  %v3592_v63 = vmax.f32 %v3311_v26, 0.0  ;;  %1081 = vperm.xlu1 %4641, %v4780_v1   ;;  %v2688_v36 = vmax.f32 %v2560_v25, 0.0  ;;  %v3711_v31 = vmax.f32 %v3709_v9, %v3710_v30  ;;  %v6459_v9 = vld [vmem:[%s7797_s4] ss:$0 sm:$0xff] }
 0x2d2   :  { %v890_v1 = vmul.f32 %v5988_v2, %v5833_v51 }
 0x2d3   :  { %v3725_v55 = vsel %vm3669_vm1, %v3564_v35, -inf  ;;  %v6397_v0 = vsel %vm3669_vm1, %v3592_v63, -inf  ;;  %4469 = vmatmul.msk.f32.gmra.mxu2 %vm2755_vm0, %v2688_v36  ;;  %v547_v54 = vpop.permute.xlu1 %546  ;;  %v1246_v8 = vpop.permute.xlu2 %1245  ;;  %v4031_v34 = vsel %vm4030_vm2, %v3711_v31, %v3690_v47 }
 0x2d4   :  { %v3726_v56 = vmax.f32 %v6321_v57, %v3725_v55  ;;  %v3802_v15 = vmax.f32 %v6386_v12, %v6397_v0  ;;  %v4781_v57 = vld [vmem:[%s7793_s0 + $0x1f0] sm:$0xff]  ;;  %v889_v17 = vmul.f32 %v5988_v2, %v547_v54  ;;  %v1532_v28 = vmul.f32 %v5995_v14, %v1246_v8  ;;  %v6444_v55 = vld [vmem:[%s7794_s1] ss:$0 sm:$0xff] }
 0x2d5   :  { %v845_v54 = vmul.f32 %v6444_v55, %v5600_v10  ;;  %v2257_v10 = vmul.f32 %v6426_v3, %v6378_v40  ;;  %v7918_v12 = vld [vmem:[#allocation50_spill] sm:$0xff] }
 0x2d6   :  { %v3727_v29 = vrot.slane %v3726_v56, 4  ;;  %v1660_v36 = vadd.f32 %v1532_v28, %v890_v1  ;;  %v873_v0 = vmul.f32 %v6444_v55, %v7918_v12  ;;  %v139_v1 = vld [vmem:[%s7793_s0 + $0x2f0] sm:$0xff] }
 0x2d8   :  { %v3728_v27 = vmax.f32 %v3726_v56, %v3727_v29  ;;  %4643 = vset.pattern.permute.xlu2 %v7840_v4  ;;  %v6454_v56 = vld [vmem:[%s7793_s0 + $0x2c8] sm:$0xff] }
 0x2d9   :  { %1193 = vperm.xlu1 %4641, %v4781_v57   ;;  %1261 = vperm.xlu2 %4643, %v4782_v39  }
 0x2da   :  { %v3729_v32 = vrot.slane %v3728_v27, 2  ;;  %2071 = vperm.xlu0 %4658, %v6454_v56  }
 0x2dc   :  { %v3730_v38 = vmax.f32 %v3728_v27, %v3729_v32  ;;  %v1242_v44 = vpop.permute.xlu1 %1241  ;;  %v2016_v20 = vpop.permute.xlu2 %2015 }
 0x2dd   :  { %v1531_v50 = vmul.f32 %v5995_v14, %v1242_v44  ;;  %v2302_v35 = vmul.f32 %v6426_v3, %v2016_v20  ;;  %v6484_v20 = vld [vmem:[%s7793_s0 + $0x340] sm:$0xff] }
 0x2de   :  { %v3731_v49 = vrot.slane %v3730_v38, 1 }
 0x2df   :  { %v1659_v18 = vadd.f32 %v1531_v50, %v889_v17 }
 0x2e0   :  { %v3732_v5 = vmax.f32 %v3730_v38, %v3731_v49  ;;  %v4787_v38 = vld [vmem:[%s7793_s0 + $0x280] sm:$0xff] }
 0x2e1   :  { %v2429_v26 = vadd.f32 %v2301_v23, %v1659_v18  ;;  %4644 = vset.pattern.permute.xlu1 %v7839_v22  ;;  %v3229_v25 = vpop.f32.mrf.mxu0  ;;  %4645 = vset.pattern.permute.xlu2 %v7839_v22 }
 0x2e2   :  { %v6437_v33 = vsel %vm4032_vm3, %v3732_v5, %v4031_v34  ;;  %1963 = vperm.xlu1 %4644, %v4781_v57   ;;  %2031 = vperm.xlu2 %4645, %v4782_v39   ;;  %v3230_v29 = vadd.f32 %v6459_v9, %v3229_v25  ;;  %v126_v34 = vld [vmem:[%s7793_s0 + $0x288] sm:$0xff] }
 0x2e3   :  { %v2561_v63 = vadd.f32 %v5982_v52, %v2429_v26  ;;  %v2430_v52 = vadd.f32 %v2302_v35, %v1660_v36  ;;  %2131 = vperm.xlu0 %4658, %v6484_v20   ;;  %v6509_v26 = vld [vmem:[%s7794_s1 + $0x1] ss:$0 sm:$0xff] }
 0x2e4   :  { %v1066_v42 = vpop.permute.xlu1 %1065  ;;  %v3565_v57 = vmax.f32 %v3230_v29, 0.0 }
 0x2e5   :  { %v1487_v51 = vmul.f32 %v5995_v14, %v1066_v42  ;;  %v6449_v2 = vpop.permute.xlu2 %556  ;;  %v2689_v8 = vmax.f32 %v2561_v63, 0.0  ;;  %v2562_v40 = vadd.f32 %v6473_v37, %v2430_v52  ;;  %v7920_v52 = vld [vmem:[#allocation24_spill] sm:$0xff] }
 0x2e6   :  { %v6487_v23 = vsel %vm3669_vm1, %v3565_v57, -inf  ;;  %v846_v29 = vmul.f32 %v6444_v55, %v7920_v52 }
 0x2e7   :  { %v1615_v14 = vadd.f32 %v1487_v51, %v845_v54  ;;  %4470 = vmatmul.msk.f32.gmra.mxu2 %vm2755_vm0, %v2689_v8  ;;  %v2690_v18 = vmax.f32 %v2562_v40, 0.0  ;;  %v7919_v54 = vld [vmem:[#allocation48_spill] sm:$0xff] }
 0x2e8   :  { %v1488_v51 = vmul.f32 %v6509_v26, %v7919_v54 }
 0x2e9   :  { %v2385_v13 = vadd.f32 %v2257_v10, %v1615_v14  ;;  %v3232_v27 = vpop.f32.mrf.mxu0  ;;  %v3313_v30 = vpop.f32.mrf.mxu1 }
 0x2ea   :  { %v3233_v39 = vadd.f32 %v6459_v9, %v3232_v27  ;;  %v3314_v32 = vadd.f32 %v6459_v9, %v3313_v30  ;;  %4646 = vset.pattern.permute.xlu1 %v7840_v4  ;;  %4647 = vset.pattern.permute.xlu2 %v7840_v4  ;;  %v6533_v30 = vld [vmem:[%s7793_s0 + $0x2a8] sm:$0xff] }
 0x2eb   :  { %v2517_v62 = vadd.f32 %v6473_v37, %v2385_v13  ;;  %1197 = vperm.xlu1 %4646, %v6280_v43   ;;  %1265 = vperm.xlu2 %4647, %v4787_v38   ;;  %v1616_v13 = vadd.f32 %v1488_v51, %v846_v29 }
 0x2ec   :  { %v3566_v44 = vmax.f32 %v3233_v39, 0.0  ;;  %v3593_v31 = vmax.f32 %v3314_v32, 0.0  ;;  %v1178_v17 = vpop.permute.xlu1 %1177  ;;  %2091 = vperm.xlu0 %4658, %v139_v1   ;;  %v7922_v1 = vld [vmem:[#allocation51_spill] sm:$0xff] }
 0x2ed   :  { %v2645_v50 = vmax.f32 %v2517_v62, 0.0  ;;  %v1515_v25 = vmul.f32 %v6509_v26, %v1178_v17  ;;  %v4789_v17 = vld [vmem:[%s7793_s0 + $0x290] sm:$0xff] }
 0x2ee   :  { %v6490_v49 = vsel %vm3669_vm1, %v3566_v44, -inf  ;;  %v3803_v43 = vsel %vm3669_vm1, %v3593_v31, -inf  ;;  %v1250_v47 = vpop.permute.xlu2 %1249  ;;  %v1952_v44 = vpop.permute.xlu0 %1951 }
 0x2ef   :  { %v3735_v5 = vmax.f32 %v6487_v23, %v6490_v49  ;;  %v6499_v28 = vmax.f32 %v3802_v15, %v3803_v43  ;;  %4426 = vmatmul.msk.f32.gmra.mxu0 %vm2755_vm0, %v2645_v50  ;;  %4471 = vmatmul.msk.f32.gmra.mxu2 %vm2755_vm0, %v2690_v18  ;;  %v1643_v35 = vadd.f32 %v1515_v25, %v873_v0  ;;  %v7921_v43 = vld [vmem:[#allocation40_spill] sm:$0xff] }
 0x2f0   :  { %v874_v18 = vmul.f32 %v6444_v55, %v7921_v43  ;;  %v2286_v12 = vmul.f32 %v6426_v3, %v1952_v44  ;;  %v1533_v52 = vmul.f32 %v6509_v26, %v1250_v47 }
 0x2f3   :  { %4648 = vset.pattern.permute.xlu1 %v7839_v22  ;;  %4649 = vset.pattern.permute.xlu2 %v7893_v48 }
 0x2f4   :  { %2035 = vperm.xlu1 %4648, %v4787_v38   ;;  %581 = vperm.xlu2 %4649, %v126_v34  }
 0x2f5   :  { %v1948_v15 = vpop.permute.xlu1 %1947  ;;  %4679 = vset.pattern.permute.xlu0 %v7840_v4 }
 0x2f6   :  { %v2285_v63 = vmul.f32 %v6426_v3, %v1948_v15  ;;  %v1074_v36 = vpop.permute.xlu2 %1073  ;;  %1285 = vperm.xlu0 %4679, %v6533_v30  }
 0x2f8   :  { %v2413_v42 = vadd.f32 %v2285_v63, %v1643_v35  ;;  %v1517_v35 = vmul.f32 %v6509_v26, %v7922_v1  ;;  %v875_v63 = vmul.f32 %v6444_v55, %v5739_v11 }
 0x2fa   :  { %v2545_v8 = vadd.f32 %v6473_v37, %v2413_v42  ;;  %v1645_v29 = vadd.f32 %v1517_v35, %v875_v63 }
 0x2fc   :  { %4650 = vset.pattern.permute.xlu1 %v7840_v4  ;;  %4651 = vset.pattern.permute.xlu2 %v7839_v22  ;;  %v2673_v10 = vmax.f32 %v2545_v8, 0.0  ;;  %v891_v8 = vmul.f32 %v6444_v55, %v6449_v2 }
 0x2fd   :  { %1269 = vperm.xlu1 %4650, %v126_v34   ;;  %v1840_v14 = vpop.permute.xlu1 %1839  ;;  %2039 = vperm.xlu2 %4651, %v126_v34  }
 0x2fe   :  { %v2258_v27 = vmul.f32 %v6426_v3, %v1840_v14  ;;  %4454 = vmatmul.msk.f32.gmra.mxu1 %vm2755_vm0, %v2673_v10 }
 0x2ff   :  { %v6535_v57 = vpop.permute.xlu2 %561 }
 0x300   :  { %v2386_v39 = vadd.f32 %v2258_v27, %v1616_v13  ;;  %v1661_v13 = vadd.f32 %v1533_v52, %v891_v8 }
 0x302   :  { %v2518_v32 = vadd.f32 %v6473_v37, %v2386_v39  ;;  %v3316_v40 = vpop.f32.mrf.mxu1 }
 0x303   :  { %v3317_v62 = vadd.f32 %v6459_v9, %v3316_v40  ;;  %v1489_v40 = vmul.f32 %v6509_v26, %v1074_v36 }
 0x304   :  { %v2646_v38 = vmax.f32 %v2518_v32, 0.0  ;;  %v129_v32 = vld [vmem:[%s7793_s0 + $0x2a0] sm:$0xff] }
 0x305   :  { %v3594_v31 = vmax.f32 %v3317_v62, 0.0  ;;  %1273 = vperm.xlu1 %4650, %v4789_v17   ;;  %2043 = vperm.xlu2 %4651, %v4789_v17   ;;  %v7923_v62 = vld [vmem:[#allocation18_spill] sm:$0xff] }
 0x306   :  { %4427 = vmatmul.msk.f32.gmra.mxu0 %vm2755_vm0, %v2646_v38  ;;  %v1182_v50 = vpop.permute.xlu1 %1181  ;;  %v847_v38 = vmul.f32 %v6444_v55, %v7923_v62 }
 0x307   :  { %v6547_v34 = vsel %vm3669_vm1, %v3594_v31, -inf  ;;  %v1516_v25 = vmul.f32 %v6509_v26, %v1182_v50  ;;  %v1848_v50 = vpop.permute.xlu0 %1847 }
 0x308   :  { %v3806_v0 = vmax.f32 %v6499_v28, %v6547_v34  ;;  %v1956_v15 = vpop.permute.xlu2 %1955  ;;  %v1617_v34 = vadd.f32 %v1489_v40, %v847_v38 }
 0x309   :  { %v1644_v42 = vadd.f32 %v1516_v25, %v874_v18  ;;  %v2287_v51 = vmul.f32 %v6426_v3, %v1956_v15  ;;  %v848_v18 = vmul.f32 %v6444_v55, %v5613_v24  ;;  %v2260_v15 = vmul.f32 %v6426_v3, %v1848_v50  ;;  %v6610_v50 = vld [vmem:[%s7793_s0 + $0x320] sm:$0xff] }
 0x30a   :  { %1345 = vperm.xlu0 %4679, %v6610_v50  }
 0x30b   :  { %v2414_v54 = vadd.f32 %v2286_v12, %v1644_v42  ;;  %v2415_v28 = vadd.f32 %v2287_v51, %v1645_v29  ;;  %v7924_v29 = vld [vmem:[#allocation52_spill] sm:$0xff] }
 0x30d   :  { %v2546_v10 = vadd.f32 %v6473_v37, %v2414_v54  ;;  %4652 = vset.pattern.permute.xlu1 %v7893_v48  ;;  %4653 = vset.pattern.permute.xlu2 %v7840_v4  ;;  %v2547_v39 = vadd.f32 %v6473_v37, %v2415_v28 }
 0x30e   :  { %591 = vperm.xlu1 %4652, %v6406_v19   ;;  %1277 = vperm.xlu2 %4653, %v6406_v19  }
 0x30f   :  { %v2674_v11 = vmax.f32 %v2546_v10, 0.0  ;;  %v2020_v14 = vpop.permute.xlu1 %2019  ;;  %v2675_v17 = vmax.f32 %v2547_v39, 0.0  ;;  %v876_v10 = vmul.f32 %v6444_v55, %v7924_v29 }
 0x310   :  { %v2303_v27 = vmul.f32 %v6426_v3, %v2020_v14 }
 0x311   :  { %4455 = vmatmul.msk.f32.gmra.mxu1 %vm2755_vm0, %v2674_v11  ;;  %v1078_v2 = vpop.permute.xlu2 %1077 }
 0x312   :  { %v2431_v47 = vadd.f32 %v2303_v27, %v1661_v13  ;;  %v1490_v44 = vmul.f32 %v6509_v26, %v1078_v2 }
 0x314   :  { %v2563_v19 = vadd.f32 %v6473_v37, %v2431_v47  ;;  %v1618_v12 = vadd.f32 %v1490_v44, %v848_v18  ;;  %v143_v47 = vld [vmem:[%s7793_s0 + $0x310] sm:$0xff] }
 0x315   :  { %v6620_v18 = vld [vmem:[%s7793_s0 + $0x2d0] sm:$0xff] }
 0x316   :  { %596 = vperm.xlu1 %4652, %v129_v32   ;;  %1281 = vperm.xlu2 %4653, %v129_v32   ;;  %v2691_v31 = vmax.f32 %v2563_v19, 0.0  ;;  %v2388_v54 = vadd.f32 %v2260_v15, %v1618_v12  ;;  %v2028_v12 = vpop.permute.xlu0 %2027  ;;  %v6630_v15 = vld [vmem:[%s7793_s0 + $0x348] sm:$0xff] }
 0x317   :  { %v1844_v43 = vpop.permute.xlu1 %1843  ;;  %1305 = vperm.xlu0 %4679, %v6620_v18  }
 0x318   :  { %v2259_v25 = vmul.f32 %v6426_v3, %v1844_v43  ;;  %4472 = vmatmul.msk.f32.gmra.mxu2 %vm2755_vm0, %v2691_v31  ;;  %v2520_v28 = vadd.f32 %v6473_v37, %v2388_v54 }
 0x319   :  { %4456 = vmatmul.msk.f32.gmra.mxu1 %vm2755_vm0, %v2675_v17  ;;  %v1190_v36 = vpop.permute.xlu2 %1189 }
 0x31a   :  { %v2387_v1 = vadd.f32 %v2259_v25, %v1617_v34  ;;  %v1518_v24 = vmul.f32 %v6509_v26, %v1190_v36  ;;  %v4790_v36 = vld [vmem:[%s7793_s0 + $0x2b0] sm:$0xff] }
 0x31c   :  { %v2519_v35 = vadd.f32 %v6473_v37, %v2387_v1  ;;  %v3319_v63 = vpop.f32.mrf.mxu1  ;;  %v1646_v27 = vadd.f32 %v1518_v24, %v876_v10 }
 0x31d   :  { %v3320_v42 = vadd.f32 %v6459_v9, %v3319_v63 }
 0x31e   :  { %v2647_v51 = vmax.f32 %v2519_v35, 0.0  ;;  %4654 = vset.pattern.permute.xlu1 %v7839_v22  ;;  %4655 = vset.pattern.permute.xlu2 %v7893_v48 }
 0x31f   :  { %v3595_v8 = vmax.f32 %v3320_v42, 0.0  ;;  %2051 = vperm.xlu1 %4654, %v129_v32   ;;  %601 = vperm.xlu2 %4655, %v6533_v30   ;;  %v2648_v32 = vmax.f32 %v2520_v28, 0.0  ;;  %v2305_v42 = vmul.f32 %v6426_v3, %v2028_v12  ;;  %v6648_v28 = vld [vmem:[%s7793_s0 + $0x2f8] sm:$0xff] }
 0x320   :  { %4428 = vmatmul.msk.f32.gmra.mxu0 %vm2755_vm0, %v2647_v51  ;;  %v1254_v52 = vpop.permute.xlu1 %1253  ;;  %1365 = vperm.xlu0 %4679, %v6630_v15  }
 0x321   :  { %v3807_v11 = vsel %vm3669_vm1, %v3595_v8, -inf  ;;  %v1534_v40 = vmul.f32 %v6509_v26, %v1254_v52  ;;  %v894_v8 = vmul.f32 %v6444_v55, %v5846_v16 }
 0x322   :  { %v6594_v14 = vmax.f32 %v3806_v0, %v3807_v11  ;;  %v1960_v13 = vpop.permute.xlu2 %1959  ;;  %v892_v0 = vmul.f32 %v6444_v55, %v6535_v57 }
 0x323   :  { %v2288_v2 = vmul.f32 %v6426_v3, %v1960_v13  ;;  %v7925_v13 = vld [vmem:[#allocation27_spill] sm:$0xff] }
 0x324   :  { %v1662_v44 = vadd.f32 %v1534_v40, %v892_v0 }
 0x325   :  { %v2416_v39 = vadd.f32 %v2288_v2, %v1646_v27  ;;  %v849_v27 = vmul.f32 %v6444_v55, %v7925_v13 }
 0x327   :  { %v2548_v19 = vadd.f32 %v6473_v37, %v2416_v39  ;;  %2055 = vperm.xlu1 %4654, %v6533_v30   ;;  %666 = vperm.xlu2 %4655, %v143_v47  }
 0x328   :  { %4429 = vmatmul.msk.f32.gmra.mxu0 %vm2755_vm0, %v2648_v32  ;;  %1325 = vperm.xlu0 %4679, %v6648_v28  }
 0x329   :  { %v2676_v62 = vmax.f32 %v2548_v19, 0.0  ;;  %v2024_v38 = vpop.permute.xlu1 %2023  ;;  %v132_v19 = vld [vmem:[%s7793_s0 + $0x2b8] sm:$0xff] }
 0x32a   :  { %v2304_v31 = vmul.f32 %v6426_v3, %v2024_v38  ;;  %v1852_v17 = vpop.permute.xlu2 %1851 }
 0x32b   :  { %4457 = vmatmul.msk.f32.gmra.mxu1 %vm2755_vm0, %v2676_v62 }
 0x32c   :  { %v2432_v30 = vadd.f32 %v2304_v31, %v1662_v44  ;;  %v146_v31 = vld [vmem:[%s7793_s0 + $0x328] sm:$0xff] }
 0x32e   :  { %v2564_v57 = vadd.f32 %v6473_v37, %v2432_v30 }
 0x32f   :  { %4656 = vset.pattern.permute.xlu1 %v7840_v4  ;;  %4657 = vset.pattern.permute.xlu2 %v7839_v22 }
 0x330   :  { %1337 = vperm.xlu1 %4656, %v143_v47   ;;  %2107 = vperm.xlu2 %4657, %v143_v47   ;;  %v2692_v43 = vmax.f32 %v2564_v57, 0.0 }
 0x331   :  { %4682 = vset.pattern.permute.xlu0 %v7893_v48 }
 0x332   :  { %4473 = vmatmul.msk.f32.gmra.mxu2 %vm2755_vm0, %v2692_v43  ;;  %v567_v34 = vpop.permute.xlu1 %566  ;;  %681 = vperm.xlu0 %4682, %v146_v31  }
 0x333   :  { %v1262_v25 = vpop.permute.xlu2 %1261  ;;  %v893_v35 = vmul.f32 %v6444_v55, %v567_v34  ;;  %v7926_v34 = vld [vmem:[#allocation43_spill] sm:$0xff] }
 0x334   :  { %v1536_v51 = vmul.f32 %v6509_v26, %v1262_v25  ;;  %v877_v25 = vmul.f32 %v6444_v55, %v7926_v34 }
 0x336   :  { %v1664_v10 = vadd.f32 %v1536_v51, %v894_v8 }
 0x338   :  { %1289 = vperm.xlu1 %4656, %v4790_v36   ;;  %2059 = vperm.xlu2 %4657, %v4790_v36  }
 0x33b   :  { %v1258_v1 = vpop.permute.xlu1 %1257 }
 0x33c   :  { %v1535_v63 = vmul.f32 %v6509_v26, %v1258_v1  ;;  %v2032_v54 = vpop.permute.xlu2 %2031 }
 0x33d   :  { %v2306_v29 = vmul.f32 %v6426_v3, %v2032_v54  ;;  %v1968_v54 = vpop.permute.xlu0 %1967 }
 0x33e   :  { %v1663_v24 = vadd.f32 %v1535_v63, %v893_v35  ;;  %v3235_v35 = vpop.f32.mrf.mxu0 }
 0x33f   :  { %v2434_v2 = vadd.f32 %v2306_v29, %v1664_v10  ;;  %v878_v29 = vmul.f32 %v6444_v55, %v5765_v21 }
 0x340   :  { %v2433_v52 = vadd.f32 %v2305_v42, %v1663_v24  ;;  %4659 = vset.pattern.permute.xlu1 %v7893_v48  ;;  %4660 = vset.pattern.permute.xlu2 %v7840_v4  ;;  %v133_v42 = vld [vmem:[%s7793_s0 + $0x2c0] sm:$0xff] }
 0x341   :  { %671 = vperm.xlu1 %4659, %v6419_v45   ;;  %1341 = vperm.xlu2 %4660, %v6419_v45   ;;  %v2261_v45 = vmul.f32 %v6426_v3, %v1852_v17  ;;  %v2566_v62 = vadd.f32 %v6473_v37, %v2434_v2 }
 0x342   :  { %v2565_v11 = vadd.f32 %v6473_v37, %v2433_v52 }
 0x343   :  { %v1082_v16 = vpop.permute.xlu1 %1081  ;;  %v2694_v30 = vmax.f32 %v2566_v62, 0.0 }
 0x344   :  { %v1491_v47 = vmul.f32 %v6509_v26, %v1082_v16  ;;  %v2693_v39 = vmax.f32 %v2565_v11, 0.0  ;;  %v2290_v11 = vmul.f32 %v6426_v3, %v1968_v54 }
 0x345   :  { %v1266_v40 = vpop.permute.xlu2 %1265  ;;  %v6684_v2 = vpop.permute.xlu0 %2047 }
 0x346   :  { %v1619_v32 = vadd.f32 %v1491_v47, %v849_v27  ;;  %4474 = vmatmul.msk.f32.gmra.mxu2 %vm2755_vm0, %v2693_v39  ;;  %v3238_v16 = vpop.f32.mrf.mxu0  ;;  %v895_v39 = vmul.f32 %v6444_v55, %v5861_v60 }
 0x348   :  { %v2389_v0 = vadd.f32 %v2261_v45, %v1619_v32  ;;  %v6692_v45 = vpop.f32.mrf.mxu2 }
 0x349   :  { %611 = vperm.xlu1 %4659, %v132_v19   ;;  %1293 = vperm.xlu2 %4660, %v132_v19  }
 0x34a   :  { %v2521_v38 = vadd.f32 %v6473_v37, %v2389_v0 }
 0x34b   :  { %v1194_v44 = vpop.permute.xlu1 %1193 }
 0x34c   :  { %v2649_v17 = vmax.f32 %v2521_v38, 0.0  ;;  %v1519_v43 = vmul.f32 %v6509_v26, %v1194_v44 }
 0x34e   :  { %4430 = vmatmul.msk.f32.gmra.mxu0 %vm2755_vm0, %v2649_v17  ;;  %4475 = vmatmul.msk.f32.gmra.mxu2 %vm2755_vm0, %v2694_v30  ;;  %v582_v57 = vpop.permute.xlu2 %581  ;;  %v1647_v12 = vadd.f32 %v1519_v43, %v877_v25  ;;  %v3241_v0 = vpop.f32.mrf.mxu0 }
 0x34f   :  { %v6697_v30 = vpop.permute.xlu0 %2111  ;;  %v896_v25 = vmul.f32 %v6444_v55, %v582_v57 }
 0x350   :  { %v6699_v60 = vpop.f32.mrf.mxu2 }
 0x351   :  { %4661 = vset.pattern.permute.xlu1 %v7839_v22  ;;  %4662 = vset.pattern.permute.xlu2 %v7893_v48 }
 0x352   :  { %2063 = vperm.xlu1 %4661, %v132_v19   ;;  %676 = vperm.xlu2 %4662, %v6610_v50  }
 0x354   :  { %v1964_v36 = vpop.permute.xlu1 %1963 }
 0x355   :  { %v2289_v1 = vmul.f32 %v6426_v3, %v1964_v36 }
 0x357   :  { %v2417_v63 = vadd.f32 %v2289_v1, %v1647_v12  ;;  %v2040_v51 = vpop.permute.xlu2 %2039  ;;  %v3244_v1 = vpop.f32.mrf.mxu0 }
 0x358   :  { %v6712_v57 = vpop.permute.xlu0 %2071 }
 0x359   :  { %v2549_v24 = vadd.f32 %v6473_v37, %v2417_v63  ;;  %v2308_v63 = vmul.f32 %v6426_v3, %v2040_v51  ;;  %v897_v51 = vmul.f32 %v6444_v55, %v5874_v46 }
 0x35a   :  { %2115 = vperm.xlu1 %4661, %v6610_v50   ;;  %616 = vperm.xlu2 %4662, %v133_v42   ;;  %v1537_v50 = vmul.f32 %v6509_v26, %v1266_v40 }
 0x35b   :  { %v2677_v8 = vmax.f32 %v2549_v24, 0.0  ;;  %v3239_v24 = vadd.f32 %v6459_v9, %v3238_v16 }
 0x35c   :  { %v1665_v62 = vadd.f32 %v1537_v50, %v895_v39 }
 0x35d   :  { %4458 = vmatmul.msk.f32.gmra.mxu1 %vm2755_vm0, %v2677_v8  ;;  %v1198_v52 = vpop.permute.xlu1 %1197  ;;  %v3568_v50 = vmax.f32 %v3239_v24, 0.0  ;;  %v2310_v24 = vmul.f32 %v6426_v3, %v6684_v2 }
 0x35e   :  { %v1520_v10 = vmul.f32 %v6509_v26, %v1198_v52  ;;  %v6718_v52 = vpop.f32.mrf.mxu2 }
 0x35f   :  { %v2044_v13 = vpop.permute.xlu2 %2043 }
 0x360   :  { %v1648_v27 = vadd.f32 %v1520_v10, %v878_v29  ;;  %v2309_v46 = vmul.f32 %v6426_v3, %v2044_v13  ;;  %v6737_v13 = vld [vmem:[%s7793_s0 + $0x2d8] sm:$0xff] }
 0x361   :  { %631 = vperm.xlu0 %4682, %v6737_v13  }
 0x362   :  { %v2418_v47 = vadd.f32 %v2290_v11, %v1648_v27  ;;  %4663 = vset.pattern.permute.xlu1 %v7840_v4  ;;  %4664 = vset.pattern.permute.xlu2 %v7839_v22 }
 0x363   :  { %1297 = vperm.xlu1 %4663, %v133_v42   ;;  %2067 = vperm.xlu2 %4664, %v133_v42   ;;  %v3236_v42 = vadd.f32 %v6459_v9, %v3235_v35  ;;  %v3242_v35 = vadd.f32 %v6459_v9, %v3241_v0 }
 0x364   :  { %v2550_v21 = vadd.f32 %v6473_v37, %v2418_v47 }
 0x365   :  { %v3567_v10 = vmax.f32 %v3236_v42, 0.0 }
 0x366   :  { %v2678_v32 = vmax.f32 %v2550_v21, 0.0  ;;  %v2036_v19 = vpop.permute.xlu1 %2035  ;;  %v3245_v21 = vadd.f32 %v6459_v9, %v3244_v1 }
 0x367   :  { %v2307_v38 = vmul.f32 %v6426_v3, %v2036_v19  ;;  %v3569_v19 = vmax.f32 %v3242_v35, 0.0 }
 0x368   :  { %4459 = vmatmul.msk.f32.gmra.mxu1 %vm2755_vm0, %v2678_v32  ;;  %v1278_v44 = vpop.permute.xlu2 %1277  ;;  %v3736_v32 = vsel %vm3669_vm1, %v3567_v10, -inf }
 0x369   :  { %v2435_v17 = vadd.f32 %v2307_v38, %v1665_v62  ;;  %v3738_v38 = vsel %vm3669_vm1, %v3568_v50, -inf  ;;  %v3740_v1 = vsel %vm3669_vm1, %v3569_v19, -inf }
 0x36b   :  { %1349 = vperm.xlu1 %4663, %v146_v31   ;;  %2119 = vperm.xlu2 %4664, %v146_v31   ;;  %v2567_v40 = vadd.f32 %v6473_v37, %v2435_v17  ;;  %v3570_v17 = vmax.f32 %v3245_v21, 0.0 }
 0x36c   :  { %v3247_v47 = vpop.f32.mrf.mxu0 }
 0x36d   :  { %v2695_v43 = vmax.f32 %v2567_v40, 0.0  ;;  %v3248_v0 = vadd.f32 %v6459_v9, %v3247_v47  ;;  %v3742_v23 = vsel %vm3669_vm1, %v3570_v17, -inf }
 0x36f   :  { %4476 = vmatmul.msk.f32.gmra.mxu2 %vm2755_vm0, %v2695_v43  ;;  %v1270_v34 = vpop.permute.xlu1 %1269  ;;  %v6739_v43 = vpop.f32.mrf.mxu2 }
 0x370   :  { %v1538_v36 = vmul.f32 %v6509_v26, %v1270_v34  ;;  %v6704_v12 = vpop.permute.xlu2 %1281  ;;  %v3737_v34 = vmax.f32 %v3735_v5, %v3736_v32 }
 0x372   :  { %v1666_v31 = vadd.f32 %v1538_v36, %v896_v25  ;;  %v1540_v25 = vmul.f32 %v6509_v26, %v1278_v44  ;;  %v6745_v36 = vpop.permute.xlu0 %2131 }
 0x373   :  { %4665 = vset.pattern.permute.xlu1 %v7893_v48  ;;  %4666 = vset.pattern.permute.xlu2 %v7840_v4 }
 0x374   :  { %v2436_v54 = vadd.f32 %v2308_v63, %v1666_v31  ;;  %621 = vperm.xlu1 %4665, %v6454_v56   ;;  %1301 = vperm.xlu2 %4666, %v6454_v56   ;;  %v147_v56 = vld [vmem:[%s7793_s0 + $0x330] sm:$0xff]  ;;  %v3571_v63 = vmax.f32 %v3248_v0, 0.0  ;;  %v148_v0 = vld [vmem:[%s7793_s0 + $0x338] sm:$0xff] }
 0x376   :  { %v2568_v8 = vadd.f32 %v6473_v37, %v2436_v54  ;;  %v3739_v54 = vmax.f32 %v3737_v34, %v3738_v38 }
 0x377   :  { %v1274_v29 = vpop.permute.xlu1 %1273 }
 0x378   :  { %v1539_v11 = vmul.f32 %v6509_v26, %v1274_v29  ;;  %v2696_v27 = vmax.f32 %v2568_v8, 0.0  ;;  %v3741_v49 = vmax.f32 %v3739_v54, %v3740_v1  ;;  %v3744_v29 = vsel %vm3669_vm1, %v3571_v63, -inf }
 0x379   :  { %v6725_v16 = vpop.permute.xlu2 %601 }
 0x37a   :  { %v1667_v39 = vadd.f32 %v1539_v11, %v897_v51  ;;  %4477 = vmatmul.msk.f32.gmra.mxu2 %vm2755_vm0, %v2696_v27  ;;  %v3743_v2 = vmax.f32 %v3741_v49, %v3742_v23  ;;  %v6761_v27 = vpop.f32.mrf.mxu2  ;;  %v6765_v32 = vpop.permute.xlu0 %2091  ;;  %v900_v49 = vmul.f32 %v6444_v55, %v6725_v16 }
 0x37c   :  { %v2437_v62 = vadd.f32 %v2309_v46, %v1667_v39  ;;  %686 = vperm.xlu1 %4665, %v147_v56   ;;  %1353 = vperm.xlu2 %4666, %v147_v56   ;;  %v3745_v47 = vmax.f32 %v3743_v2, %v3744_v29 }
 0x37e   :  { %v2569_v40 = vadd.f32 %v6473_v37, %v2437_v62 }
 0x380   :  { %v592_v31 = vpop.permute.xlu1 %591  ;;  %v2697_v42 = vmax.f32 %v2569_v40, 0.0 }
 0x381   :  { %v898_v8 = vmul.f32 %v6444_v55, %v592_v31  ;;  %v6752_v51 = vpop.permute.xlu2 %666 }
 0x382   :  { %4478 = vmatmul.msk.f32.gmra.mxu2 %vm2755_vm0, %v2697_v42  ;;  %v6773_v40 = vpop.f32.mrf.mxu2 }
 0x383   :  { %v1668_v5 = vadd.f32 %v1540_v25, %v898_v8  ;;  %v3250_v44 = vpop.f32.mrf.mxu0  ;;  %v1541_v25 = vmul.f32 %v6509_v26, %v6704_v12  ;;  %v1286_v8 = vpop.permute.xlu0 %1285 }
 0x384   :  { %v3251_v10 = vadd.f32 %v6459_v9, %v3250_v44  ;;  %4667 = vset.pattern.permute.xlu1 %v7839_v22  ;;  %4668 = vset.pattern.permute.xlu2 %v7893_v48  ;;  %v1542_v12 = vmul.f32 %v6509_v26, %v1286_v8 }
 0x385   :  { %v2438_v35 = vadd.f32 %v2310_v24, %v1668_v5  ;;  %2123 = vperm.xlu1 %4667, %v147_v56   ;;  %626 = vperm.xlu2 %4668, %v6620_v18  }
 0x386   :  { %v3572_v11 = vmax.f32 %v3251_v10, 0.0 }
 0x387   :  { %v2570_v50 = vadd.f32 %v6473_v37, %v2438_v35  ;;  %v1670_v35 = vadd.f32 %v1542_v12, %v900_v49 }
 0x388   :  { %v3746_v21 = vsel %vm3669_vm1, %v3572_v11, -inf  ;;  %v597_v46 = vpop.permute.xlu1 %596 }
 0x389   :  { %v3747_v39 = vmax.f32 %v3745_v47, %v3746_v21  ;;  %v2698_v19 = vmax.f32 %v2570_v50, 0.0  ;;  %v899_v17 = vmul.f32 %v6444_v55, %v597_v46 }
 0x38a   :  { %v2108_v56 = vpop.permute.xlu2 %2107  ;;  %v6784_v44 = vpop.f32.mrf.mxu2 }
 0x38b   :  { %v3748_v62 = vrot.slane %v3747_v39, 4  ;;  %4479 = vmatmul.msk.f32.gmra.mxu2 %vm2755_vm0, %v2698_v19  ;;  %v1669_v31 = vadd.f32 %v1541_v25, %v899_v17 }
 0x38d   :  { %v3749_v38 = vmax.f32 %v3747_v39, %v3748_v62  ;;  %2075 = vperm.xlu1 %4667, %v6620_v18   ;;  %691 = vperm.xlu2 %4668, %v148_v0   ;;  %v913_v39 = vmul.f32 %v6444_v55, %v6752_v51  ;;  %v2325_v62 = vmul.f32 %v6426_v3, %v2108_v56 }
 0x38e   :  { %v901_v51 = vmul.f32 %v6444_v55, %v5888_v53 }
 0x38f   :  { %v3750_v34 = vrot.slane %v3749_v38, 2 }
 0x391   :  { %v3751_v1 = vmax.f32 %v3749_v38, %v3750_v34  ;;  %v2052_v63 = vpop.permute.xlu1 %2051 }
 0x392   :  { %v2311_v42 = vmul.f32 %v6426_v3, %v2052_v63  ;;  %v2060_v54 = vpop.permute.xlu2 %2059  ;;  %v3376_v21 = vpop.f32.mrf.mxu2  ;;  %v137_v63 = vld [vmem:[%s7793_s0 + $0x2e0] sm:$0xff] }
 0x393   :  { %v3752_v24 = vrot.slane %v3751_v1, 1 }
 0x394   :  { %v2439_v23 = vadd.f32 %v2311_v42, %v1669_v31  ;;  %v2313_v42 = vmul.f32 %v6426_v3, %v2060_v54 }
 0x395   :  { %v3753_v18 = vmax.f32 %v3751_v1, %v3752_v24  ;;  %4669 = vset.pattern.permute.xlu1 %v7840_v4  ;;  %4670 = vset.pattern.permute.xlu2 %v7839_v22 }
 0x396   :  { %1357 = vperm.xlu1 %4669, %v148_v0   ;;  %2127 = vperm.xlu2 %4670, %v148_v0   ;;  %v2571_v5 = vadd.f32 %v6473_v37, %v2439_v23  ;;  %v6816_v23 = vpop.permute.xlu0 %1345 }
 0x397   :  { %v6788_v29 = vsel %vm4034_vm4, %v3753_v18, %v6437_v33  ;;  %v6821_v18 = vld [vmem:[%s7793_s0 + $0x350] sm:$0xff] }
 0x398   :  { %v2699_v10 = vmax.f32 %v2571_v5, 0.0  ;;  %706 = vperm.xlu0 %4682, %v6821_v18   ;;  %v2326_v5 = vmul.f32 %v6426_v3, %v6697_v30 }
 0x399   :  { %v2056_v2 = vpop.permute.xlu1 %2055 }
 0x39a   :  { %v2312_v11 = vmul.f32 %v6426_v3, %v2056_v2  ;;  %4480 = vmatmul.msk.f32.gmra.mxu2 %vm2755_vm0, %v2699_v10 }
 0x39b   :  { %v1342_v16 = vpop.permute.xlu2 %1341 }
 0x39c   :  { %v2440_v47 = vadd.f32 %v2312_v11, %v1670_v35  ;;  %v1556_v49 = vmul.f32 %v6509_v26, %v1342_v16 }
 0x39d   :  { %v3253_v11 = vpop.f32.mrf.mxu0 }
 0x39e   :  { %1309 = vperm.xlu1 %4669, %v6737_v13   ;;  %2079 = vperm.xlu2 %4670, %v6737_v13   ;;  %v2572_v50 = vadd.f32 %v6473_v37, %v2440_v47  ;;  %v3379_v13 = vpop.f32.mrf.mxu2 }
 0x3a0   :  { %v2700_v46 = vmax.f32 %v2572_v50, 0.0 }
 0x3a2   :  { %4481 = vmatmul.msk.f32.gmra.mxu2 %vm2755_vm0, %v2700_v46  ;;  %v1338_v33 = vpop.permute.xlu1 %1337  ;;  %v6835_v46 = vpop.permute.xlu0 %1305 }
 0x3a3   :  { %v1555_v19 = vmul.f32 %v6509_v26, %v1338_v33  ;;  %v1294_v0 = vpop.permute.xlu2 %1293 }
 0x3a5   :  { %v1683_v38 = vadd.f32 %v1555_v19, %v913_v39  ;;  %v138_v39 = vld [vmem:[%s7793_s0 + $0x2e8] sm:$0xff] }
 0x3a6   :  { %4671 = vset.pattern.permute.xlu1 %v7893_v48  ;;  %4672 = vset.pattern.permute.xlu2 %v7840_v4  ;;  %v3382_v8 = vpop.f32.mrf.mxu2 }
 0x3a7   :  { %v2453_v17 = vadd.f32 %v2325_v62, %v1683_v38  ;;  %696 = vperm.xlu1 %4671, %v6484_v20   ;;  %1361 = vperm.xlu2 %4672, %v6484_v20   ;;  %v3322_v62 = vpop.f32.mrf.mxu1  ;;  %v3377_v38 = vadd.f32 %v6459_v9, %v3376_v21  ;;  %v1544_v21 = vmul.f32 %v6509_v26, %v1294_v0 }
 0x3a9   :  { %v2585_v34 = vadd.f32 %v6473_v37, %v2453_v17  ;;  %v3374_v17 = vadd.f32 %v6459_v9, %v6784_v44  ;;  %v4009_v44 = vld [vmem:[%s7798_s5 + $0x18] sm:$0xff] }
 0x3aa   :  { %v1290_v25 = vpop.permute.xlu1 %1289  ;;  %4067 = vmatpush.msrb.mxu1 %v4009_v44 }
 0x3ab   :  { %v1543_v1 = vmul.f32 %v6509_v26, %v1290_v25  ;;  %v2713_v56 = vmax.f32 %v2585_v34, 0.0  ;;  %v3256_v34 = vpop.f32.mrf.mxu0 }
 0x3ac   :  { %v6811_v31 = vpop.permute.xlu2 %676 }
 0x3ad   :  { %v1671_v24 = vadd.f32 %v1543_v1, %v901_v51  ;;  %4494 = vmatmul.msk.f32.vlgmr.msra.gmra.mxu3 %vm2755_vm0, %v2713_v56  ;;  %v3380_v1 = vadd.f32 %v6459_v9, %v3379_v13  ;;  %v6851_v56 = vadd.f32 %v6459_v9, %v5998_v41  ;;  %v3383_v13 = vadd.f32 %v6459_v9, %v3382_v8 }
 0x3ae   :  { %v3385_v47 = vpop.f32.mrf.mxu2  ;;  %v3254_v8 = vadd.f32 %v6459_v9, %v3253_v11  ;;  %v1557_v11 = vmul.f32 %v6509_v26, %v6816_v23 }
 0x3af   :  { %v2441_v20 = vadd.f32 %v2313_v42, %v1671_v24  ;;  %636 = vperm.xlu1 %4671, %v137_v63   ;;  %1313 = vperm.xlu2 %4672, %v137_v63   ;;  %v3614_v42 = vmax.f32 %v3377_v38, 0.0  ;;  %v3257_v24 = vadd.f32 %v6459_v9, %v3256_v34 }
 0x3b1   :  { %v2573_v53 = vadd.f32 %v6473_v37, %v2441_v20  ;;  %v3613_v20 = vmax.f32 %v3374_v17, 0.0 }
 0x3b3   :  { %v672_v54 = vpop.permute.xlu1 %671  ;;  %v2701_v12 = vmax.f32 %v2573_v53, 0.0 }
 0x3b4   :  { %v914_v10 = vmul.f32 %v6444_v55, %v672_v54  ;;  %v6828_v2 = vpop.permute.xlu2 %616 }
 0x3b5   :  { %4482 = vmatmul.msk.f32.gmra.mxu2 %vm2755_vm0, %v2701_v12  ;;  %v3615_v12 = vmax.f32 %v3380_v1, 0.0 }
 0x3b6   :  { %v1684_v35 = vadd.f32 %v1556_v49, %v914_v10  ;;  %v3388_v25 = vpop.f32.mrf.mxu2  ;;  %v6867_v49 = vpop.permute.xlu0 %1365  ;;  %v3576_v10 = vmax.f32 %v6851_v56, 0.0  ;;  %v3266_v56 = vadd.f32 %v6459_v9, %v6017_v59  ;;  %v6898_v59 = vld [vmem:[%s7794_s1 + $0x2] ss:$0 sm:$0xff] }
 0x3b7   :  { %4673 = vset.pattern.permute.xlu1 %v7839_v22  ;;  %4674 = vset.pattern.permute.xlu2 %v7893_v48  ;;  %v3862_v34 = vsel %vm3669_vm1, %v3615_v12, -inf }
 0x3b8   :  { %v2454_v16 = vadd.f32 %v2326_v5, %v1684_v35  ;;  %2083 = vperm.xlu1 %4673, %v137_v63   ;;  %701 = vperm.xlu2 %4674, %v6630_v15   ;;  %v3323_v63 = vadd.f32 %v6459_v9, %v3322_v62  ;;  %v3386_v5 = vadd.f32 %v6459_v9, %v3385_v47  ;;  %v3859_v62 = vsel %vm3669_vm1, %v3613_v20, -inf }
 0x3b9   :  { %v915_v47 = vmul.f32 %v6444_v55, %v6811_v31 }
 0x3ba   :  { %v2586_v50 = vadd.f32 %v6473_v37, %v2454_v16  ;;  %v3596_v35 = vmax.f32 %v3323_v63, 0.0 }
 0x3bb   :  { %v612_v30 = vpop.permute.xlu1 %611 }
 0x3bc   :  { %v2714_v33 = vmax.f32 %v2586_v50, 0.0  ;;  %v902_v51 = vmul.f32 %v6444_v55, %v612_v30  ;;  %v3860_v50 = vsel %vm3669_vm1, %v3614_v42, -inf  ;;  %v3616_v30 = vmax.f32 %v3383_v13, 0.0 }
 0x3bd   :  { %v6840_v19 = vpop.permute.xlu2 %2067  ;;  %v3269_v55 = vadd.f32 %v6459_v9, %v6027_v7  ;;  %v3861_v31 = vmax.f32 %v3859_v62, %v3860_v50  ;;  %v3809_v13 = vsel %vm3669_vm1, %v3596_v35, -inf }
 0x3be   :  { %4495 = vmatmul.msk.f32.gmra.mxu3 %vm2755_vm0, %v2714_v33  ;;  %v1672_v0 = vadd.f32 %v1544_v21, %v902_v51  ;;  %v3574_v33 = vmax.f32 %v3257_v24, 0.0  ;;  %v3573_v51 = vmax.f32 %v3254_v8, 0.0  ;;  %v3864_v23 = vsel %vm3669_vm1, %v3616_v30, -inf  ;;  %v6906_v50 = vpop.permute.xlu0 %1325  ;;  %v6911_v30 = vld [vmem:[%s7797_s4] ss:$0 sm:$0xff] }
 0x3bf   :  { %v3863_v24 = vmax.f32 %v3861_v31, %v3862_v34 }
 0x3c0   :  { %2135 = vperm.xlu1 %4673, %v6630_v15   ;;  %641 = vperm.xlu2 %4674, %v138_v39   ;;  %v6858_v15 = vld [vmem:[%s7799_s6 + $0x18] sm:$0xff] }
 0x3c1   :  { %4103 = vmatpush.msrb.mxu2 %v6858_v15  ;;  %4128 = vmatpush.msrb.mxu3 %v6858_v15  ;;  %v3865_v8 = vmax.f32 %v3863_v24, %v3864_v23 }
 0x3c4   :  { %v2064_v41 = vpop.permute.xlu1 %2063 }
 0x3c5   :  { %v2314_v53 = vmul.f32 %v6426_v3, %v2064_v41  ;;  %v6869_v54 = vpop.permute.xlu2 %2119  ;;  %v3389_v3 = vadd.f32 %v6459_v9, %v3388_v25  ;;  %v3617_v25 = vmax.f32 %v3386_v5, 0.0  ;;  %v1685_v41 = vadd.f32 %v1557_v11, %v915_v47 }
 0x3c6   :  { %v3577_v5 = vmax.f32 %v3266_v56, 0.0  ;;  %v3578_v11 = vmax.f32 %v3269_v55, 0.0  ;;  %v6929_v56 = vld [vmem:[%s7793_s0 + $0x300] sm:$0xff] }
 0x3c7   :  { %v2442_v16 = vadd.f32 %v2314_v53, %v1672_v0  ;;  %v3618_v21 = vmax.f32 %v3389_v3, 0.0  ;;  %v3866_v20 = vsel %vm3669_vm1, %v3617_v25, -inf  ;;  %v3754_v0 = vsel %vm3669_vm1, %v3573_v51, -inf  ;;  %656 = vperm.xlu0 %4682, %v6929_v56  }
 0x3c8   :  { %4675 = vset.pattern.permute.xlu1 %v7840_v4  ;;  %4676 = vset.pattern.permute.xlu2 %v7839_v22  ;;  %v3810_v3 = vmax.f32 %v6594_v14, %v3809_v13  ;;  %v3759_v51 = vsel %vm3669_vm1, %v3576_v10, -inf  ;;  %v3790_v10 = vrot.slane %v6240_v61, 4  ;;  %v6939_v13 = vld [vmem:[%s7794_s1] ss:$0 sm:$0xff] }
 0x3c9   :  { %1317 = vperm.xlu1 %4675, %v138_v39   ;;  %v3391_v38 = vpop.f32.mrf.mxu2  ;;  %2087 = vperm.xlu2 %4676, %v138_v39   ;;  %v2574_v17 = vadd.f32 %v6473_v37, %v2442_v16  ;;  %v3755_v39 = vsel %vm3669_vm1, %v3574_v33, -inf  ;;  %v3272_v33 = vadd.f32 %v6911_v30, %v6054_v58  ;;  %v3868_v62 = vsel %vm3669_vm1, %v3618_v21, -inf }
 0x3ca   :  { %v3392_v1 = vadd.f32 %v6459_v9, %v3391_v38  ;;  %v3756_v35 = vmax.f32 %v3754_v0, %v3755_v39  ;;  %v3867_v38 = vmax.f32 %v3865_v8, %v3866_v20  ;;  %v3275_v58 = vadd.f32 %v6911_v30, %v6075_v6 }
 0x3cb   :  { %v3259_v63 = vpop.f32.mrf.mxu0  ;;  %v2702_v26 = vmax.f32 %v2574_v17, 0.0  ;;  %v3811_v23 = vrot.slane %v3810_v3, 4  ;;  %v903_v24 = vmul.f32 %v6939_v13, %v6828_v2  ;;  %v3791_v8 = vmax.f32 %v6240_v61, %v3790_v10  ;;  %v6967_v61 = vld [vmem:[%s7793_s0 + $0x368] sm:$0xff] }
 0x3cc   :  { %v3260_v44 = vadd.f32 %v6459_v9, %v3259_v63  ;;  %v2116_v42 = vpop.permute.xlu1 %2115  ;;  %v3619_v53 = vmax.f32 %v3392_v1, 0.0  ;;  %v3869_v55 = vmax.f32 %v3867_v38, %v3868_v62  ;;  %v2315_v2 = vmul.f32 %v6898_v59, %v6840_v19  ;;  %v682_v62 = vpop.permute.xlu0 %681  ;;  %v4795_v38 = vld [vmem:[%s7793_s0 + $0x2f0] sm:$0xff] }
 0x3cd   :  { %v2327_v7 = vmul.f32 %v6898_v59, %v2116_v42  ;;  %4483 = vmatmul.msk.f32.gmra.mxu2 %vm2755_vm0, %v2702_v26  ;;  %v3763_v26 = vsel %vm3669_vm1, %v3578_v11, -inf  ;;  %v3580_v42 = vmax.f32 %v3275_v58, 0.0  ;;  %v2328_v10 = vmul.f32 %v6898_v59, %v6869_v54 }
 0x3ce   :  { %v3575_v9 = vmax.f32 %v3260_v44, 0.0  ;;  %v6904_v12 = vpop.permute.xlu2 %1301  ;;  %v3870_v14 = vsel %vm3669_vm1, %v3619_v53, -inf }
 0x3cf   :  { %v2455_v16 = vadd.f32 %v2327_v7, %v1685_v41  ;;  %v3871_v39 = vmax.f32 %v3869_v55, %v3870_v14  ;;  %v6947_v7 = vld [vmem:[%s7794_s1 + $0x1] ss:$0 sm:$0xff]  ;;  %721 = vperm.xlu0 %4682, %v6967_v61  }
 0x3d0   :  { %v3757_v47 = vsel %vm3669_vm1, %v3575_v9, -inf }
 0x3d1   :  { %v3758_v17 = vmax.f32 %v3756_v35, %v3757_v47  ;;  %1369 = vperm.xlu1 %4675, %v6821_v18   ;;  %v3394_v34 = vpop.f32.mrf.mxu2  ;;  %2139 = vperm.xlu2 %4676, %v6821_v18   ;;  %v2587_v25 = vadd.f32 %v6473_v37, %v2455_v16  ;;  %v3761_v37 = vsel %vm3669_vm1, %v3577_v5, -inf  ;;  %v3579_v18 = vmax.f32 %v3272_v33, 0.0 }
 0x3d2   :  { %v3395_v1 = vadd.f32 %v6911_v30, %v3394_v34  ;;  %v3812_v16 = vmax.f32 %v3810_v3, %v3811_v23  ;;  %v3767_v47 = vsel %vm3669_vm1, %v3580_v42, -inf  ;;  %v3792_v3 = vrot.slane %v3791_v8, 2  ;;  %v6974_v34 = vld [vmem:[%s7795_s2] ss:$0 sm:$0xff] }
 0x3d3   :  { %v3760_v31 = vmax.f32 %v3758_v17, %v3759_v51  ;;  %v2715_v63 = vmax.f32 %v2587_v25, 0.0  ;;  %v3765_v5 = vsel %vm3669_vm1, %v3579_v18, -inf  ;;  %v916_v17 = vmul.f32 %v6939_v13, %v682_v62 }
 0x3d4   :  { %v3620_v6 = vmax.f32 %v3395_v1, 0.0  ;;  %v3813_v51 = vrot.slane %v3812_v16, 2  ;;  %v3793_v18 = vmax.f32 %v3791_v8, %v3792_v3  ;;  %v2316_v62 = vmul.f32 %v6898_v59, %v6712_v57 }
 0x3d5   :  { %v3762_v21 = vmax.f32 %v3760_v31, %v3761_v37  ;;  %4496 = vmatmul.msk.f32.gmra.mxu3 %vm2755_vm0, %v2715_v63  ;;  %v1298_v44 = vpop.permute.xlu1 %1297  ;;  %v152_v63 = vld [vmem:[%s7793_s0 + $0x358] sm:$0xff] }
 0x3d6   :  { %v3872_v41 = vsel %vm3669_vm1, %v3620_v6, -inf  ;;  %v1545_v20 = vmul.f32 %v6947_v7, %v1298_v44  ;;  %v6950_v0 = vpop.permute.xlu2 %1353  ;;  %v3794_v42 = vrot.slane %v3793_v18, 1 }
 0x3d7   :  { %v3764_v53 = vmax.f32 %v3762_v21, %v3763_v26  ;;  %v6952_v9 = vmax.f32 %v3871_v39, %v3872_v41  ;;  %v3814_v26 = vmax.f32 %v3812_v16, %v3813_v51  ;;  %v6989_v21 = vld [vmem:[%s7793_s0 + $0x308] sm:$0xff]  ;;  %v1546_v41 = vmul.f32 %v6947_v7, %v6904_v12 }
 0x3d8   :  { %v1673_v35 = vadd.f32 %v1545_v20, %v903_v24  ;;  %661 = vperm.xlu0 %4682, %v6989_v21   ;;  %v3795_v16 = vmax.f32 %v3793_v18, %v3794_v42 }
 0x3d9   :  { %v3766_v33 = vmax.f32 %v3764_v53, %v3765_v5  ;;  %4677 = vset.pattern.permute.xlu1 %v7893_v48  ;;  %4678 = vset.pattern.permute.xlu2 %v7840_v4  ;;  %v3815_v54 = vrot.slane %v3814_v26, 1 }
 0x3da   :  { %v2443_v11 = vadd.f32 %v2315_v2, %v1673_v35  ;;  %646 = vperm.xlu1 %4677, %v4795_v38   ;;  %1321 = vperm.xlu2 %4678, %v4795_v38  }
 0x3db   :  { %v3768_v19 = vmax.f32 %v3766_v33, %v3767_v47  ;;  %v3816_v33 = vmax.f32 %v3814_v26, %v3815_v54  ;;  %v4008_v54 = vld [vmem:[%s7798_s5 + $0x10] sm:$0xff] }
 0x3dc   :  { %v2575_v25 = vadd.f32 %v6974_v34, %v2443_v11  ;;  %v7008_v11 = vld [vmem:[%s7793_s0 + $0x378] sm:$0xff]  ;;  %4068 = vmatpush.msrb.mxu1 %v4008_v54 }
 0x3dd   :  { %v3769_v58 = vrot.slane %v3768_v19, 4  ;;  %v1350_v14 = vpop.permute.xlu1 %1349 }
 0x3de   :  { %v1558_v1 = vmul.f32 %v6947_v7, %v1350_v14  ;;  %v2703_v55 = vmax.f32 %v2575_v25, 0.0  ;;  %v153_v25 = vld [vmem:[%s7793_s0 + $0x360] sm:$0xff] }
 0x3df   :  { %v3770_v31 = vmax.f32 %v3768_v19, %v3769_v58  ;;  %v6981_v37 = vpop.permute.xlu2 %626 }
 0x3e0   :  { %v1686_v6 = vadd.f32 %v1558_v1, %v916_v17  ;;  %4484 = vmatmul.msk.f32.gmra.mxu2 %vm2755_vm0, %v2703_v55  ;;  %731 = vperm.xlu0 %4682, %v7008_v11   ;;  %v1559_v1 = vmul.f32 %v6947_v7, %v6950_v0  ;;  %v1547_v0 = vmul.f32 %v6947_v7, %v6835_v46 }
 0x3e1   :  { %v3771_v23 = vrot.slane %v3770_v31, 2  ;;  %v905_v26 = vmul.f32 %v6939_v13, %v6981_v37 }
 0x3e2   :  { %v2456_v39 = vadd.f32 %v2328_v10, %v1686_v6  ;;  %711 = vperm.xlu1 %4677, %v152_v63   ;;  %1373 = vperm.xlu2 %4678, %v152_v63  }
 0x3e3   :  { %v3772_v44 = vmax.f32 %v3770_v31, %v3771_v23 }
 0x3e4   :  { %v2588_v24 = vadd.f32 %v6974_v34, %v2456_v39 }
 0x3e5   :  { %v3773_v20 = vrot.slane %v3772_v44, 1 }
 0x3e6   :  { %v622_v53 = vpop.permute.xlu1 %621  ;;  %v2716_v5 = vmax.f32 %v2588_v24, 0.0 }
 0x3e7   :  { %v904_v8 = vmul.f32 %v6939_v13, %v622_v53  ;;  %v6996_v2 = vpop.permute.xlu2 %691  ;;  %v3774_v35 = vmax.f32 %v3772_v44, %v3773_v20  ;;  %v1675_v20 = vadd.f32 %v1547_v0, %v905_v26 }
 0x3e8   :  { %4497 = vmatmul.msk.f32.gmra.mxu3 %vm2755_vm0, %v2716_v5  ;;  %4694 = vset.pattern.permute.xlu0 %v7839_v22 }
 0x3e9   :  { %v1674_v47 = vadd.f32 %v1546_v41, %v904_v8  ;;  %v4037_v12 = vsel %vm4036_vm5, %v3774_v35, %v6788_v29  ;;  %2103 = vperm.xlu0 %4694, %v6989_v21  }
 0x3ea   :  { %4680 = vset.pattern.permute.xlu1 %v7839_v22  ;;  %4681 = vset.pattern.permute.xlu2 %v7893_v48  ;;  %v4039_v38 = vsel %vm4038_vm6, %v3795_v16, %v4037_v12 }
 0x3eb   :  { %v2444_v19 = vadd.f32 %v2316_v62, %v1674_v47  ;;  %2143 = vperm.xlu1 %4680, %v152_v63   ;;  %651 = vperm.xlu2 %4681, %v6648_v28   ;;  %v7013_v57 = vsel %vm4040_vm7, %v3816_v33, %v4039_v38  ;;  %v4797_v47 = vld [vmem:[%s7793_s0 + $0x200] sm:$0xff] }
 0x3ed   :  { %v2576_v29 = vadd.f32 %v6974_v34, %v2444_v19 }
 0x3ee   :  { %v687_v3 = vpop.permute.xlu1 %686 }
 0x3ef   :  { %v2704_v17 = vmax.f32 %v2576_v29, 0.0  ;;  %v917_v58 = vmul.f32 %v6939_v13, %v687_v3  ;;  %v918_v3 = vmul.f32 %v6939_v13, %v6996_v2 }
 0x3f0   :  { %v2128_v51 = vpop.permute.xlu2 %2127 }
 0x3f1   :  { %4485 = vmatmul.msk.f32.gmra.mxu2 %vm2755_vm0, %v2704_v17  ;;  %v1687_v31 = vadd.f32 %v1559_v1, %v917_v58 }
 0x3f2   :  { %v3397_v14 = vpop.f32.mrf.mxu2 }
 0x3f3   :  { %2095 = vperm.xlu1 %4680, %v6648_v28   ;;  %716 = vperm.xlu2 %4681, %v153_v25   ;;  %v7031_v28 = vld [vmem:[%s7799_s6 + $0x10] sm:$0xff]  ;;  %v3398_v10 = vadd.f32 %v6911_v30, %v3397_v14  ;;  %v2330_v14 = vmul.f32 %v6898_v59, %v2128_v51 }
 0x3f4   :  { %4104 = vmatpush.msrb.mxu2 %v7031_v28  ;;  %4129 = vmatpush.msrb.mxu3 %v7031_v28 }
 0x3f5   :  { %v3621_v44 = vmax.f32 %v3398_v10, 0.0 }
 0x3f7   :  { %v2124_v55 = vpop.permute.xlu1 %2123  ;;  %v3880_v5 = vsel %vm3669_vm1, %v3621_v44, -inf }
 0x3f8   :  { %v2329_v63 = vmul.f32 %v6898_v59, %v2124_v55  ;;  %v2080_v18 = vpop.permute.xlu2 %2079 }
 0x3fa   :  { %v2457_v6 = vadd.f32 %v2329_v63, %v1687_v31  ;;  %v632_v31 = vpop.permute.xlu0 %631 }
 0x3fb   :  { %4683 = vset.pattern.permute.xlu1 %v7840_v4  ;;  %4684 = vset.pattern.permute.xlu2 %v7839_v22 }
 0x3fc   :  { %1377 = vperm.xlu1 %4683, %v153_v25   ;;  %2147 = vperm.xlu2 %4684, %v153_v25   ;;  %v2589_v23 = vadd.f32 %v6974_v34, %v2457_v6  ;;  %v906_v6 = vmul.f32 %v6939_v13, %v632_v31 }
 0x3fd   :  { %v3400_v39 = vpop.f32.mrf.mxu2 }
 0x3fe   :  { %v3401_v42 = vadd.f32 %v6911_v30, %v3400_v39  ;;  %v2717_v24 = vmax.f32 %v2589_v23, 0.0 }
 0x3ff   :  { %v2076_v41 = vpop.permute.xlu1 %2075 }
 0x400   :  { %v3622_v46 = vmax.f32 %v3401_v42, 0.0  ;;  %v2317_v53 = vmul.f32 %v6898_v59, %v2076_v41  ;;  %4498 = vmatmul.msk.f32.gmra.mxu3 %vm2755_vm0, %v2717_v24  ;;  %v2318_v42 = vmul.f32 %v6898_v59, %v2080_v18 }
 0x401   :  { %v1362_v37 = vpop.permute.xlu2 %1361 }
 0x402   :  { %v3881_v8 = vsel %vm3669_vm1, %v3622_v46, -inf  ;;  %v2445_v35 = vadd.f32 %v2317_v53, %v1675_v20  ;;  %v1561_v46 = vmul.f32 %v6947_v7, %v1362_v37  ;;  %v4798_v37 = vld [vmem:[%s7793_s0 + $0x208] sm:$0xff] }
 0x403   :  { %v3882_v16 = vmax.f32 %v3880_v5, %v3881_v8 }
 0x404   :  { %v2577_v33 = vadd.f32 %v6974_v34, %v2445_v35  ;;  %1329 = vperm.xlu1 %4683, %v6929_v56   ;;  %4685 = vset.pattern.permute.xlu2 %v7840_v4  ;;  %v2331_v35 = vmul.f32 %v6898_v59, %v6745_v36  ;;  %v7097_v36 = vld [vmem:[%s7793_s0 + $0x380] sm:$0xff] }
 0x405   :  { %v3403_v62 = vpop.f32.mrf.mxu2  ;;  %1201 = vperm.xlu2 %4685, %v4797_v47   ;;  %2163 = vperm.xlu0 %4694, %v7097_v36  }
 0x406   :  { %v2705_v12 = vmax.f32 %v2577_v33, 0.0  ;;  %v3404_v38 = vadd.f32 %v6911_v30, %v3403_v62 }
 0x408   :  { %v3623_v19 = vmax.f32 %v3404_v38, 0.0  ;;  %4486 = vmatmul.msk.f32.gmra.mxu2 %vm2755_vm0, %v2705_v12  ;;  %v1358_v29 = vpop.permute.xlu1 %1357 }
 0x409   :  { %v1560_v17 = vmul.f32 %v6947_v7, %v1358_v29  ;;  %v7062_v25 = vpop.permute.xlu2 %1313 }
 0x40a   :  { %v3883_v58 = vsel %vm3669_vm1, %v3623_v19, -inf  ;;  %v1549_v31 = vmul.f32 %v6947_v7, %v7062_v25 }
 0x40b   :  { %v3884_v1 = vmax.f32 %v3882_v16, %v3883_v58  ;;  %v1688_v55 = vadd.f32 %v1560_v17, %v918_v3 }
 0x40c   :  { %4686 = vset.pattern.permute.xlu1 %v7839_v22 }
 0x40d   :  { %v2458_v63 = vadd.f32 %v2330_v14, %v1688_v55  ;;  %2099 = vperm.xlu1 %4686, %v6929_v56   ;;  %4687 = vset.pattern.permute.xlu2 %v7839_v22 }
 0x40e   :  { %v3406_v10 = vpop.f32.mrf.mxu2  ;;  %1971 = vperm.xlu2 %4687, %v4797_v47   ;;  %4699 = vset.pattern.permute.xlu0 %v7840_v4 }
 0x40f   :  { %v3407_v2 = vadd.f32 %v6911_v30, %v3406_v10  ;;  %v2590_v0 = vadd.f32 %v6974_v34, %v2458_v63 }
 0x410   :  { %v1310_v26 = vpop.permute.xlu1 %1309 }
 0x411   :  { %v3624_v51 = vmax.f32 %v3407_v2, 0.0  ;;  %v1548_v23 = vmul.f32 %v6947_v7, %v1310_v26  ;;  %v2718_v39 = vmax.f32 %v2590_v0, 0.0 }
 0x412   :  { %v702_v44 = vpop.permute.xlu2 %701 }
 0x413   :  { %v3885_v56 = vsel %vm3669_vm1, %v3624_v51, -inf  ;;  %v1676_v24 = vadd.f32 %v1548_v23, %v906_v6  ;;  %4499 = vmatmul.msk.f32.gmra.mxu3 %vm2755_vm0, %v2718_v39  ;;  %v1562_v23 = vmul.f32 %v6947_v7, %v6867_v49  ;;  %v920_v39 = vmul.f32 %v6939_v13, %v702_v44 }
 0x414   :  { %v3886_v54 = vmax.f32 %v3884_v1, %v3885_v56  ;;  %v155_v1 = vld [vmem:[%s7793_s0 + $0x370] sm:$0xff] }
 0x415   :  { %v2446_v41 = vadd.f32 %v2318_v42, %v1676_v24  ;;  %4688 = vset.pattern.permute.xlu1 %v7840_v4  ;;  %v7123_v24 = vld [vmem:[%s7793_s0 + $0x390] sm:$0xff] }
 0x416   :  { %1381 = vperm.xlu1 %4688, %v6967_v61   ;;  %2151 = vperm.xlu2 %4687, %v6967_v61  }
 0x417   :  { %v2578_v20 = vadd.f32 %v6974_v34, %v2446_v41  ;;  %1401 = vperm.xlu0 %4699, %v7123_v24  }
 0x419   :  { %v2706_v53 = vmax.f32 %v2578_v20, 0.0  ;;  %v697_v5 = vpop.permute.xlu1 %696 }
 0x41a   :  { %v919_v18 = vmul.f32 %v6939_v13, %v697_v5  ;;  %v7082_v8 = vpop.permute.xlu2 %641 }
 0x41b   :  { %4487 = vmatmul.msk.f32.gmra.mxu2 %vm2755_vm0, %v2706_v53 }
 0x41c   :  { %v1689_v16 = vadd.f32 %v1561_v46, %v919_v18 }
 0x41d   :  { %v3409_v33 = vpop.f32.mrf.mxu2 }
 0x41e   :  { %v2459_v62 = vadd.f32 %v2331_v35, %v1689_v16  ;;  %v3410_v61 = vadd.f32 %v6911_v30, %v3409_v33  ;;  %1333 = vperm.xlu1 %4688, %v6989_v21   ;;  %4689 = vset.pattern.permute.xlu2 %v7840_v4  ;;  %v908_v16 = vmul.f32 %v6939_v13, %v7082_v8 }
 0x41f   :  { %1205 = vperm.xlu2 %4689, %v4798_v37   ;;  %4702 = vset.pattern.permute.xlu0 %v7893_v48 }
 0x420   :  { %v3625_v47 = vmax.f32 %v3410_v61, 0.0  ;;  %v2591_v12 = vadd.f32 %v6974_v34, %v2459_v62 }
 0x421   :  { %v637_v38 = vpop.permute.xlu1 %636 }
 0x422   :  { %v3887_v19 = vsel %vm3669_vm1, %v3625_v47, -inf  ;;  %v2719_v29 = vmax.f32 %v2591_v12, 0.0  ;;  %v907_v14 = vmul.f32 %v6939_v13, %v637_v38 }
 0x423   :  { %v3888_v21 = vmax.f32 %v3886_v54, %v3887_v19  ;;  %v2088_v3 = vpop.permute.xlu2 %2087  ;;  %v1690_v54 = vadd.f32 %v1562_v23, %v920_v39 }
 0x424   :  { %4500 = vmatmul.msk.f32.gmra.mxu3 %vm2755_vm0, %v2719_v29  ;;  %v1677_v2 = vadd.f32 %v1549_v31, %v907_v14  ;;  %v7150_v29 = vld [vmem:[%s7799_s6 + $0x8] sm:$0xff] }
 0x425   :  { %v3412_v17 = vpop.f32.mrf.mxu2  ;;  %4105 = vmatpush.msrb.mxu2 %v7150_v29  ;;  %4130 = vmatpush.msrb.mxu3 %v7150_v29  ;;  %v158_v31 = vld [vmem:[%s7793_s0 + $0x388] sm:$0xff] }
 0x426   :  { %v3413_v58 = vadd.f32 %v6911_v30, %v3412_v17  ;;  %4690 = vset.pattern.permute.xlu1 %v7839_v22  ;;  %v7156_v17 = vpop.f32.mrf.mxu1 }
 0x427   :  { %1975 = vperm.xlu1 %4690, %v4798_v37   ;;  %4691 = vset.pattern.permute.xlu2 %v7893_v48  ;;  %v2320_v37 = vmul.f32 %v6898_v59, %v2088_v3 }
 0x428   :  { %v3626_v55 = vmax.f32 %v3413_v58, 0.0  ;;  %726 = vperm.xlu2 %4691, %v155_v1  }
 0x42a   :  { %v3889_v63 = vsel %vm3669_vm1, %v3626_v55, -inf  ;;  %v2084_v10 = vpop.permute.xlu1 %2083 }
 0x42b   :  { %v3890_v6 = vmax.f32 %v3888_v21, %v3889_v63  ;;  %v2319_v0 = vmul.f32 %v6898_v59, %v2084_v10  ;;  %v2140_v26 = vpop.permute.xlu2 %2139  ;;  %v4007_v21 = vld [vmem:[%s7798_s5 + $0x8] sm:$0xff] }
 0x42c   :  { %4069 = vmatpush.msrb.mxu1 %v4007_v21 }
 0x42d   :  { %v2447_v51 = vadd.f32 %v2319_v0, %v1677_v2 }
 0x42e   :  { %v7172_v0 = vpop.f32.mrf.mxu1 }
 0x42f   :  { %v2579_v42 = vadd.f32 %v6974_v34, %v2447_v51  ;;  %4692 = vset.pattern.permute.xlu1 %v7840_v4 }
 0x430   :  { %1385 = vperm.xlu1 %4692, %v155_v1   ;;  %4693 = vset.pattern.permute.xlu2 %v7839_v22 }
 0x431   :  { %v2707_v25 = vmax.f32 %v2579_v42, 0.0  ;;  %2155 = vperm.xlu2 %4693, %v155_v1   ;;  %v2333_v1 = vmul.f32 %v6898_v59, %v2140_v26  ;;  %v2321_v42 = vmul.f32 %v6898_v59, %v6765_v32  ;;  %v7191_v32 = vld [vmem:[%s7793_s0 + $0x3a8] sm:$0xff] }
 0x432   :  { %v2136_v56 = vpop.permute.xlu1 %2135 }
 0x433   :  { %v2332_v49 = vmul.f32 %v6898_v59, %v2136_v56  ;;  %4488 = vmatmul.msk.f32.gmra.mxu2 %vm2755_vm0, %v2707_v25 }
 0x434   :  { %v1322_v44 = vpop.permute.xlu2 %1321 }
 0x435   :  { %v2460_v41 = vadd.f32 %v2332_v49, %v1690_v54  ;;  %v1551_v2 = vmul.f32 %v6947_v7, %v1322_v44 }
 0x437   :  { %v2592_v20 = vadd.f32 %v6974_v34, %v2460_v41 }
 0x438   :  { %1389 = vperm.xlu1 %4692, %v7008_v11   ;;  %v3415_v46 = vpop.f32.mrf.mxu2 }
 0x439   :  { %v3416_v53 = vadd.f32 %v6911_v30, %v3415_v46  ;;  %v2720_v5 = vmax.f32 %v2592_v20, 0.0  ;;  %2159 = vperm.xlu2 %4693, %v7008_v11   ;;  %v707_v11 = vpop.permute.xlu0 %706  ;;  %v7186_v20 = vpop.f32.mrf.mxu1 }
 0x43a   :  { %v921_v19 = vmul.f32 %v6939_v13, %v707_v11 }
 0x43b   :  { %v3627_v18 = vmax.f32 %v3416_v53, 0.0  ;;  %4501 = vmatmul.msk.f32.gmra.mxu3 %vm2755_vm0, %v2720_v5  ;;  %v1318_v35 = vpop.permute.xlu1 %1317 }
 0x43c   :  { %v1550_v33 = vmul.f32 %v6947_v7, %v1318_v35  ;;  %v7137_v62 = vpop.permute.xlu2 %1373 }
 0x43d   :  { %v3891_v61 = vsel %vm3669_vm1, %v3627_v18, -inf }
 0x43e   :  { %v3892_v47 = vmax.f32 %v3890_v6, %v3891_v61  ;;  %v1678_v12 = vadd.f32 %v1550_v33, %v908_v16  ;;  %v7170_v6 = vld [vmem:[%s7793_s0 + $0x3a0] sm:$0xff]  ;;  %v160_v33 = vld [vmem:[%s7793_s0 + $0x398] sm:$0xff] }
 0x43f   :  { %756 = vperm.xlu0 %4702, %v7170_v6  }
 0x440   :  { %v2448_v38 = vadd.f32 %v2320_v37, %v1678_v12  ;;  %4695 = vset.pattern.permute.xlu1 %v7893_v48  ;;  %v1564_v37 = vmul.f32 %v6947_v7, %v7137_v62 }
 0x441   :  { %736 = vperm.xlu1 %4695, %v7097_v36   ;;  %4696 = vset.pattern.permute.xlu2 %v7840_v4  ;;  %v7204_v61 = vpop.f32.mrf.mxu1 }
 0x442   :  { %v2580_v8 = vadd.f32 %v6974_v34, %v2448_v38  ;;  %1393 = vperm.xlu2 %4696, %v7097_v36  }
 0x443   :  { %v1370_v3 = vpop.permute.xlu1 %1369 }
 0x444   :  { %v2708_v58 = vmax.f32 %v2580_v8, 0.0  ;;  %v1563_v14 = vmul.f32 %v6947_v7, %v1370_v3 }
 0x445   :  { %v652_v36 = vpop.permute.xlu2 %651 }
 0x446   :  { %v1691_v55 = vadd.f32 %v1563_v14, %v921_v19  ;;  %4489 = vmatmul.msk.f32.gmra.mxu2 %vm2755_vm0, %v2708_v58  ;;  %v910_v19 = vmul.f32 %v6939_v13, %v652_v36  ;;  %v7220_v14 = vld [vmem:[%s7793_s0 + $0x3b8] sm:$0xff] }
 0x447   :  { %4705 = vset.pattern.permute.xlu0 %v7839_v22 }
 0x448   :  { %v2461_v63 = vadd.f32 %v2333_v1, %v1691_v55  ;;  %2183 = vperm.xlu0 %4705, %v7191_v32   ;;  %v7927_v55 = vld [vmem:[#allocation53_spill] sm:$0xff] }
 0x449   :  { %741 = vperm.xlu1 %4695, %v158_v31  }
 0x44a   :  { %v2593_v10 = vadd.f32 %v6974_v34, %v2461_v63  ;;  %1397 = vperm.xlu2 %4696, %v158_v31   ;;  %v7229_v63 = vpop.permute.xlu0 %656 }
 0x44c   :  { %v647_v26 = vpop.permute.xlu1 %646  ;;  %v2721_v51 = vmax.f32 %v2593_v10, 0.0 }
 0x44d   :  { %v909_v23 = vmul.f32 %v6939_v13, %v647_v26  ;;  %v7176_v39 = vpop.permute.xlu2 %716 }
 0x44e   :  { %4502 = vmatmul.msk.f32.gmra.mxu3 %vm2755_vm0, %v2721_v51 }
 0x44f   :  { %v1679_v25 = vadd.f32 %v1551_v2, %v909_v23 }
 0x450   :  { %v3418_v56 = vpop.f32.mrf.mxu2  ;;  %4708 = vset.pattern.permute.xlu0 %v7840_v4 }
 0x451   :  { %v2449_v54 = vadd.f32 %v2321_v42, %v1679_v25  ;;  %v3419_v49 = vadd.f32 %v6911_v30, %v3418_v56  ;;  %4697 = vset.pattern.permute.xlu1 %v7839_v22  ;;  %1421 = vperm.xlu0 %4708, %v7220_v14  }
 0x452   :  { %2167 = vperm.xlu1 %4697, %v158_v31   ;;  %4698 = vset.pattern.permute.xlu2 %v7893_v48  ;;  %v879_v31 = vmul.f32 %v6939_v13, %v7927_v55 }
 0x453   :  { %v2581_v44 = vadd.f32 %v6974_v34, %v2449_v54  ;;  %v3628_v41 = vmax.f32 %v3419_v49, 0.0  ;;  %746 = vperm.xlu2 %4698, %v7123_v24  }
 0x454   :  { %v712_v46 = vpop.permute.xlu1 %711 }
 0x455   :  { %v2709_v53 = vmax.f32 %v2581_v44, 0.0  ;;  %v3893_v5 = vsel %vm3669_vm1, %v3628_v41, -inf  ;;  %v922_v16 = vmul.f32 %v6939_v13, %v712_v46  ;;  %v923_v41 = vmul.f32 %v6939_v13, %v7176_v39  ;;  %v7252_v39 = vld [vmem:[%s7799_s6] sm:$0xff] }
 0x456   :  { %v7196_v18 = vmax.f32 %v3892_v47, %v3893_v5  ;;  %v2148_v35 = vpop.permute.xlu2 %2147  ;;  %4106 = vmatpush.msrb.mxu2 %v7252_v39  ;;  %4131 = vmatpush.msrb.mxu3 %v7252_v39 }
 0x457   :  { %4490 = vmatmul.msk.f32.gmra.mxu2 %vm2755_vm0, %v2709_v53  ;;  %v1692_v47 = vadd.f32 %v1564_v37, %v922_v16  ;;  %v2335_v16 = vmul.f32 %v6898_v59, %v2148_v35  ;;  %v7246_v37 = vpop.permute.xlu0 %721  ;;  %v3329_v35 = vadd.f32 %v6911_v30, %v7172_v0  ;;  %v3332_v0 = vadd.f32 %v6911_v30, %v7186_v20  ;;  %v4006_v20 = vld [vmem:[%s7798_s5] sm:$0xff] }
 0x458   :  { %4157 = vmatpush.msra.mxu2 %v6858_v15  ;;  %4186 = vmatpush.msra.mxu3 %v6858_v15 }
 0x459   :  { %4711 = vset.pattern.permute.xlu0 %v7893_v48  ;;  %4070 = vmatpush.msrb.mxu1 %v4006_v20  ;;  %v7333_v20 = vld [vmem:[%s7793_s0 + $0x3d0] sm:$0xff] }
 0x45a   :  { %2171 = vperm.xlu1 %4697, %v7123_v24   ;;  %v1552_v24 = vmul.f32 %v6947_v7, %v6906_v50  ;;  %v7222_v50 = vpop.f32.mrf.mxu1  ;;  %4158 = vmatpush.msra.mxu2 %v7031_v28 }
 0x45b   :  { %751 = vperm.xlu2 %4698, %v160_v33   ;;  %4187 = vmatpush.msra.mxu3 %v7031_v28 }
 0x45c   :  { %v1680_v36 = vadd.f32 %v1552_v24, %v910_v19  ;;  %4159 = vmatpush.msra.mxu2 %v7150_v29  ;;  %4215 = vmatpush.msra.mxu1 %v6858_v15  ;;  %v7306_v15 = vld [vmem:[%s7793_s0 + $0x3c8] sm:$0xff] }
 0x45d   :  { %v2144_v12 = vpop.permute.xlu1 %2143  ;;  %4188 = vmatpush.msra.mxu3 %v7150_v29  ;;  %781 = vperm.xlu0 %4711, %v7306_v15  }
 0x45e   :  { %v2334_v11 = vmul.f32 %v6898_v59, %v2144_v12  ;;  %4160 = vmatpush.msra.mxu2 %v7252_v39  ;;  %4216 = vmatpush.msra.mxu1 %v7031_v28 }
 0x45f   :  { %v1202_v38 = vpop.permute.xlu2 %1201  ;;  %4189 = vmatpush.msra.mxu3 %v7252_v39 }
 0x460   :  { %v2462_v8 = vadd.f32 %v2334_v11, %v1692_v47  ;;  %v1521_v3 = vmul.f32 %v6947_v7, %v1202_v38  ;;  %4217 = vmatpush.msra.mxu1 %v7150_v29 }
 0x462   :  { %4700 = vset.pattern.permute.xlu1 %v7840_v4  ;;  %v2594_v21 = vadd.f32 %v6974_v34, %v2462_v8  ;;  %v1649_v26 = vadd.f32 %v1521_v3, %v879_v31  ;;  %v3340_v49 = vpop.f32.mrf.mxu1  ;;  %4218 = vmatpush.msra.mxu1 %v7252_v39 }
 0x463   :  { %1405 = vperm.xlu1 %4700, %v160_v33   ;;  %4701 = vset.pattern.permute.xlu2 %v7839_v22  ;;  %v3421_v25 = vpop.f32.mrf.mxu2 }
 0x464   :  { %v2722_v62 = vmax.f32 %v2594_v21, 0.0  ;;  %2175 = vperm.xlu2 %4701, %v160_v33   ;;  %v3326_v21 = vadd.f32 %v6911_v30, %v7156_v17  ;;  %v163_v17 = vld [vmem:[%s7793_s0 + $0x3b0] sm:$0xff] }
 0x465   :  { %v2096_v58 = vpop.permute.xlu1 %2095  ;;  %4714 = vset.pattern.permute.xlu0 %v7839_v22 }
 0x466   :  { %v2322_v1 = vmul.f32 %v6898_v59, %v2096_v58  ;;  %4503 = vmatmul.msk.f32.gmra.mxu3 %vm2755_vm0, %v2722_v62  ;;  %v3335_v58 = vadd.f32 %v6911_v30, %v7204_v61  ;;  %v3597_v31 = vmax.f32 %v3326_v21, 0.0  ;;  %2203 = vperm.xlu0 %4714, %v7333_v20  }
 0x468   :  { %v2450_v10 = vadd.f32 %v2322_v1, %v1680_v36  ;;  %v1972_v2 = vpop.permute.xlu2 %1971 }
 0x469   :  { %v2291_v51 = vmul.f32 %v6898_v59, %v1972_v2  ;;  %v3338_v2 = vadd.f32 %v6911_v30, %v7222_v50 }
 0x46a   :  { %v2582_v23 = vadd.f32 %v6974_v34, %v2450_v10  ;;  %v3343_v24 = vpop.f32.mrf.mxu1  ;;  %v3599_v10 = vmax.f32 %v3332_v0, 0.0 }
 0x46b   :  { %v2419_v42 = vadd.f32 %v2291_v51, %v1649_v26  ;;  %1409 = vperm.xlu1 %4700, %v7170_v6   ;;  %v911_v26 = vmul.f32 %v6939_v13, %v7229_v63  ;;  %v7296_v51 = vpop.permute.xlu0 %661  ;;  %v3817_v63 = vsel %vm3669_vm1, %v3597_v31, -inf }
 0x46c   :  { %v2710_v56 = vmax.f32 %v2582_v23, 0.0  ;;  %2179 = vperm.xlu2 %4701, %v7170_v6   ;;  %v3422_v6 = vadd.f32 %v6911_v30, %v3421_v25  ;;  %v3600_v25 = vmax.f32 %v3335_v58, 0.0 }
 0x46d   :  { %v2551_v54 = vadd.f32 %v6974_v34, %v2419_v42 }
 0x46e   :  { %4491 = vmatmul.msk.f32.gmra.mxu2 %vm2755_vm0, %v2710_v56  ;;  %v1378_v44 = vpop.permute.xlu1 %1377  ;;  %v3629_v11 = vmax.f32 %v3422_v6, 0.0  ;;  %v3341_v56 = vadd.f32 %v6911_v30, %v3340_v49  ;;  %v3822_v6 = vsel %vm3669_vm1, %v3600_v25, -inf  ;;  %4717 = vset.pattern.permute.xlu0 %v7840_v4 }
 0x46f   :  { %v2679_v46 = vmax.f32 %v2551_v54, 0.0  ;;  %v1565_v53 = vmul.f32 %v6947_v7, %v1378_v44  ;;  %v3820_v54 = vsel %vm3669_vm1, %v3599_v10, -inf  ;;  %v3601_v44 = vmax.f32 %v3338_v2, 0.0 }
 0x470   :  { %v7241_v5 = vpop.permute.xlu2 %2151  ;;  %v7273_v36 = vsel %vm3669_vm1, %v3629_v11, -inf  ;;  %v924_v2 = vmul.f32 %v6939_v13, %v7246_v37  ;;  %v165_v37 = vld [vmem:[%s7793_s0 + $0x3c0] sm:$0xff] }
 0x471   :  { %v1693_v33 = vadd.f32 %v1565_v53, %v923_v41  ;;  %4460 = vmatmul.msk.f32.gmra.mxu1 %vm2755_vm0, %v2679_v46  ;;  %v3344_v41 = vadd.f32 %v6911_v30, %v3343_v24 }
 0x472   :  { %v3346_v50 = vpop.f32.mrf.mxu1 }
 0x473   :  { %v2463_v12 = vadd.f32 %v2335_v16, %v1693_v33  ;;  %4703 = vset.pattern.permute.xlu1 %v7893_v48  ;;  %v3602_v33 = vmax.f32 %v3341_v56, 0.0 }
 0x474   :  { %761 = vperm.xlu1 %4703, %v7191_v32   ;;  %v3424_v47 = vpop.f32.mrf.mxu2  ;;  %4704 = vset.pattern.permute.xlu2 %v7840_v4 }
 0x475   :  { %v3425_v38 = vadd.f32 %v6911_v30, %v3424_v47  ;;  %v2595_v8 = vadd.f32 %v6974_v34, %v2463_v12  ;;  %1413 = vperm.xlu2 %4704, %v7191_v32   ;;  %v3598_v32 = vmax.f32 %v3329_v35, 0.0  ;;  %v3347_v12 = vadd.f32 %v6911_v30, %v3346_v50 }
 0x476   :  { %v1330_v19 = vpop.permute.xlu1 %1329  ;;  %v3826_v21 = vsel %vm3669_vm1, %v3602_v33, -inf }
 0x477   :  { %v3630_v62 = vmax.f32 %v3425_v38, 0.0  ;;  %v2723_v3 = vmax.f32 %v2595_v8, 0.0  ;;  %v1553_v23 = vmul.f32 %v6947_v7, %v1330_v19  ;;  %v3818_v42 = vsel %vm3669_vm1, %v3598_v32, -inf }
 0x478   :  { %v3819_v49 = vmax.f32 %v3817_v63, %v3818_v42  ;;  %v3824_v38 = vsel %vm3669_vm1, %v3601_v44, -inf  ;;  %v3603_v8 = vmax.f32 %v3344_v41, 0.0  ;;  %v3604_v0 = vmax.f32 %v3347_v12, 0.0 }
 0x479   :  { %v7276_v1 = vsel %vm3669_vm1, %v3630_v62, -inf  ;;  %4504 = vmatmul.msk.f32.gmra.mxu3 %vm2755_vm0, %v2723_v3  ;;  %v7287_v61 = vpop.permute.xlu2 %1205  ;;  %v1681_v53 = vadd.f32 %v1553_v23, %v911_v26  ;;  %v7326_v3 = vpop.permute.xlu0 %731  ;;  %v2336_v42 = vmul.f32 %v6898_v59, %v7241_v5 }
 0x47a   :  { %v3903_v55 = vmax.f32 %v7273_v36, %v7276_v1  ;;  %v3821_v47 = vmax.f32 %v3819_v49, %v3820_v54  ;;  %v3828_v58 = vsel %vm3669_vm1, %v3603_v8, -inf  ;;  %v3830_v10 = vsel %vm3669_vm1, %v3604_v0, -inf  ;;  %v7382_v0 = vld [vmem:[%s7794_s1 + $0x2] ss:$0 sm:$0xff] }
 0x47b   :  { %v1522_v8 = vmul.f32 %v6947_v7, %v7287_v61 }
 0x47c   :  { %766 = vperm.xlu1 %4703, %v163_v17   ;;  %v3823_v24 = vmax.f32 %v3821_v47, %v3822_v6 }
 0x47d   :  { %1417 = vperm.xlu2 %4704, %v163_v17  }
 0x47e   :  { %v3825_v62 = vmax.f32 %v3823_v24, %v3824_v38 }
 0x47f   :  { %v2100_v46 = vpop.permute.xlu1 %2099 }
 0x480   :  { %v2323_v16 = vmul.f32 %v6898_v59, %v2100_v46  ;;  %v3827_v31 = vmax.f32 %v3825_v62, %v3826_v21 }
 0x481   :  { %v2104_v46 = vpop.permute.xlu0 %2103 }
 0x482   :  { %v2451_v35 = vadd.f32 %v2323_v16, %v1681_v53  ;;  %v7318_v11 = vpop.permute.xlu2 %726  ;;  %v3829_v23 = vmax.f32 %v3827_v31, %v3828_v58  ;;  %v912_v53 = vmul.f32 %v6939_v13, %v7296_v51  ;;  %v2324_v33 = vmul.f32 %v6898_v59, %v2104_v46  ;;  %v7928_v59 = vld [vmem:[#allocation46_spill] sm:$0xff]  ;;  %v7410_v46 = vld [vmem:[%s7799_s6 + $0x18] sm:$0xff] }
 0x483   :  { %v880_v1 = vmul.f32 %v6939_v13, %v7928_v59 }
 0x484   :  { %v2583_v19 = vadd.f32 %v6974_v34, %v2451_v35  ;;  %4706 = vset.pattern.permute.xlu1 %v7839_v22  ;;  %v3831_v63 = vmax.f32 %v3829_v23, %v3830_v10 }
 0x485   :  { %2187 = vperm.xlu1 %4706, %v163_v17   ;;  %4707 = vset.pattern.permute.xlu2 %v7893_v48  ;;  %v1650_v61 = vadd.f32 %v1522_v8, %v880_v1 }
 0x486   :  { %v2711_v32 = vmax.f32 %v2583_v19, 0.0  ;;  %771 = vperm.xlu2 %4707, %v7220_v14   ;;  %v3832_v5 = vrot.slane %v3831_v63, 4 }
 0x488   :  { %4492 = vmatmul.msk.f32.gmra.mxu2 %vm2755_vm0, %v2711_v32  ;;  %v1382_v17 = vpop.permute.xlu1 %1381  ;;  %v3833_v51 = vmax.f32 %v3831_v63, %v3832_v5  ;;  %v925_v63 = vmul.f32 %v6939_v13, %v7318_v11 }
 0x489   :  { %v1566_v26 = vmul.f32 %v6947_v7, %v1382_v17  ;;  %v2164_v8 = vpop.permute.xlu0 %2163 }
 0x48a   :  { %v3834_v24 = vrot.slane %v3833_v51, 2 }
 0x48b   :  { %v1694_v25 = vadd.f32 %v1566_v26, %v924_v2  ;;  %v3427_v56 = vpop.f32.mrf.mxu2  ;;  %v7344_v50 = vpop.permute.xlu2 %2155  ;;  %v7391_v2 = vld [vmem:[%s7797_s4] ss:$0 sm:$0xff] }
 0x48c   :  { %v3428_v54 = vadd.f32 %v6911_v30, %v3427_v56  ;;  %v3835_v31 = vmax.f32 %v3833_v51, %v3834_v24  ;;  %v2337_v11 = vmul.f32 %v7382_v0, %v7344_v50  ;;  %v2339_v24 = vmul.f32 %v7382_v0, %v2164_v8 }
 0x48d   :  { %v2464_v44 = vadd.f32 %v2336_v42, %v1694_v25  ;;  %2191 = vperm.xlu1 %4706, %v7220_v14  }
 0x48e   :  { %v3631_v41 = vmax.f32 %v3428_v54, 0.0  ;;  %776 = vperm.xlu2 %4707, %v165_v37   ;;  %v3836_v42 = vrot.slane %v3835_v31, 1 }
 0x48f   :  { %v2596_v49 = vadd.f32 %v6974_v34, %v2464_v44 }
 0x490   :  { %v3904_v16 = vsel %vm3669_vm1, %v3631_v41, -inf  ;;  %v1334_v6 = vpop.permute.xlu1 %1333  ;;  %v3837_v13 = vmax.f32 %v3835_v31, %v3836_v42 }
 0x491   :  { %v7359_v30 = vmax.f32 %v3903_v55, %v3904_v16  ;;  %v1554_v14 = vmul.f32 %v6947_v7, %v1334_v6  ;;  %v2724_v12 = vmax.f32 %v2596_v49, 0.0  ;;  %v7376_v55 = vld [vmem:[%s7793_s0 + $0x3e0] sm:$0xff] }
 0x492   :  { %1441 = vperm.xlu0 %4717, %v7376_v55   ;;  %v4043_v5 = vsel %vm4042_vm8, %v3837_v13, %v7013_v57  ;;  %v7429_v16 = vld [vmem:[%s7794_s1] ss:$0 sm:$0xff]  ;;  %v7436_v6 = vld [vmem:[%s7794_s1 + $0x1] ss:$0 sm:$0xff] }
 0x493   :  { %v1682_v47 = vadd.f32 %v1554_v14, %v912_v53  ;;  %4505 = vmatmul.msk.f32.gmra.mxu3 %vm2755_vm0, %v2724_v12  ;;  %v7364_v35 = vpop.permute.xlu2 %2159 }
 0x494   :  { %v2338_v12 = vmul.f32 %v7382_v0, %v7364_v35 }
 0x495   :  { %v2452_v38 = vadd.f32 %v2324_v33, %v1682_v47  ;;  %4709 = vset.pattern.permute.xlu1 %v7840_v4  ;;  %v168_v33 = vld [vmem:[%s7793_s0 + $0x3d8] sm:$0xff] }
 0x496   :  { %1425 = vperm.xlu1 %4709, %v165_v37   ;;  %4710 = vset.pattern.permute.xlu2 %v7839_v22 }
 0x497   :  { %v2584_v36 = vadd.f32 %v6974_v34, %v2452_v38  ;;  %2195 = vperm.xlu2 %4710, %v165_v37   ;;  %v4837_v37 = vmov 0.0   ;;  %v7450_v38 = vld [vmem:[%s7793_s0 + $0x3f0] sm:$0xff] }
 0x499   :  { %v2712_v19 = vmax.f32 %v2584_v36, 0.0  ;;  %v1976_v21 = vpop.permute.xlu1 %1975 }
 0x49a   :  { %v2292_v62 = vmul.f32 %v7382_v0, %v1976_v21  ;;  %4720 = vset.pattern.permute.xlu0 %v7893_v48 }
 0x49b   :  { %4493 = vmatmul.msk.f32.gmra.mxu2 %vm2755_vm0, %v2712_v19  ;;  %806 = vperm.xlu0 %4720, %v7450_v38  }
 0x49c   :  { %v2420_v32 = vadd.f32 %v2292_v62, %v1650_v61  ;;  %v1394_v58 = vpop.permute.xlu2 %1393  ;;  %v7468_v62 = vld [vmem:[%s7795_s2] ss:$0 sm:$0xff] }
 0x49d   :  { %v1569_v36 = vmul.f32 %v7436_v6, %v1394_v58  ;;  %v172_v58 = vld [vmem:[%s7793_s0 + $0x3f8] sm:$0xff] }
 0x49e   :  { %v2552_v17 = vadd.f32 %v6974_v34, %v2420_v32  ;;  %1429 = vperm.xlu1 %4709, %v7306_v15   ;;  %v3430_v10 = vpop.f32.mrf.mxu2 }
 0x49f   :  { %v3431_v26 = vadd.f32 %v7391_v2, %v3430_v10  ;;  %2199 = vperm.xlu2 %4710, %v7306_v15   ;;  %v7475_v10 = vpop.f32.mrf.mxu3 }
 0x4a0   :  { %v2680_v23 = vmax.f32 %v2552_v17, 0.0 }
 0x4a1   :  { %v3632_v25 = vmax.f32 %v3431_v26, 0.0 }
 0x4a2   :  { %4461 = vmatmul.msk.f32.gmra.mxu1 %vm2755_vm0, %v2680_v23  ;;  %v1386_v56 = vpop.permute.xlu1 %1385 }
 0x4a3   :  { %v7400_v54 = vsel %vm3669_vm1, %v3632_v25, -inf  ;;  %v1567_v44 = vmul.f32 %v6947_v7, %v1386_v56  ;;  %4107 = vmatmul.f32.vlgmr.msrb.gmra.mxu2 %v4837_v37  ;;  %4723 = vset.pattern.permute.xlu0 %v7839_v22  ;;  %v170_v25 = vld [vmem:[%s7793_s0 + $0x3e8] sm:$0xff] }
 0x4a4   :  { %v3907_v15 = vmax.f32 %v7359_v30, %v7400_v54  ;;  %v7405_v41 = vpop.permute.xlu2 %1397  ;;  %4240 = vmatpush.msrb.mxu2 %v7410_v46  ;;  %2223 = vperm.xlu0 %4723, %v172_v58  }
 0x4a5   :  { %v1695_v49 = vadd.f32 %v1567_v44, %v925_v63  ;;  %v1570_v63 = vmul.f32 %v7436_v6, %v7405_v41 }
 0x4a6   :  { %4712 = vset.pattern.permute.xlu1 %v7893_v48  ;;  %4241 = vmatpush.msrb.mxu2 %v7031_v28 }
 0x4a7   :  { %v2465_v7 = vadd.f32 %v2337_v11, %v1695_v49  ;;  %786 = vperm.xlu1 %4712, %v7333_v20   ;;  %4713 = vset.pattern.permute.xlu2 %v7840_v4  ;;  %v7490_v44 = vpop.f32.mrf.mxu3 }
 0x4a8   :  { %1433 = vperm.xlu2 %4713, %v7333_v20   ;;  %4242 = vmatpush.msrb.mxu2 %v7150_v29  ;;  %v926_v20 = vmul.f32 %v7429_v16, %v7326_v3 }
 0x4a9   :  { %v2597_v50 = vadd.f32 %v6974_v34, %v2465_v7 }
 0x4aa   :  { %4524 = vmatmul.msk.f32.vlgmr.msrb.gmra.mxu1 %vm3669_vm1, %v4043_v5  ;;  %v1390_v53 = vpop.permute.xlu1 %1389  ;;  %4243 = vmatpush.msrb.mxu2 %v7252_v39 }
 0x4ab   :  { %v1568_v57 = vmul.f32 %v7436_v6, %v1390_v53  ;;  %v2725_v14 = vmax.f32 %v2597_v50, 0.0  ;;  %4298 = vmatpush.msrb.mxu1 %v7410_v46 }
 0x4ad   :  { %v1696_v47 = vadd.f32 %v1568_v57, %v926_v20  ;;  %4506 = vmatmul.msk.f32.gmra.mxu3 %vm2755_vm0, %v2725_v14  ;;  %v747_v3 = vpop.permute.xlu2 %746  ;;  %4299 = vmatpush.msrb.mxu1 %v7031_v28 }
 0x4ae   :  { %v929_v11 = vmul.f32 %v7429_v16, %v747_v3 }
 0x4af   :  { %v2466_v51 = vadd.f32 %v2338_v12, %v1696_v47  ;;  %791 = vperm.xlu1 %4712, %v168_v33   ;;  %4300 = vmatpush.msrb.mxu1 %v7150_v29  ;;  %v7499_v53 = vpop.f32.mrf.mxu3 }
 0x4b0   :  { %1437 = vperm.xlu2 %4713, %v168_v33  }
 0x4b1   :  { %v2598_v35 = vadd.f32 %v6974_v34, %v2466_v51  ;;  %4301 = vmatpush.msrb.mxu1 %v7252_v39 }
 0x4b3   :  { %v737_v28 = vpop.permute.xlu1 %736  ;;  %v2726_v59 = vmax.f32 %v2598_v35, 0.0 }
 0x4b4   :  { %v927_v1 = vmul.f32 %v7429_v16, %v737_v28 }
 0x4b5   :  { %4507 = vmatmul.msk.f32.gmra.mxu3 %vm2755_vm0, %v2726_v59  ;;  %v752_v19 = vpop.permute.xlu2 %751 }
 0x4b6   :  { %v1697_v29 = vadd.f32 %v1569_v36, %v927_v1  ;;  %v3433_v21 = vpop.f32.mrf.mxu2  ;;  %v930_v28 = vmul.f32 %v7429_v16, %v752_v19 }
 0x4b7   :  { %v3434_v61 = vadd.f32 %v7391_v2, %v3433_v21  ;;  %4715 = vset.pattern.permute.xlu1 %v7839_v22  ;;  %v7508_v35 = vpop.f32.mrf.mxu3 }
 0x4b8   :  { %v2467_v34 = vadd.f32 %v2339_v24, %v1697_v29  ;;  %2207 = vperm.xlu1 %4715, %v168_v33   ;;  %4716 = vset.pattern.permute.xlu2 %v7893_v48 }
 0x4b9   :  { %v3633_v39 = vmax.f32 %v3434_v61, 0.0  ;;  %796 = vperm.xlu2 %4716, %v7376_v55  }
 0x4ba   :  { %v2599_v32 = vadd.f32 %v7468_v62, %v2467_v34 }
 0x4bb   :  { %v3908_v31 = vsel %vm3669_vm1, %v3633_v39, -inf  ;;  %v742_v17 = vpop.permute.xlu1 %741 }
 0x4bc   :  { %v7480_v26 = vmax.f32 %v3907_v15, %v3908_v31  ;;  %v2727_v23 = vmax.f32 %v2599_v32, 0.0  ;;  %v928_v56 = vmul.f32 %v7429_v16, %v742_v17  ;;  %v1402_v15 = vpop.permute.xlu0 %1401 }
 0x4bd   :  { %v1571_v49 = vmul.f32 %v7436_v6, %v1402_v15 }
 0x4be   :  { %4508 = vmatmul.msk.f32.gmra.mxu3 %vm2755_vm0, %v2727_v23  ;;  %v2176_v42 = vpop.permute.xlu2 %2175  ;;  %v1698_v54 = vadd.f32 %v1570_v63, %v928_v56 }
 0x4bf   :  { %v1699_v14 = vadd.f32 %v1571_v49, %v929_v11  ;;  %v2342_v1 = vmul.f32 %v7382_v0, %v2176_v42  ;;  %v7517_v34 = vpop.f32.mrf.mxu3 }
 0x4c0   :  { %2211 = vperm.xlu1 %4715, %v7376_v55  }
 0x4c1   :  { %801 = vperm.xlu2 %4716, %v170_v25  }
 0x4c4   :  { %v2168_v30 = vpop.permute.xlu1 %2167  ;;  %v757_v29 = vpop.permute.xlu0 %756 }
 0x4c5   :  { %v2340_v37 = vmul.f32 %v7382_v0, %v2168_v30  ;;  %v931_v19 = vmul.f32 %v7429_v16, %v757_v29 }
 0x4c6   :  { %v2180_v55 = vpop.permute.xlu2 %2179 }
 0x4c7   :  { %v2468_v13 = vadd.f32 %v2340_v37, %v1698_v54  ;;  %v2343_v42 = vmul.f32 %v7382_v0, %v2180_v55  ;;  %v7525_v56 = vpop.f32.mrf.mxu3 }
 0x4c8   :  { %4718 = vset.pattern.permute.xlu1 %v7840_v4 }
 0x4c9   :  { %1445 = vperm.xlu1 %4718, %v170_v25   ;;  %v3436_v7 = vpop.f32.mrf.mxu2  ;;  %v2600_v5 = vadd.f32 %v7468_v62, %v2468_v13  ;;  %4719 = vset.pattern.permute.xlu2 %v7839_v22 }
 0x4ca   :  { %v3437_v41 = vadd.f32 %v7391_v2, %v3436_v7  ;;  %2215 = vperm.xlu2 %4719, %v170_v25  }
 0x4cb   :  { %v2728_v50 = vmax.f32 %v2600_v5, 0.0 }
 0x4cc   :  { %v3634_v20 = vmax.f32 %v3437_v41, 0.0  ;;  %v2172_v57 = vpop.permute.xlu1 %2171  ;;  %v2184_v63 = vpop.permute.xlu0 %2183 }
 0x4cd   :  { %v2341_v33 = vmul.f32 %v7382_v0, %v2172_v57  ;;  %4509 = vmatmul.msk.f32.gmra.mxu3 %vm2755_vm0, %v2728_v50  ;;  %v2344_v49 = vmul.f32 %v7382_v0, %v2184_v63 }
 0x4ce   :  { %v3910_v12 = vsel %vm3669_vm1, %v3634_v20, -inf }
 0x4cf   :  { %v3911_v47 = vmax.f32 %v7480_v26, %v3910_v12  ;;  %v2469_v3 = vadd.f32 %v2341_v33, %v1699_v14  ;;  %v1414_v51 = vpop.permute.xlu2 %1413  ;;  %v3469_v5 = vpop.f32.mrf.mxu3 }
 0x4d0   :  { %v1574_v54 = vmul.f32 %v7436_v6, %v1414_v51 }
 0x4d1   :  { %1449 = vperm.xlu1 %4718, %v7450_v38   ;;  %v2601_v22 = vadd.f32 %v7468_v62, %v2469_v3 }
 0x4d2   :  { %2219 = vperm.xlu2 %4719, %v7450_v38  }
 0x4d3   :  { %v2729_v8 = vmax.f32 %v2601_v22, 0.0 }
 0x4d5   :  { %4510 = vmatmul.msk.f32.gmra.mxu3 %vm2755_vm0, %v2729_v8  ;;  %v1406_v36 = vpop.permute.xlu1 %1405 }
 0x4d6   :  { %v1572_v59 = vmul.f32 %v7436_v6, %v1406_v36 }
 0x4d7   :  { %v1418_v32 = vpop.permute.xlu2 %1417  ;;  %v3472_v12 = vpop.f32.mrf.mxu3 }
 0x4d8   :  { %v1700_v24 = vadd.f32 %v1572_v59, %v930_v28  ;;  %v1575_v22 = vmul.f32 %v7436_v6, %v1418_v32 }
 0x4d9   :  { %4721 = vset.pattern.permute.xlu1 %v7893_v48 }
 0x4da   :  { %v2470_v21 = vadd.f32 %v2342_v1, %v1700_v24  ;;  %811 = vperm.xlu1 %4721, %v172_v58   ;;  %v3439_v61 = vpop.f32.mrf.mxu2  ;;  %4722 = vset.pattern.permute.xlu2 %v7840_v4  ;;  %v1422_v1 = vpop.permute.xlu0 %1421 }
 0x4db   :  { %v3440_v38 = vadd.f32 %v7391_v2, %v3439_v61  ;;  %1453 = vperm.xlu2 %4722, %v172_v58  }
 0x4dc   :  { %v2602_v39 = vadd.f32 %v7468_v62, %v2470_v21 }
 0x4dd   :  { %v3635_v31 = vmax.f32 %v3440_v38, 0.0  ;;  %v1410_v17 = vpop.permute.xlu1 %1409  ;;  %v1576_v38 = vmul.f32 %v7436_v6, %v1422_v1 }
 0x4de   :  { %v1573_v48 = vmul.f32 %v7436_v6, %v1410_v17  ;;  %v2730_v26 = vmax.f32 %v2602_v39, 0.0 }
 0x4df   :  { %v3912_v23 = vsel %vm3669_vm1, %v3635_v31, -inf  ;;  %v3475_v21 = vpop.f32.mrf.mxu3 }
 0x4e0   :  { %v3913_v4 = vmax.f32 %v3911_v47, %v3912_v23  ;;  %v1701_v25 = vadd.f32 %v1573_v48, %v931_v19  ;;  %4511 = vmatmul.msk.f32.gmra.mxu3 %vm2755_vm0, %v2730_v26  ;;  %v772_v13 = vpop.permute.xlu2 %771 }
 0x4e1   :  { %v934_v61 = vmul.f32 %v7429_v16, %v772_v13 }
 0x4e2   :  { %v2471_v58 = vadd.f32 %v2343_v42, %v1701_v25 }
 0x4e3   :  { %v1704_v31 = vadd.f32 %v1576_v38, %v934_v61 }
 0x4e4   :  { %v2603_v30 = vadd.f32 %v7468_v62, %v2471_v58  ;;  %v3473_v58 = vadd.f32 %v7391_v2, %v3472_v12 }
 0x4e6   :  { %v762_v37 = vpop.permute.xlu1 %761  ;;  %v2731_v15 = vmax.f32 %v2603_v30, 0.0 }
 0x4e7   :  { %v932_v11 = vmul.f32 %v7429_v16, %v762_v37  ;;  %v3476_v37 = vadd.f32 %v7391_v2, %v3475_v21 }
 0x4e8   :  { %4512 = vmatmul.msk.f32.gmra.mxu3 %vm2755_vm0, %v2731_v15  ;;  %v777_v57 = vpop.permute.xlu2 %776 }
 0x4e9   :  { %v1702_v55 = vadd.f32 %v1574_v54, %v932_v11  ;;  %v3478_v26 = vpop.f32.mrf.mxu3  ;;  %v935_v63 = vmul.f32 %v7429_v16, %v777_v57  ;;  %v3470_v54 = vadd.f32 %v7391_v2, %v3469_v5 }
 0x4eb   :  { %v2472_v7 = vadd.f32 %v2344_v49, %v1702_v55  ;;  %v782_v49 = vpop.permute.xlu0 %781  ;;  %v3646_v55 = vmax.f32 %v3473_v58, 0.0  ;;  %v3359_v58 = vadd.f32 %v7391_v2, %v6699_v60 }
 0x4ed   :  { %v2604_v41 = vadd.f32 %v7468_v62, %v2472_v7  ;;  %v3479_v7 = vadd.f32 %v7391_v2, %v3478_v26 }
 0x4ee   :  { %v767_v50 = vpop.permute.xlu1 %766 }
 0x4ef   :  { %v2732_v20 = vmax.f32 %v2604_v41, 0.0  ;;  %v933_v47 = vmul.f32 %v7429_v16, %v767_v50  ;;  %v3645_v50 = vmax.f32 %v3470_v54, 0.0 }
 0x4f1   :  { %v3442_v14 = vpop.f32.mrf.mxu2  ;;  %4513 = vmatmul.msk.f32.gmra.mxu3 %vm2755_vm0, %v2732_v20  ;;  %v1703_v28 = vadd.f32 %v1575_v22, %v933_v47  ;;  %v2196_v29 = vpop.permute.xlu2 %2195  ;;  %v3944_v47 = vsel %vm3669_vm1, %v3646_v55, -inf }
 0x4f2   :  { %v3443_v33 = vadd.f32 %v7391_v2, %v3442_v14  ;;  %v2347_v15 = vmul.f32 %v7382_v0, %v2196_v29  ;;  %v3647_v14 = vmax.f32 %v3476_v37, 0.0 }
 0x4f4   :  { %v3636_v3 = vmax.f32 %v3443_v33, 0.0  ;;  %v936_v33 = vmul.f32 %v7429_v16, %v782_v49 }
 0x4f6   :  { %v3914_v51 = vsel %vm3669_vm1, %v3636_v3, -inf  ;;  %v3648_v3 = vmax.f32 %v3479_v7, 0.0 }
 0x4f7   :  { %v7538_v8 = vmax.f32 %v3913_v4, %v3914_v51  ;;  %v2188_v36 = vpop.permute.xlu1 %2187 }
 0x4f8   :  { %v2345_v59 = vmul.f32 %v7382_v0, %v2188_v36  ;;  %v3943_v36 = vsel %vm3669_vm1, %v3645_v50, -inf  ;;  %v3948_v21 = vsel %vm3669_vm1, %v3648_v3, -inf  ;;  %v3452_v50 = vadd.f32 %v7391_v2, %v7475_v10 }
 0x4f9   :  { %v2200_v23 = vpop.permute.xlu2 %2199  ;;  %v3945_v29 = vmax.f32 %v3943_v36, %v3944_v47 }
 0x4fa   :  { %v2473_v24 = vadd.f32 %v2345_v59, %v1703_v28  ;;  %v3946_v28 = vsel %vm3669_vm1, %v3647_v14, -inf  ;;  %v2348_v1 = vmul.f32 %v7382_v0, %v2200_v23  ;;  %v3356_v23 = vadd.f32 %v7391_v2, %v6692_v45 }
 0x4fb   :  { %v3947_v38 = vmax.f32 %v3945_v29, %v3946_v28  ;;  %v3639_v28 = vmax.f32 %v3452_v50, 0.0  ;;  %v3895_v50 = vrot.slane %v7196_v18, 4 }
 0x4fc   :  { %v2605_v19 = vadd.f32 %v7468_v62, %v2473_v24  ;;  %v3481_v11 = vpop.f32.mrf.mxu3  ;;  %v3607_v49 = vmax.f32 %v3356_v23, 0.0 }
 0x4fd   :  { %v3482_v57 = vadd.f32 %v7391_v2, %v3481_v11 }
 0x4fe   :  { %v2733_v39 = vmax.f32 %v2605_v19, 0.0  ;;  %v3841_v3 = vsel %vm3669_vm1, %v3607_v49, -inf }
 0x4ff   :  { %v2192_v32 = vpop.permute.xlu1 %2191  ;;  %v3649_v59 = vmax.f32 %v3482_v57, 0.0 }
 0x500   :  { %v2346_v17 = vmul.f32 %v7382_v0, %v2192_v32  ;;  %4514 = vmatmul.msk.f32.gmra.mxu3 %vm2755_vm0, %v2733_v39  ;;  %v3349_v32 = vpop.f32.mrf.mxu1 }
 0x501   :  { %v3350_v55 = vadd.f32 %v7391_v2, %v3349_v32 }
 0x502   :  { %v2474_v48 = vadd.f32 %v2346_v17, %v1704_v31  ;;  %v1434_v20 = vpop.permute.xlu2 %1433  ;;  %v3950_v31 = vsel %vm3669_vm1, %v3649_v59, -inf }
 0x504   :  { %v2606_v42 = vadd.f32 %v7468_v62, %v2474_v48  ;;  %v2204_v48 = vpop.permute.xlu0 %2203 }
 0x506   :  { %v2734_v4 = vmax.f32 %v2606_v42, 0.0  ;;  %v3949_v42 = vmax.f32 %v3947_v38, %v3948_v21 }
 0x508   :  { %4515 = vmatmul.msk.f32.gmra.mxu3 %vm2755_vm0, %v2734_v4  ;;  %v1426_v25 = vpop.permute.xlu1 %1425  ;;  %v1579_v4 = vmul.f32 %v7436_v6, %v1434_v20  ;;  %v7575_v37 = vmax.f32 %v3949_v42, %v3950_v31  ;;  %v3362_v20 = vadd.f32 %v7391_v2, %v6718_v52  ;;  %v3458_v52 = vadd.f32 %v7391_v2, %v7499_v53 }
 0x509   :  { %v1577_v30 = vmul.f32 %v7436_v6, %v1426_v25  ;;  %v3368_v53 = vadd.f32 %v7391_v2, %v6761_v27  ;;  %v3467_v27 = vadd.f32 %v7391_v2, %v7525_v56 }
 0x50a   :  { %v7571_v25 = vpop.permute.xlu2 %1437 }
 0x50b   :  { %v1705_v13 = vadd.f32 %v1577_v30, %v935_v63  ;;  %v3445_v19 = vpop.f32.mrf.mxu2  ;;  %v1580_v56 = vmul.f32 %v7436_v6, %v7571_v25 }
 0x50c   :  { %v3446_v11 = vadd.f32 %v7391_v2, %v3445_v19  ;;  %v3461_v19 = vadd.f32 %v7391_v2, %v7508_v35  ;;  %v3464_v35 = vadd.f32 %v7391_v2, %v7517_v34  ;;  %v3874_v34 = vrot.slane %v6952_v9, 4 }
 0x50d   :  { %v2475_v41 = vadd.f32 %v2347_v15, %v1705_v13  ;;  %v2349_v13 = vmul.f32 %v7382_v0, %v2204_v48 }
 0x50f   :  { %v2607_v5 = vadd.f32 %v7468_v62, %v2475_v41  ;;  %v3608_v41 = vmax.f32 %v3359_v58, 0.0 }
 0x510   :  { %v1430_v12 = vpop.permute.xlu1 %1429 }
 0x511   :  { %v1578_v22 = vmul.f32 %v7436_v6, %v1430_v12  ;;  %v2735_v51 = vmax.f32 %v2607_v5, 0.0  ;;  %v3637_v5 = vmax.f32 %v3446_v11, 0.0  ;;  %v3843_v10 = vsel %vm3669_vm1, %v3608_v41, -inf }
 0x512   :  { %v3371_v11 = vadd.f32 %v7391_v2, %v6773_v40 }
 0x513   :  { %v1706_v24 = vadd.f32 %v1578_v22, %v936_v33  ;;  %4516 = vmatmul.msk.f32.gmra.mxu3 %vm2755_vm0, %v2735_v51  ;;  %v3455_v33 = vadd.f32 %v7391_v2, %v7490_v44  ;;  %v3605_v22 = vmax.f32 %v3350_v55, 0.0  ;;  %v3609_v44 = vmax.f32 %v3362_v20, 0.0 }
 0x514   :  { %v3644_v20 = vmax.f32 %v3467_v27, 0.0 }
 0x515   :  { %v2476_v61 = vadd.f32 %v2348_v1, %v1706_v24  ;;  %v3365_v24 = vadd.f32 %v7391_v2, %v6739_v43  ;;  %v3640_v38 = vmax.f32 %v3455_v33, 0.0  ;;  %v3838_v31 = vsel %vm3669_vm1, %v3605_v22, -inf }
 0x516   :  { %v3484_v39 = vpop.f32.mrf.mxu3  ;;  %v3925_v43 = vsel %vm3669_vm1, %v3639_v28, -inf  ;;  %v3845_v42 = vsel %vm3669_vm1, %v3609_v44, -inf  ;;  %v3875_v28 = vmax.f32 %v6952_v9, %v3874_v34  ;;  %v3896_v44 = vmax.f32 %v7196_v18, %v3895_v50 }
 0x517   :  { %v3485_v17 = vadd.f32 %v7391_v2, %v3484_v39  ;;  %v2608_v26 = vadd.f32 %v7468_v62, %v2476_v61  ;;  %v797_v61 = vpop.permute.xlu2 %796  ;;  %v3922_v39 = vsel %vm3669_vm1, %v3637_v5, -inf }
 0x519   :  { %v3650_v63 = vmax.f32 %v3485_v17, 0.0  ;;  %v787_v30 = vpop.permute.xlu1 %786  ;;  %v2736_v54 = vmax.f32 %v2608_v26, 0.0  ;;  %v3641_v26 = vmax.f32 %v3458_v52, 0.0 }
 0x51a   :  { %v937_v15 = vmul.f32 %v7429_v16, %v787_v30  ;;  %v3642_v30 = vmax.f32 %v3461_v19, 0.0  ;;  %v939_v19 = vmul.f32 %v7429_v16, %v797_v61 }
 0x51b   :  { %v7581_v45 = vsel %vm3669_vm1, %v3650_v63, -inf  ;;  %4517 = vmatmul.msk.f32.gmra.mxu3 %vm2755_vm0, %v2736_v54  ;;  %v3927_v63 = vsel %vm3669_vm1, %v3640_v38, -inf  ;;  %v3929_v55 = vsel %vm3669_vm1, %v3641_v26, -inf  ;;  %v3897_v26 = vrot.slane %v3896_v44, 2 }
 0x51c   :  { %v3953_v60 = vmax.f32 %v7575_v37, %v7581_v45  ;;  %v1707_v7 = vadd.f32 %v1579_v4, %v937_v15  ;;  %v3610_v4 = vmax.f32 %v3365_v24, 0.0  ;;  %v3931_v5 = vsel %vm3669_vm1, %v3642_v30, -inf }
 0x51d   :  { %v3935_v24 = vsel %vm3669_vm1, %v3644_v20, -inf }
 0x51e   :  { %v2477_v14 = vadd.f32 %v2349_v13, %v1707_v7  ;;  %v3448_v57 = vpop.f32.mrf.mxu2  ;;  %v3611_v13 = vmax.f32 %v3368_v53, 0.0  ;;  %v3643_v7 = vmax.f32 %v3464_v35, 0.0 }
 0x51f   :  { %v3449_v12 = vadd.f32 %v7391_v2, %v3448_v57  ;;  %v3352_v47 = vpop.f32.mrf.mxu1 }
 0x520   :  { %v2609_v51 = vadd.f32 %v7468_v62, %v2477_v14  ;;  %v3353_v36 = vadd.f32 %v7391_v2, %v3352_v47  ;;  %v3916_v14 = vrot.slane %v7538_v8, 4  ;;  %v3849_v22 = vsel %vm3669_vm1, %v3611_v13, -inf }
 0x521   :  { %v3638_v59 = vmax.f32 %v3449_v12, 0.0  ;;  %v792_v1 = vpop.permute.xlu1 %791  ;;  %v3933_v52 = vsel %vm3669_vm1, %v3643_v7, -inf  ;;  %v3898_v13 = vmax.f32 %v3896_v44, %v3897_v26 }
 0x522   :  { %v2737_v29 = vmax.f32 %v2609_v51, 0.0  ;;  %v3606_v21 = vmax.f32 %v3353_v36, 0.0  ;;  %v938_v15 = vmul.f32 %v7429_v16, %v792_v1  ;;  %v3612_v51 = vmax.f32 %v3371_v11, 0.0  ;;  %v1442_v36 = vpop.permute.xlu0 %1441 }
 0x523   :  { %v3923_v32 = vsel %vm3669_vm1, %v3638_v59, -inf }
 0x524   :  { %v3924_v17 = vmax.f32 %v3922_v39, %v3923_v32  ;;  %v3839_v48 = vsel %vm3669_vm1, %v3606_v21, -inf  ;;  %4518 = vmatmul.msk.f32.gmra.mxu3 %vm2755_vm0, %v2737_v29  ;;  %v1708_v12 = vadd.f32 %v1580_v56, %v938_v15  ;;  %v3917_v29 = vmax.f32 %v7538_v8, %v3916_v14 }
 0x525   :  { %v3840_v23 = vmax.f32 %v3838_v31, %v3839_v48  ;;  %v1581_v39 = vmul.f32 %v7436_v6, %v1442_v36  ;;  %v3851_v9 = vsel %vm3669_vm1, %v3612_v51, -inf }
 0x526   :  { %v3926_v58 = vmax.f32 %v3924_v17, %v3925_v43  ;;  %v3876_v17 = vrot.slane %v3875_v28, 2  ;;  %v3918_v35 = vrot.slane %v3917_v29, 2 }
 0x527   :  { %v3842_v54 = vmax.f32 %v3840_v23, %v3841_v3  ;;  %v3847_v3 = vsel %vm3669_vm1, %v3610_v4, -inf  ;;  %v1709_v4 = vadd.f32 %v1581_v39, %v939_v19 }
 0x528   :  { %v3928_v49 = vmax.f32 %v3926_v58, %v3927_v63  ;;  %v3877_v63 = vmax.f32 %v3875_v28, %v3876_v17 }
 0x529   :  { %v3844_v41 = vmax.f32 %v3842_v54, %v3843_v10  ;;  %v802_v10 = vpop.permute.xlu2 %801 }
 0x52a   :  { %v3930_v57 = vmax.f32 %v3928_v49, %v3929_v55  ;;  %v2208_v33 = vpop.permute.xlu1 %2207  ;;  %v3919_v55 = vmax.f32 %v3917_v29, %v3918_v35  ;;  %v3878_v20 = vrot.slane %v3877_v63, 1  ;;  %v940_v45 = vmul.f32 %v7429_v16, %v802_v10  ;;  %v807_v44 = vpop.permute.xlu0 %806 }
 0x52b   :  { %v3846_v40 = vmax.f32 %v3844_v41, %v3845_v42  ;;  %v2350_v47 = vmul.f32 %v7382_v0, %v2208_v33 }
 0x52c   :  { %v3932_v25 = vmax.f32 %v3930_v57, %v3931_v5  ;;  %v3899_v5 = vrot.slane %v3898_v13, 1 }
 0x52d   :  { %v3848_v59 = vmax.f32 %v3846_v40, %v3847_v3  ;;  %v2478_v1 = vadd.f32 %v2350_v47, %v1708_v12  ;;  %v3920_v40 = vrot.slane %v3919_v55, 1 }
 0x52e   :  { %v3934_v21 = vmax.f32 %v3932_v25, %v3933_v52  ;;  %v3900_v36 = vmax.f32 %v3898_v13, %v3899_v5 }
 0x52f   :  { %v3850_v38 = vmax.f32 %v3848_v59, %v3849_v22  ;;  %v2610_v32 = vadd.f32 %v7468_v62, %v2478_v1  ;;  %v3879_v22 = vmax.f32 %v3877_v63, %v3878_v20  ;;  %v3921_v1 = vmax.f32 %v3919_v55, %v3920_v40 }
 0x530   :  { %v3936_v53 = vmax.f32 %v3934_v21, %v3935_v24  ;;  %v3487_v31 = vpop.f32.mrf.mxu3 }
 0x531   :  { %v3852_v48 = vmax.f32 %v3850_v38, %v3851_v9  ;;  %v2738_v43 = vmax.f32 %v2610_v32, 0.0  ;;  %v3488_v18 = vadd.f32 %v7391_v2, %v3487_v31  ;;  %v2216_v34 = vpop.permute.xlu2 %2215 }
 0x532   :  { %v3937_v8 = vrot.slane %v3936_v53, 4  ;;  %v2212_v23 = vpop.permute.xlu1 %2211  ;;  %v2352_v28 = vmul.f32 %v7382_v0, %v2216_v34 }
 0x533   :  { %v3853_v42 = vrot.slane %v3852_v48, 4  ;;  %v3651_v61 = vmax.f32 %v3488_v18, 0.0  ;;  %v2351_v27 = vmul.f32 %v7382_v0, %v2212_v23  ;;  %4519 = vmatmul.msk.f32.gmra.mxu3 %vm2755_vm0, %v2738_v43  ;;  %v7666_v23 = vld [vmem:[%s7800_s7] ss:$0 sm:$0xff] }
 0x534   :  { %v3938_v58 = vmax.f32 %v3936_v53, %v3937_v8  ;;  %v941_v53 = vmul.f32 %v7429_v16, %v807_v44  ;;  %v4807_v44 = vld [vmem:[%s7799_s6] sm:$0xff] }
 0x535   :  { %v3854_v30 = vmax.f32 %v3852_v48, %v3853_v42  ;;  %v3954_v54 = vsel %vm3669_vm1, %v3651_v61, -inf  ;;  %v2479_v15 = vadd.f32 %v2351_v27, %v1709_v4 }
 0x536   :  { %v3955_v11 = vmax.f32 %v3953_v60, %v3954_v54  ;;  %v3939_v49 = vrot.slane %v3938_v58, 2  ;;  %v2224_v54 = vpop.permute.xlu0 %2223 }
 0x537   :  { %v3855_v7 = vrot.slane %v3854_v30, 2  ;;  %v2611_v56 = vadd.f32 %v7468_v62, %v2479_v15 }
 0x538   :  { %v3490_v41 = vpop.f32.mrf.mxu3  ;;  %v3940_v50 = vmax.f32 %v3938_v58, %v3939_v49  ;;  %v4072_v58 = vpop.f32.mrf.mxu1 }
 0x539   :  { %v3856_v14 = vmax.f32 %v3854_v30, %v3855_v7  ;;  %v2739_v57 = vmax.f32 %v2611_v56, 0.0  ;;  %v3491_v33 = vadd.f32 %v7391_v2, %v3490_v41  ;;  %v2220_v21 = vpop.permute.xlu2 %2219  ;;  %v4073_v13 = vadd.f32 %v7666_v23, %v4072_v58 }
 0x53a   :  { %v3941_v3 = vrot.slane %v3940_v50, 1  ;;  %v2353_v35 = vmul.f32 %v7382_v0, %v2220_v21  ;;  %v2354_v41 = vmul.f32 %v7382_v0, %v2224_v54 }
 0x53b   :  { %v3857_v12 = vrot.slane %v3856_v14, 1  ;;  %v3652_v47 = vmax.f32 %v3491_v33, 0.0  ;;  %4520 = vmatmul.msk.f32.gmra.mxu3 %vm2755_vm0, %v2739_v57  ;;  %v1446_v37 = vpop.permute.xlu1 %1445 }
 0x53c   :  { %v1582_v60 = vmul.f32 %v7436_v6, %v1446_v37  ;;  %v3942_v10 = vmax.f32 %v3940_v50, %v3941_v3 }
 0x53d   :  { %v3956_v51 = vsel %vm3669_vm1, %v3652_v47, -inf  ;;  %v3858_v25 = vmax.f32 %v3856_v14, %v3857_v12  ;;  %v4108_v14 = vpop.f32.mrf.mxu2 }
 0x53e   :  { %v3957_v52 = vmax.f32 %v3955_v11, %v3956_v51  ;;  %v1710_v59 = vadd.f32 %v1582_v60, %v940_v45  ;;  %v7674_v11 = vld [vmem:[%s7801_s8] ss:$0 sm:$0xff] }
 0x53f   :  { %v4044_v24 = vsel %vm4030_vm2, %v3879_v22, %v3858_v25  ;;  %v7684_v50 = vadd.f32 %v7674_v11, %v4073_v13 }
 0x540   :  { %v3958_v29 = vrot.slane %v3957_v52, 4  ;;  %v2480_v38 = vadd.f32 %v2352_v28, %v1710_v59  ;;  %v4045_v19 = vsel %vm4032_vm3, %v3900_v36, %v4044_v24  ;;  %v4805_v36 = vld [vmem:[%s7799_s6 + $0x10] sm:$0xff]  ;;  %v4806_v59 = vld [vmem:[%s7799_s6 + $0x8] sm:$0xff] }
 0x541   :  { %v4046_v39 = vsel %vm4034_vm4, %v3921_v1, %v4045_v19  ;;  %v3493_v4 = vpop.f32.mrf.mxu3  ;;  %v1454_v27 = vpop.permute.xlu2 %1453  ;;  %v4111_v47 = vadd.f32 %v4108_v14, %v7684_v50 }
 0x542   :  { %v3959_v32 = vmax.f32 %v3957_v52, %v3958_v29  ;;  %v2612_v9 = vadd.f32 %v7468_v62, %v2480_v38  ;;  %v4047_v31 = vsel %vm4036_vm5, %v3942_v10, %v4046_v39  ;;  %v1584_v15 = vmul.f32 %v7436_v6, %v1454_v27 }
 0x543   :  { %v1450_v17 = vpop.permute.xlu1 %1449  ;;  %v3494_v7 = vadd.f32 %v7391_v2, %v3493_v4  ;;  %4733 = vtanh.f32 %v4111_v47 }
 0x544   :  { %v3960_v48 = vrot.slane %v3959_v32, 2  ;;  %v2740_v43 = vmax.f32 %v2612_v9, 0.0  ;;  %v1583_v18 = vmul.f32 %v7436_v6, %v1450_v17 }
 0x545   :  { %v3653_v57 = vmax.f32 %v3494_v7, 0.0 }
 0x546   :  { %v3961_v26 = vmax.f32 %v3959_v32, %v3960_v48  ;;  %v1711_v8 = vadd.f32 %v1583_v18, %v941_v53  ;;  %4521 = vmatmul.msk.f32.gmra.mxu3 %vm2755_vm0, %v2740_v43 }
 0x548   :  { %v3962_v42 = vrot.slane %v3961_v26, 1  ;;  %v2481_v61 = vadd.f32 %v2353_v35, %v1711_v8 }
 0x549   :  { %v4734_v25 = vpop.eup %4733 }
 0x54a   :  { %v3963_v63 = vmax.f32 %v3961_v26, %v3962_v42  ;;  %v2613_v30 = vadd.f32 %v7468_v62, %v2481_v61 }
 0x54c   :  { %v2741_v34 = vmax.f32 %v2613_v30, 0.0  ;;  %v812_v49 = vpop.permute.xlu1 %811  ;;  %v7677_v55 = vsel %vm4038_vm6, %v3963_v63, %v4047_v31 }
 0x54d   :  { %v942_v56 = vmul.f32 %v7429_v16, %v812_v49  ;;  %v3964_v16 = vsel %vm3669_vm1, %v3653_v57, -inf }
 0x54e   :  { %4522 = vmatmul.msk.f32.gmra.mxu3 %vm2755_vm0, %v2741_v34 }
 0x54f   :  { %v1712_v6 = vadd.f32 %v1584_v15, %v942_v56 }
 0x550   :  { %v3496_v20 = vpop.f32.mrf.mxu3 }
 0x551   :  { %v2482_v33 = vadd.f32 %v2354_v41, %v1712_v6  ;;  %v3497_v5 = vadd.f32 %v7391_v2, %v3496_v20 }
 0x553   :  { %v2614_v40 = vadd.f32 %v7468_v62, %v2482_v33  ;;  %v3654_v12 = vmax.f32 %v3497_v5, 0.0 }
 0x555   :  { %v2742_v0 = vmax.f32 %v2614_v40, 0.0  ;;  %v3965_v37 = vsel %vm3669_vm1, %v3654_v12, -inf }
 0x556   :  { %v3966_v45 = vmax.f32 %v3964_v16, %v3965_v37 }
 0x557   :  { %4523 = vmatmul.msk.f32.gmra.mxu3 %vm2755_vm0, %v2742_v0 }
 0x558   :  { %v3499_v60 = vpop.f32.mrf.mxu3 }
 0x559   :  { %v3500_v3 = vadd.f32 %v7391_v2, %v3499_v60 }
 0x55b   :  { %v3655_v22 = vmax.f32 %v3500_v3, 0.0 }
 0x55d   :  { %v3967_v51 = vsel %vm3669_vm1, %v3655_v22, -inf }
 0x55e   :  { %v3968_v62 = vmax.f32 %v3966_v45, %v3967_v51 }
 0x55f   :  { %4526 = vmatmul.msk.f32.vlgmr.msrb.gmra.mxu3 %vm3669_vm1, %v4734_v25 }
 0x560   :  { %4269 = vmatpush.msrb.mxu3 %v7410_v46 }
 0x562   :  { %4270 = vmatpush.msrb.mxu3 %v4805_v36 }
 0x563   :  { %v3502_v28 = vpop.f32.mrf.mxu3 }
 0x564   :  { %v3503_v52 = vadd.f32 %v7391_v2, %v3502_v28  ;;  %4271 = vmatpush.msrb.mxu3 %v4806_v59 }
 0x566   :  { %v3656_v1 = vmax.f32 %v3503_v52, 0.0  ;;  %4272 = vmatpush.msrb.mxu3 %v4807_v44 }
 0x568   :  { %v3969_v46 = vsel %vm3669_vm1, %v3656_v1, -inf }
 0x569   :  { %v3970_v24 = vmax.f32 %v3968_v62, %v3969_v46 }
 0x56b   :  { %v3505_v29 = vpop.f32.mrf.mxu3 }
 0x56c   :  { %v3506_v21 = vadd.f32 %v7391_v2, %v3505_v29 }
 0x56e   :  { %v3657_v38 = vmax.f32 %v3506_v21, 0.0 }
 0x570   :  { %v3971_v10 = vsel %vm3669_vm1, %v3657_v38, -inf }
 0x571   :  { %v3972_v19 = vmax.f32 %v3970_v24, %v3971_v10 }
 0x574   :  { %v3508_v39 = vpop.f32.mrf.mxu3 }
 0x575   :  { %v3509_v32 = vadd.f32 %v7391_v2, %v3508_v39 }
 0x577   :  { %v3658_v9 = vmax.f32 %v3509_v32, 0.0 }
 0x579   :  { %v3973_v53 = vsel %vm3669_vm1, %v3658_v9, -inf }
 0x57a   :  { %v3974_v31 = vmax.f32 %v3972_v19, %v3973_v53 }
 0x583   :  { %v3511_v17 = vpop.f32.mrf.mxu3 }
 0x584   :  { %v3512_v48 = vadd.f32 %v7391_v2, %v3511_v17 }
 0x586   :  { %v3659_v43 = vmax.f32 %v3512_v48, 0.0 }
 0x588   :  { %v3975_v18 = vsel %vm3669_vm1, %v3659_v43, -inf }
 0x589   :  { %v3976_v26 = vmax.f32 %v3974_v31, %v3975_v18 }
 0x58b   :  { %v3514_v35 = vpop.f32.mrf.mxu3 }
 0x58c   :  { %v3515_v8 = vadd.f32 %v7391_v2, %v3514_v35 }
 0x58e   :  { %v3660_v42 = vmax.f32 %v3515_v8, 0.0 }
 0x590   :  { %v3977_v4 = vsel %vm3669_vm1, %v3660_v42, -inf }
 0x591   :  { %v3978_v61 = vmax.f32 %v3976_v26, %v3977_v4 }
 0x593   :  { %v3979_v27 = vrot.slane %v3978_v61, 4 }
 0x595   :  { %v3980_v58 = vmax.f32 %v3978_v61, %v3979_v27 }
 0x596   :  { %v3517_v15 = vpop.f32.mrf.mxu3 }
 0x597   :  { %v3981_v63 = vrot.slane %v3980_v58, 2  ;;  %v3518_v14 = vadd.f32 %v7391_v2, %v3517_v15 }
 0x599   :  { %v3982_v30 = vmax.f32 %v3980_v58, %v3981_v63  ;;  %v3661_v40 = vmax.f32 %v3518_v14, 0.0 }
 0x59b   :  { %v3983_v54 = vrot.slane %v3982_v30, 1  ;;  %v3985_v45 = vsel %vm3669_vm1, %v3661_v40, -inf }
 0x59d   :  { %v3984_v13 = vmax.f32 %v3982_v30, %v3983_v54 }
 0x59e   :  { %v3520_v49 = vpop.f32.mrf.mxu3 }
 0x59f   :  { %v4049_v34 = vsel %vm4040_vm7, %v3984_v13, %v7677_v55  ;;  %v3521_v6 = vadd.f32 %v7391_v2, %v3520_v49 }
 0x5a1   :  { %v3662_v33 = vmax.f32 %v3521_v6, 0.0 }
 0x5a3   :  { %v3986_v55 = vsel %vm3669_vm1, %v3662_v33, -inf }
 0x5a4   :  { %v3987_v51 = vmax.f32 %v3985_v45, %v3986_v55  ;;  %v4313_v55 = vld [vmem:[%s7802_s9 + $0x10] sm:$0xff] }
 0x5a5   :  { %v4350_v45 = vld [vmem:[%s7804_s11 + $0x30] sm:$0xff] }
 0x5a7   :  { %v3523_v7 = vpop.f32.mrf.mxu3 }
 0x5a8   :  { %v3524_v57 = vadd.f32 %v7391_v2, %v3523_v7 }
 0x5aa   :  { %v3663_v12 = vmax.f32 %v3524_v57, 0.0 }
 0x5ac   :  { %v3988_v60 = vsel %vm3669_vm1, %v3663_v12, -inf }
 0x5ad   :  { %v3989_v36 = vmax.f32 %v3987_v51, %v3988_v60  ;;  %v4349_v60 = vld [vmem:[%s7804_s11 + $0x28] sm:$0xff] }
 0x5b6   :  { %v3526_v56 = vpop.f32.mrf.mxu3 }
 0x5b7   :  { %v3527_v5 = vadd.f32 %v7391_v2, %v3526_v56 }
 0x5b9   :  { %v3664_v16 = vmax.f32 %v3527_v5, 0.0 }
 0x5bb   :  { %v3990_v25 = vsel %vm3669_vm1, %v3664_v16, -inf  ;;  %v4312_v16 = vld [vmem:[%s7802_s9 + $0x8] sm:$0xff] }
 0x5bc   :  { %v3991_v59 = vmax.f32 %v3989_v36, %v3990_v25 }
 0x5be   :  { %v3529_v41 = vpop.f32.mrf.mxu3 }
 0x5bf   :  { %v3530_v47 = vadd.f32 %v7391_v2, %v3529_v41 }
 0x5c1   :  { %v3665_v3 = vmax.f32 %v3530_v47, 0.0  ;;  %v4314_v47 = vld [vmem:[%s7802_s9 + $0x18] sm:$0xff] }
 0x5c3   :  { %v3992_v28 = vsel %vm3669_vm1, %v3665_v3, -inf  ;;  %v4348_v3 = vld [vmem:[%s7804_s11 + $0x20] sm:$0xff] }
 0x5c4   :  { %v3993_v44 = vmax.f32 %v3991_v59, %v3992_v28  ;;  %v4345_v59 = vld [vmem:[%s7804_s11 + $0x8] sm:$0xff] }
 0x5c9   :  { %v3532_v20 = vpop.f32.mrf.mxu3 }
 0x5ca   :  { %v3533_v0 = vadd.f32 %v7391_v2, %v3532_v20 }
 0x5cc   :  { %v3666_v62 = vmax.f32 %v3533_v0, 0.0  ;;  %v4311_v0 = vld [vmem:[%s7802_s9] sm:$0xff] }
 0x5ce   :  { %v3994_v1 = vsel %vm3669_vm1, %v3666_v62, -inf }
 0x5cf   :  { %v3995_v21 = vmax.f32 %v3993_v44, %v3994_v1  ;;  %v4344_v1 = vld [vmem:[%s7804_s11] sm:$0xff] }
 0x5d0   :  { %v4731_v44 = vld [vmem:[%s7803_s10] ss:$0 sm:$0xff] }
 0x5d1   :  { %v3535_v37 = vpop.f32.mrf.mxu3 }
 0x5d2   :  { %v3536_v22 = vadd.f32 %v7391_v2, %v3535_v37  ;;  %v4351_v37 = vld [vmem:[%s7804_s11 + $0x38] sm:$0xff] }
 0x5d4   :  { %v3667_v52 = vmax.f32 %v3536_v22, 0.0  ;;  %v4347_v22 = vld [vmem:[%s7804_s11 + $0x18] sm:$0xff] }
 0x5d6   :  { %v3996_v24 = vsel %vm3669_vm1, %v3667_v52, -inf  ;;  %v4346_v52 = vld [vmem:[%s7804_s11 + $0x10] sm:$0xff]  ;;  %s4387_s11 = sshll.u32 %s7806_s13, 4  ;;  %s4388_s11 = int_to_ptr.hbm [resolvable:$true] %s4387_s11 }
 0x5d7   :  { %v3997_v10 = vmax.f32 %v3995_v21, %v3996_v24  ;;  %v4732_v21 = vld [vmem:[%s7805_s12] ss:$0 sm:$0xff] }
 0x5da   :  { %v3538_v46 = vpop.f32.mrf.mxu3 }
 0x5db   :  { %v3539_v29 = vadd.f32 %v7391_v2, %v3538_v46 }
 0x5dd   :  { %v3668_v38 = vmax.f32 %v3539_v29, 0.0 }
 0x5df   :  { %v3998_v19 = vsel %vm3669_vm1, %v3668_v38, -inf }
 0x5e0   :  { %v3999_v39 = vmax.f32 %v3997_v10, %v3998_v19 }
 0x5e2   :  { %v4000_v32 = vrot.slane %v3999_v39, 4  ;;  %v4133_v9 = vpop.f32.mrf.mxu3 }
 0x5e3   :  { %v4137_v53 = vrot.slane %v4133_v9, 6 }
 0x5e4   :  { %v4001_v31 = vmax.f32 %v3999_v39, %v4000_v32 }
 0x5e5   :  { %v4139_v17 = vadd.f32 %v4137_v53, %v7684_v50 }
 0x5e6   :  { %v4002_v48 = vrot.slane %v4001_v31, 2 }
 0x5e7   :  { %4735 = vtanh.f32 %v4139_v17 }
 0x5e8   :  { %v4003_v43 = vmax.f32 %v4001_v31, %v4002_v48 }
 0x5ea   :  { %v4004_v18 = vrot.slane %v4003_v43, 1 }
 0x5ec   :  { %v4005_v26 = vmax.f32 %v4003_v43, %v4004_v18 }
 0x5ed   :  { %v4736_v35 = vpop.eup %4735 }
 0x5ee   :  { %v4142_v8 = vrot.slane %v4736_v35, 2  ;;  %v4050_v2 = vsel %vm4042_vm8, %v4005_v26, %v4049_v34 }
 0x5ef   :  { %4525 = vmatmul.msk.f32.gmra.mxu1 %vm3669_vm1, %v4050_v2 }
 0x5f0   :  { %4527 = vmatmul.msk.f32.vlgmr.msra.gmra.mxu2 %vm3669_vm1, %v4142_v8 }
 0x5f1   :  { %4335 = vmatpush.msra.mxu2 %v4314_v47 }
 0x5f3   :  { %4336 = vmatpush.msra.mxu2 %v4313_v55 }
 0x5f5   :  { %4337 = vmatpush.msra.mxu2 %v4312_v16 }
 0x5f7   :  { %4338 = vmatpush.msra.mxu2 %v4311_v0 }
 0x66c   :  { %v4075_v34 = vpop.f32.mrf.mxu1 }
 0x66d   :  { %v4076_v49 = vadd.f32 %v7666_v23, %v4075_v34 }
 0x66f   :  { %v4083_v7 = vadd.f32 %v7674_v11, %v4076_v49 }
 0x673   :  { %v4162_v42 = vpop.f32.mrf.mxu2 }
 0x674   :  { %v4166_v4 = vrot.slane %v4162_v42, 4 }
 0x676   :  { %v4168_v61 = vadd.f32 %v4166_v4, %v7684_v50 }
 0x678   :  { %4737 = vtanh.f32 %v4168_v61 }
 0x67e   :  { %v4738_v27 = vpop.eup %4737 }
 0x67f   :  { %v4171_v58 = vrot.slane %v4738_v27, 4 }
 0x681   :  { %4528 = vmatmul.msk.f32.vlgmr.msra.gmra.mxu3 %vm3669_vm1, %v4171_v58 }
 0x682   :  { %4367 = vmatpush.msra.mxu3 %v4351_v37 }
 0x684   :  { %4368 = vmatpush.msra.mxu3 %v4350_v45 }
 0x686   :  { %4369 = vmatpush.msra.mxu3 %v4349_v60 }
 0x688   :  { %4370 = vmatpush.msra.mxu3 %v4348_v3 }
 0x68a   :  { %4371 = vmatpush.msra.mxu3 %v4347_v22 }
 0x68c   :  { %4372 = vmatpush.msra.mxu3 %v4346_v52 }
 0x68e   :  { %4373 = vmatpush.msra.mxu3 %v4345_v59 }
 0x690   :  { %4374 = vmatpush.msra.mxu3 %v4344_v1 }
 0x704   :  { %v4191_v63 = vpop.f32.mrf.mxu3 }
 0x705   :  { %v4195_v30 = vrot.slane %v4191_v63, 2 }
 0x707   :  { %v4197_v54 = vadd.f32 %v4195_v30, %v7684_v50 }
 0x709   :  { %4739 = vtanh.f32 %v4197_v54 }
 0x70f   :  { %v4740_v15 = vpop.eup %4739 }
 0x710   :  { %v4200_v13 = vrot.slane %v4740_v15, 6 }
 0x712   :  { %4529 = vmatmul.msk.f32.vlgmr.msra.gmra.mxu1 %vm3669_vm1, %v4200_v13 }
 0x78f   :  { %v4220_v56 = vpop.f32.mrf.mxu1 }
 0x790   :  { %v4223_v41 = vadd.f32 %v4220_v56, %v4083_v7 }
 0x792   :  { %4741 = vtanh.f32 %v4223_v41 }
 0x798   :  { %v4742_v6 = vpop.eup %4741 }
 0x799   :  { %4530 = vmatmul.msk.f32.vlgmr.msrb.gmra.mxu2 %vm3669_vm1, %v4742_v6 }
 0x81c   :  { %v4245_v20 = vpop.f32.mrf.mxu2 }
 0x81d   :  { %v4249_v14 = vrot.slane %v4245_v20, 6 }
 0x81f   :  { %v4251_v57 = vadd.f32 %v4249_v14, %v4083_v7 }
 0x821   :  { %4743 = vtanh.f32 %v4251_v57 }
 0x827   :  { %v4744_v50 = vpop.eup %4743 }
 0x828   :  { %v4254_v33 = vrot.slane %v4744_v50, 2 }
 0x82a   :  { %4531 = vmatmul.msk.f32.vlgmr.msrb.gmra.mxu3 %vm3669_vm1, %v4254_v33 }
 0x8ad   :  { %v4274_v5 = vpop.f32.mrf.mxu3 }
 0x8ae   :  { %v4278_v40 = vrot.slane %v4274_v5, 4 }
 0x8b0   :  { %v4280_v12 = vadd.f32 %v4278_v40, %v4083_v7 }
 0x8b2   :  { %4745 = vtanh.f32 %v4280_v12 }
 0x8b8   :  { %v4746_v23 = vpop.eup %4745 }
 0x8b9   :  { %v4283_v11 = vrot.slane %v4746_v23, 4 }
 0x8bb   :  { %4532 = vmatmul.msk.f32.vlgmr.msrb.gmra.mxu1 %vm3669_vm1, %v4283_v11 }
 0x938   :  { %v4303_v51 = vpop.f32.mrf.mxu1 }
 0x939   :  { %v4307_v25 = vrot.slane %v4303_v51, 2 }
 0x93b   :  { %v4309_v62 = vadd.f32 %v4307_v25, %v4083_v7 }
 0x93d   :  { %4747 = vtanh.f32 %v4309_v62 }
 0x943   :  { %v4748_v36 = vpop.eup %4747 }
 0x944   :  { %v4320_v28 = vrot.slane %v4748_v36, 6 }
 0x946   :  { %4533 = vmatmul.msk.f32.vlgmr.msra.gmra.mxu2 %vm3669_vm1, %v4320_v28 }
 0x9c9   :  { %v4340_v46 = vpop.f32.mrf.mxu2 }
 0x9ca   :  { %v4341_v24 = vadd.f32 %v4731_v44, %v4340_v46 }
 0x9cc   :  { %v4343_v29 = vmax.f32 %v4341_v24, 0.0 }
 0x9ce   :  { %4534 = vmatmul.msk.f32.vlgmr.msra.gmra.mxu3 %vm2755_vm0, %v4343_v29 }
 0xa51   :  { %v4376_v38 = vpop.f32.mrf.mxu3 }
 0xa52   :  { %v4377_v10 = vadd.f32 %v4732_v21, %v4376_v38 }
 0xa54   :  { %4379 = vst [vmem:[#allocation2] sm:$0x3] %v4377_v10 }
 0xa55   :  { %4390 = dma.vmem_to_hbm [thread:$0]  %s4386_s14, 32, %s4388_s11, [#allocation3]  }
 0xa56   :  { %4832 = dma.done.wait [#allocation3], 32  }
 0xa57   :  { %4833 = vsyncadd [#allocation3], 4294967264 }
 0xa58   :  { %4395 = vsyncpa [#allocation3], 1 }

</bundles_post_ra>
